<compile_context>
chip_gen: v5e
topology: v5e:2x2
jax: 0.10.0
libtpu: 0.0.40
codegen_flags: <defaults>
</compile_context>

<pallas_src>
import functools

import jax
import jax.numpy as jnp
import numpy as np
from jax.experimental import pallas as pl
from jax.experimental.pallas import tpu as pltpu

EPS = 1e-5
LANE = 128


def _round_up(x, m):
    return (x + m - 1) // m * m


def _pick_tm(m):
    """Largest row tile (multiple of 8) dividing m exactly; else the full m."""
    if m % 8:
        return m
    for tm in (1024, 512, 256, 128, 64, 32, 16, 8):
        if m % tm == 0:
            return tm
    return m


def _vmem_limit():
    """~3/4 of physical VMEM (~96 MiB on v5e/v6e, ~48 MiB on v7x)."""
    try:
        cap = int(pltpu.get_tpu_info().vmem_capacity_bytes)
    except Exception:
        cap = 64 * 1024 * 1024
    return min((cap * 3) // 4, 100 * 1024 * 1024)


# --------------- Kernel A: fused conv (shifted-tap matmuls) + BN stats -------------- #
def conv_stats(plane_arrays, taps, w_taps, *, Ho, Wo):
    """Conv as shifted matmuls over raw NHWC planes + per-channel sum / sumsq.

    plane_arrays: list of (B, Hpp, Wpp, Cinp) bf16 arrays (1 plane for stride 1,
        s*s parity planes for stride s) -- no im2col expansion in HBM.
    taps: list of (plane_index, row_offset, col_offset), ordered like w_taps.
    w_taps: (ntaps, Cinp, Coutp) bf16.
    Returns: y_raw (B, Ho*Wo, Coutp) bf16, sum (1, Coutp) f32, sumsq (1, Coutp) f32.
    """
    P = len(plane_arrays)
    ntaps = len(taps)
    B = plane_arrays[0].shape[0]
    cinp = plane_arrays[0].shape[-1]
    coutp = w_taps.shape[-1]
    if coutp <= 512:
        tn = coutp
    elif coutp % 256 == 0:
        tn = 256
    else:
        tn = 128
    nc = coutp // tn
    mimg = Ho * Wo

    def kernel(*refs):
        plane_refs = refs[:P]
        w_ref = refs[P]
        y_ref, s_ref, q_ref = refs[P + 1:]

        @pl.when(pl.program_id(1) == 0)   # first image of this channel block
        def _init():
            s_ref[...] = jnp.zeros_like(s_ref)
            q_ref[...] = jnp.zeros_like(q_ref)

        acc = None
        for t, (p, di, dj) in enumerate(taps):
            lhs = plane_refs[p][0, di:di + Ho, dj:dj + Wo, :].reshape(mimg, cinp)
            d = jnp.dot(lhs, w_ref[t], preferred_element_type=jnp.float32)
            acc = d if acc is None else acc + d
        y_ref[0] = acc.astype(y_ref.dtype)
        s_ref[...] += jnp.sum(acc, axis=0, keepdims=True)
        q_ref[...] += jnp.sum(acc * acc, axis=0, keepdims=True)

    plane_specs = [
        pl.BlockSpec((1,) + p.shape[1:], lambda c, b: (b, 0, 0, 0))
        for p in plane_arrays
    ]
    # TODO(synk): pipeline_mode=pl.Buffered(1) on the weight spec would halve its
    # VMEM footprint (constant index_map); left at the default for portability.
    w_spec = pl.BlockSpec((ntaps, cinp, tn), lambda c, b: (0, 0, c))

    flops = 2 * ntaps * B * mimg * cinp * coutp
    bytes_accessed = (sum(int(p.size) for p in plane_arrays) * 2
                      + int(w_taps.size) * 2 + B * mimg * coutp * 2 + 2 * coutp * 4)

    return pl.pallas_call(
        kernel,
        out_shape=(
            jax.ShapeDtypeStruct((B, mimg, coutp), jnp.bfloat16),
            jax.ShapeDtypeStruct((1, coutp), jnp.float32),
            jax.ShapeDtypeStruct((1, coutp), jnp.float32),
        ),
        grid=(nc, B),
        in_specs=plane_specs + [w_spec],
        out_specs=(
            pl.BlockSpec((1, mimg, tn), lambda c, b: (b, 0, c)),
            pl.BlockSpec((1, tn), lambda c, b: (0, c)),
            pl.BlockSpec((1, tn), lambda c, b: (0, c)),
        ),
        compiler_params=pltpu.CompilerParams(
            # Channel blocks are independent ("parallel", megacore-shardable);
            # BN stats accumulate over the batch axis ("arbitrary").
            # TODO(synk): for v7x also split the batch axis across cores with
            # per-core partial stats combined in the wrapper.
            dimension_semantics=("parallel", "arbitrary"),
            vmem_limit_bytes=_vmem_limit(),
        ),
        cost_estimate=pl.CostEstimate(
            flops=flops, transcendentals=0, bytes_accessed=bytes_accessed),
    )(*plane_arrays, w_taps)


# ---------- Kernel B: BN apply (scale/shift) + fused residual + ReLU ---------------- #
def bn_apply(y, scale, shift, *, relu, residual=None):
    """Lane-dense y*scale+shift (+ residual) (+ ReLU); bf16 in/out, f32 math."""
    m, coutp = y.shape
    tm = _pick_tm(m)
    row_spec = pl.BlockSpec((tm, coutp), lambda i: (i, 0))
    vec_spec = pl.BlockSpec((1, coutp), lambda i: (0, 0))

    mode = "none" if residual is None else residual[0]
    inputs = [y, scale, shift]
    in_specs = [row_spec, vec_spec, vec_spec]
    if mode == "identity":
        inputs.append(residual[1])
        in_specs.append(row_spec)
    elif mode == "bn":
        _, r, rsc, rsh = residual
        inputs += [r, rsc, rsh]
        in_specs += [row_spec, vec_spec, vec_spec]

    def kernel(*refs):
        if mode == "none":
            y_ref, sc_ref, sh_ref, o_ref = refs
        elif mode == "identity":
            y_ref, sc_ref, sh_ref, r_ref, o_ref = refs
        else:
            y_ref, sc_ref, sh_ref, r_ref, rsc_ref, rsh_ref, o_ref = refs
        out = y_ref[...].astype(jnp.float32) * sc_ref[...] + sh_ref[...]
        if mode == "identity":
            out = out + r_ref[...].astype(jnp.float32)
        elif mode == "bn":
            out = out + (r_ref[...].astype(jnp.float32) * rsc_ref[...] + rsh_ref[...])
        if relu:
            out = jnp.maximum(out, 0.0)
        o_ref[...] = out.astype(o_ref.dtype)

    bytes_accessed = (sum(int(a.size) * a.dtype.itemsize for a in inputs)
                      + m * coutp * 2)
    return pl.pallas_call(
        kernel,
        out_shape=jax.ShapeDtypeStruct((m, coutp), jnp.bfloat16),
        grid=(m // tm,),
        in_specs=in_specs,
        out_specs=row_spec,
        compiler_params=pltpu.CompilerParams(
            dimension_semantics=("parallel",),
            vmem_limit_bytes=_vmem_limit(),
        ),
        cost_estimate=pl.CostEstimate(
            flops=8 * m * coutp, transcendentals=0, bytes_accessed=bytes_accessed),
    )(*inputs)


# ----------------------------------- JAX glue --------------------------------------- #
def _prep_conv_weight(w_oihw, cinp, coutp):
    # (Cout, Cin, kh, kw) -> (kh*kw, Cin_pad, Cout_pad) bf16, tap order t = kh*3 + kw.
    co, ci, kh, kw = w_oihw.shape
    w = jnp.transpose(w_oihw, (2, 3, 1, 0)).reshape(kh * kw, ci, co)
    return jnp.pad(w.astype(jnp.bfloat16), ((0, 0), (0, cinp - ci), (0, coutp - co)))


def _make_planes(x, stride):
    """Pad spatially (+1 halo) and split into stride-parity planes.

    x: (B, H, W, Cp) bf16.  Every 3x3 tap then reads its plane at a plain,
    unstrided static offset; total plane bytes == input bytes.
    """
    B, H, W, _ = x.shape
    s = stride
    hp = _round_up(H + 2, s)
    wp = _round_up(W + 2, s)
    xp = jnp.pad(x, ((0, 0), (1, hp - H - 1), (1, wp - W - 1), (0, 0)))
    if s == 1:
        planes = [xp]
    else:
        planes = [xp[:, i::s, j::s, :] for i in range(s) for j in range(s)]
    taps = [((i % s) * s + (j % s), i // s, j // s)
            for i in range(3) for j in range(3)]
    return planes, taps


def _bn_scale_shift(s, q, gamma, beta, m, coutp):
    """Per-channel scale/shift from one-pass sums (training-mode BatchNorm)."""
    n = int(gamma.size)
    g = jnp.pad(gamma.reshape(1, -1).astype(jnp.float32), ((0, 0), (0, coutp - n)))
    b = jnp.pad(beta.reshape(1, -1).astype(jnp.float32), ((0, 0), (0, coutp - n)))
    mean = s / m
    var = jnp.maximum(q / m - mean * mean, 0.0)   # clamp f32 cancellation
    scale = g * jax.lax.rsqrt(var + EPS)
    return scale, b - mean * scale


@functools.partial(jax.jit, static_argnames=("stride",))
def residual_block_forward(x_nchw, params, *, stride):
    """Pallas implementation of ResidualBlock.forward.  x: NCHW float32."""
    B, cin, H, W = x_nchw.shape
    planes_n = params["w1"].shape[0]
    cinp = _round_up(cin, LANE)
    coutp = _round_up(planes_n, LANE)

    # Single fused producer: NCHW->NHWC, bf16 cast, channel pad (one HBM pass).
    x_pc = jnp.pad(jnp.transpose(x_nchw, (0, 2, 3, 1)).astype(jnp.bfloat16),
                   ((0, 0), (0, 0), (0, 0), (0, cinp - cin)))

    Ho = (H - 1) // stride + 1
    Wo = (W - 1) // stride + 1
    M = B * Ho * Wo

    # conv1 (3x3, stride) + one-pass BN stats, then BN + ReLU.
    planes1, taps1 = _make_planes(x_pc, stride)
    y1_raw, s1, q1 = conv_stats(planes1, taps1,
                                _prep_conv_weight(params["w1"], cinp, coutp),
                                Ho=Ho, Wo=Wo)
    sc1, sh1 = _bn_scale_shift(s1, q1, params["g1"], params["b1"], M, coutp)
    y1 = bn_apply(y1_raw.reshape(M, coutp), sc1, sh1, relu=True)

    # conv2 (3x3, stride 1) + stats.
    planes2, taps2 = _make_planes(y1.reshape(B, Ho, Wo, coutp), 1)
    y2_raw, s2, q2 = conv_stats(planes2, taps2,
                                _prep_conv_weight(params["w2"], coutp, coutp),
                                Ho=Ho, Wo=Wo)
    sc2, sh2 = _bn_scale_shift(s2, q2, params["g2"], params["b2"], M, coutp)

    # Skip connection, fused into the final BN-apply kernel (never materialized).
    if stride != 1 or cin != planes_n:
        xd = x_pc[:, ::stride, ::stride, :]            # 1x1 conv input, no im2col
        yd_raw, sd, qd = conv_stats([xd], [(0, 0, 0)],
                                    _prep_conv_weight(params["wd"], cinp, coutp),
                                    Ho=Ho, Wo=Wo)
        scd, shd = _bn_scale_shift(sd, qd, params["gd"], params["bd"], M, coutp)
        residual = ("bn", yd_raw.reshape(M, coutp), scd, shd)
    else:
        residual = ("identity", x_pc.reshape(M, cinp))  # no extra pad / copy

    out = bn_apply(y2_raw.reshape(M, coutp), sc2, sh2, relu=True, residual=residual)
    out = out.reshape(B, Ho, Wo, coutp)[..., :planes_n]
    # TODO(synk): in a full ResNet, keep the bf16 (B, Ho, Wo, Cp) layout between
    # blocks; the NCHW conversion here is only the single-block boundary.
    return jnp.transpose(out, (0, 3, 1, 2)).astype(jnp.float32)


# ------------------------------- pure-JAX references -------------------------------- #
def _ref_conv(x, w, stride, pad, dtype):
    return jax.lax.conv_general_dilated(
        x.astype(dtype), w.astype(dtype), (stride, stride),
        [(pad, pad), (pad, pad)],
        dimension_numbers=("NCHW", "OIHW", "NCHW"),
        preferred_element_type=jnp.float32)


def _ref_bn(x, g, b):
    mean = x.mean(axis=(0, 2, 3), keepdims=True)
    var = jnp.square(x - mean).mean(axis=(0, 2, 3), keepdims=True)
    return ((x - mean) * jax.lax.rsqrt(var + EPS) * g.reshape(1, -1, 1, 1)
            + b.reshape(1, -1, 1, 1))


def residual_block_ref(x, params, *, stride, conv_dtype=jnp.float32):
    in_planes = x.shape[1]
    planes_n = params["w1"].shape[0]
    y = jax.nn.relu(_ref_bn(_ref_conv(x, params["w1"], stride, 1, conv_dtype),
                            params["g1"], params["b1"]))
    y = _ref_bn(_ref_conv(y, params["w2"], 1, 1, conv_dtype),
                params["g2"], params["b2"])
    if stride != 1 or in_planes != planes_n:
        skip = _ref_bn(_ref_conv(x, params["wd"], stride, 0, conv_dtype),
                       params["gd"], params["bd"])
    else:
        skip = x
    return jax.nn.relu(y + skip)


# --------------------------------------- main --------------------------------------- #
def _make_params(key, in_planes, planes, downsample):
    ks = jax.random.split(key, 9)
    params = {
        "w1": 0.1 * jax.random.normal(ks[0], (planes, in_planes, 3, 3), jnp.float32),
        "w2": 0.1 * jax.random.normal(ks[1], (planes, planes, 3, 3), jnp.float32),
        "g1": 1.0 + 0.1 * jax.random.normal(ks[2], (1, planes), jnp.float32),
        "b1": 0.1 * jax.random.normal(ks[3], (1, planes), jnp.float32),
        "g2": 1.0 + 0.1 * jax.random.normal(ks[4], (1, planes), jnp.float32),
        "b2": 0.1 * jax.random.normal(ks[5], (1, planes), jnp.float32),
    }
    if downsample:
        params["wd"] = 0.1 * jax.random.normal(ks[6], (planes, in_planes, 1, 1), jnp.float32)
        params["gd"] = 1.0 + 0.1 * jax.random.normal(ks[7], (1, planes), jnp.float32)
        params["bd"] = 0.1 * jax.random.normal(ks[8], (1, planes), jnp.float32)
    return params


def _run_case(key, *, B, in_planes, planes, H, W, stride):
    kp, kx = jax.random.split(key)
    downsample = stride != 1 or in_planes != planes
    params = _make_params(kp, in_planes, planes, downsample)
    x = jax.random.normal(kx, (B, in_planes, H, W), jnp.float32)

    out = jax.block_until_ready(residual_block_forward(x, params, stride=stride))
    Ho = (H - 1) // stride + 1
    assert out.shape == (B, planes, Ho, Ho), out.shape

    out_np = np.asarray(out)
    # Tight check vs. a reference that uses the same bf16 conv operands.
    ref_bf16 = np.asarray(residual_block_ref(x, params, stride=stride,
                                             conv_dtype=jnp.bfloat16))
    np.testing.assert_allclose(out_np, ref_bf16, rtol=2e-2, atol=2e-2)
    # Loose check vs. the exact f32 (PyTorch-semantics) reference; tolerance is
    # widened because the kernel's MXU operands / intermediates are bf16.
    ref_f32 = np.asarray(residual_block_ref(x, params, stride=stride,
                                            conv_dtype=jnp.float32))
    np.testing.assert_allclose(out_np, ref_f32, rtol=6e-2, atol=6e-2)


if __name__ == "__main__":
    key = jax.random.PRNGKey(0)
    k1, k2 = jax.random.split(key)
    # Downsample path (stride 2, channel expansion) and identity-skip path.
    _run_case(k1, B=2, in_planes=4, planes=8, H=16, W=16, stride=2)
    _run_case(k2, B=2, in_planes=8, planes=8, H=16, W=16, stride=1)
    print("KERNEL_OK")
</pallas_src>

<mosaic_0001>
module attributes {stable_mosaic.version = 11 : i64} {
  func.func @kernel(%arg0: i32, %arg1: i32, %arg2: memref<1x9x9x128xbf16, #tpu.memory_space<vmem>>, %arg3: memref<1x9x9x128xbf16, #tpu.memory_space<vmem>>, %arg4: memref<1x9x9x128xbf16, #tpu.memory_space<vmem>>, %arg5: memref<1x9x9x128xbf16, #tpu.memory_space<vmem>>, %arg6: memref<9x128x128xbf16, #tpu.memory_space<vmem>>, %arg7: memref<1x64x128xbf16, #tpu.memory_space<vmem>>, %arg8: memref<1x128xf32, #tpu.memory_space<vmem>>, %arg9: memref<1x128xf32, #tpu.memory_space<vmem>>) attributes {dimension_semantics = [#tpu.dimension_semantics<parallel>, #tpu.dimension_semantics<arbitrary>], iteration_bounds = array<i64: 1, 2>, scalar_prefetch = 0 : i64, scratch_operands = 0 : i64, tpu.core_type = #tpu.core_type<tc>, window_params = [{transform_indices = @transform_0, window_bounds = array<i64: 1, 9, 9, 128>}, {transform_indices = @transform_1, window_bounds = array<i64: 1, 9, 9, 128>}, {transform_indices = @transform_2, window_bounds = array<i64: 1, 9, 9, 128>}, {transform_indices = @transform_3, window_bounds = array<i64: 1, 9, 9, 128>}, {transform_indices = @transform_4, window_bounds = array<i64: 9, 128, 128>}, {transform_indices = @transform_5, window_bounds = array<i64: 1, 64, 128>}, {transform_indices = @transform_6, window_bounds = array<i64: 1, 128>}, {transform_indices = @transform_7, window_bounds = array<i64: 1, 128>}]} {
    %c0_i32 = arith.constant 0 : i32
    %0 = arith.cmpi eq, %arg1, %c0_i32 : i32
    %1 = arith.extui %0 : i1 to i32
    %c0_i32_0 = arith.constant 0 : i32
    %2 = arith.cmpi ne, %1, %c0_i32_0 : i32
    scf.if %2 {
      %cst_76 = arith.constant 0.000000e+00 : f32
      %80 = vector.broadcast %cst_76 : f32 to vector<1x128xf32>
      %c0_77 = arith.constant 0 : index
      %c0_78 = arith.constant 0 : index
      %81 = vector.load %arg8[%c0_77, %c0_78] : memref<1x128xf32, #tpu.memory_space<vmem>>, vector<1x128xf32>
      tpu.vector_store %arg8[%c0_77, %c0_78], %80 {strides = array<i32>} : memref<1x128xf32, #tpu.memory_space<vmem>>, vector<1x128xf32>,
      %cst_79 = arith.constant 0.000000e+00 : f32
      %82 = vector.broadcast %cst_79 : f32 to vector<1x128xf32>
      %c0_80 = arith.constant 0 : index
      %c0_81 = arith.constant 0 : index
      %83 = vector.load %arg9[%c0_80, %c0_81] : memref<1x128xf32, #tpu.memory_space<vmem>>, vector<1x128xf32>
      tpu.vector_store %arg9[%c0_80, %c0_81], %82 {strides = array<i32>} : memref<1x128xf32, #tpu.memory_space<vmem>>, vector<1x128xf32>,
    } else {
    }
    %c0 = arith.constant 0 : index
    %c0_1 = arith.constant 0 : index
    %c0_2 = arith.constant 0 : index
    %c0_3 = arith.constant 0 : index
    %3 = vector.load %arg2[%c0, %c0_1, %c0_2, %c0_3] : memref<1x9x9x128xbf16, #tpu.memory_space<vmem>>, vector<1x8x8x128xbf16>
    %4 = vector.shape_cast %3 : vector<1x8x8x128xbf16> to vector<8x8x128xbf16>
    %5 = vector.shape_cast %4 : vector<8x8x128xbf16> to vector<64x128xbf16>
    %c0_4 = arith.constant 0 : index
    %c0_5 = arith.constant 0 : index
    %c0_6 = arith.constant 0 : index
    %6 = vector.load %arg6[%c0_4, %c0_5, %c0_6] : memref<9x128x128xbf16, #tpu.memory_space<vmem>>, vector<1x128x128xbf16>
    %7 = vector.shape_cast %6 : vector<1x128x128xbf16> to vector<128x128xbf16>
    %cst = arith.constant dense<0.000000e+00> : vector<64x128xf32>
    %8 = tpu.matmul %5, %7, %cst {dimension_numbers = #tpu.dot_dimension_numbers<[1], [0], [0], [1], [0, 0, 1, 1], [], []>} : vector<64x128xbf16>, vector<128x128xbf16>, vector<64x128xf32> -> vector<64x128xf32>
    %c0_7 = arith.constant 0 : index
    %c0_8 = arith.constant 0 : index
    %c0_9 = arith.constant 0 : index
    %c0_10 = arith.constant 0 : index
    %9 = vector.load %arg3[%c0_7, %c0_8, %c0_9, %c0_10] : memref<1x9x9x128xbf16, #tpu.memory_space<vmem>>, vector<1x8x8x128xbf16>
    %10 = vector.shape_cast %9 : vector<1x8x8x128xbf16> to vector<8x8x128xbf16>
    %11 = vector.shape_cast %10 : vector<8x8x128xbf16> to vector<64x128xbf16>
    %c1 = arith.constant 1 : index
    %c0_11 = arith.constant 0 : index
    %c0_12 = arith.constant 0 : index
    %12 = vector.load %arg6[%c1, %c0_11, %c0_12] : memref<9x128x128xbf16, #tpu.memory_space<vmem>>, vector<1x128x128xbf16>
    %13 = vector.shape_cast %12 : vector<1x128x128xbf16> to vector<128x128xbf16>
    %cst_13 = arith.constant dense<0.000000e+00> : vector<64x128xf32>
    %14 = tpu.matmul %11, %13, %cst_13 {dimension_numbers = #tpu.dot_dimension_numbers<[1], [0], [0], [1], [0, 0, 1, 1], [], []>} : vector<64x128xbf16>, vector<128x128xbf16>, vector<64x128xf32> -> vector<64x128xf32>
    %15 = arith.addf %8, %14 : vector<64x128xf32>
    %c0_14 = arith.constant 0 : index
    %c0_15 = arith.constant 0 : index
    %c1_16 = arith.constant 1 : index
    %c0_17 = arith.constant 0 : index
    %16 = vector.load %arg2[%c0_14, %c0_15, %c1_16, %c0_17] : memref<1x9x9x128xbf16, #tpu.memory_space<vmem>>, vector<1x8x8x128xbf16>
    %17 = vector.shape_cast %16 : vector<1x8x8x128xbf16> to vector<8x8x128xbf16>
    %18 = vector.shape_cast %17 : vector<8x8x128xbf16> to vector<64x128xbf16>
    %c2 = arith.constant 2 : index
    %c0_18 = arith.constant 0 : index
    %c0_19 = arith.constant 0 : index
    %19 = vector.load %arg6[%c2, %c0_18, %c0_19] : memref<9x128x128xbf16, #tpu.memory_space<vmem>>, vector<1x128x128xbf16>
    %20 = vector.shape_cast %19 : vector<1x128x128xbf16> to vector<128x128xbf16>
    %cst_20 = arith.constant dense<0.000000e+00> : vector<64x128xf32>
    %21 = tpu.matmul %18, %20, %cst_20 {dimension_numbers = #tpu.dot_dimension_numbers<[1], [0], [0], [1], [0, 0, 1, 1], [], []>} : vector<64x128xbf16>, vector<128x128xbf16>, vector<64x128xf32> -> vector<64x128xf32>
    %22 = arith.addf %15, %21 : vector<64x128xf32>
    %c0_21 = arith.constant 0 : index
    %c0_22 = arith.constant 0 : index
    %c0_23 = arith.constant 0 : index
    %c0_24 = arith.constant 0 : index
    %23 = vector.load %arg4[%c0_21, %c0_22, %c0_23, %c0_24] : memref<1x9x9x128xbf16, #tpu.memory_space<vmem>>, vector<1x8x8x128xbf16>
    %24 = vector.shape_cast %23 : vector<1x8x8x128xbf16> to vector<8x8x128xbf16>
    %25 = vector.shape_cast %24 : vector<8x8x128xbf16> to vector<64x128xbf16>
    %c3 = arith.constant 3 : index
    %c0_25 = arith.constant 0 : index
    %c0_26 = arith.constant 0 : index
    %26 = vector.load %arg6[%c3, %c0_25, %c0_26] : memref<9x128x128xbf16, #tpu.memory_space<vmem>>, vector<1x128x128xbf16>
    %27 = vector.shape_cast %26 : vector<1x128x128xbf16> to vector<128x128xbf16>
    %cst_27 = arith.constant dense<0.000000e+00> : vector<64x128xf32>
    %28 = tpu.matmul %25, %27, %cst_27 {dimension_numbers = #tpu.dot_dimension_numbers<[1], [0], [0], [1], [0, 0, 1, 1], [], []>} : vector<64x128xbf16>, vector<128x128xbf16>, vector<64x128xf32> -> vector<64x128xf32>
    %29 = arith.addf %22, %28 : vector<64x128xf32>
    %c0_28 = arith.constant 0 : index
    %c0_29 = arith.constant 0 : index
    %c0_30 = arith.constant 0 : index
    %c0_31 = arith.constant 0 : index
    %30 = vector.load %arg5[%c0_28, %c0_29, %c0_30, %c0_31] : memref<1x9x9x128xbf16, #tpu.memory_space<vmem>>, vector<1x8x8x128xbf16>
    %31 = vector.shape_cast %30 : vector<1x8x8x128xbf16> to vector<8x8x128xbf16>
    %32 = vector.shape_cast %31 : vector<8x8x128xbf16> to vector<64x128xbf16>
    %c4 = arith.constant 4 : index
    %c0_32 = arith.constant 0 : index
    %c0_33 = arith.constant 0 : index
    %33 = vector.load %arg6[%c4, %c0_32, %c0_33] : memref<9x128x128xbf16, #tpu.memory_space<vmem>>, vector<1x128x128xbf16>
    %34 = vector.shape_cast %33 : vector<1x128x128xbf16> to vector<128x128xbf16>
    %cst_34 = arith.constant dense<0.000000e+00> : vector<64x128xf32>
    %35 = tpu.matmul %32, %34, %cst_34 {dimension_numbers = #tpu.dot_dimension_numbers<[1], [0], [0], [1], [0, 0, 1, 1], [], []>} : vector<64x128xbf16>, vector<128x128xbf16>, vector<64x128xf32> -> vector<64x128xf32>
    %36 = arith.addf %29, %35 : vector<64x128xf32>
    %c0_35 = arith.constant 0 : index
    %c0_36 = arith.constant 0 : index
    %c1_37 = arith.constant 1 : index
    %c0_38 = arith.constant 0 : index
    %37 = vector.load %arg4[%c0_35, %c0_36, %c1_37, %c0_38] : memref<1x9x9x128xbf16, #tpu.memory_space<vmem>>, vector<1x8x8x128xbf16>
    %38 = vector.shape_cast %37 : vector<1x8x8x128xbf16> to vector<8x8x128xbf16>
    %39 = vector.shape_cast %38 : vector<8x8x128xbf16> to vector<64x128xbf16>
    %c5 = arith.constant 5 : index
    %c0_39 = arith.constant 0 : index
    %c0_40 = arith.constant 0 : index
    %40 = vector.load %arg6[%c5, %c0_39, %c0_40] : memref<9x128x128xbf16, #tpu.memory_space<vmem>>, vector<1x128x128xbf16>
    %41 = vector.shape_cast %40 : vector<1x128x128xbf16> to vector<128x128xbf16>
    %cst_41 = arith.constant dense<0.000000e+00> : vector<64x128xf32>
    %42 = tpu.matmul %39, %41, %cst_41 {dimension_numbers = #tpu.dot_dimension_numbers<[1], [0], [0], [1], [0, 0, 1, 1], [], []>} : vector<64x128xbf16>, vector<128x128xbf16>, vector<64x128xf32> -> vector<64x128xf32>
    %43 = arith.addf %36, %42 : vector<64x128xf32>
    %c0_42 = arith.constant 0 : index
    %c1_43 = arith.constant 1 : index
    %c0_44 = arith.constant 0 : index
    %c0_45 = arith.constant 0 : index
    %44 = vector.load %arg2[%c0_42, %c1_43, %c0_44, %c0_45] : memref<1x9x9x128xbf16, #tpu.memory_space<vmem>>, vector<1x8x8x128xbf16>
    %45 = vector.shape_cast %44 : vector<1x8x8x128xbf16> to vector<8x8x128xbf16>
    %46 = vector.shape_cast %45 : vector<8x8x128xbf16> to vector<64x128xbf16>
    %c6 = arith.constant 6 : index
    %c0_46 = arith.constant 0 : index
    %c0_47 = arith.constant 0 : index
    %47 = vector.load %arg6[%c6, %c0_46, %c0_47] : memref<9x128x128xbf16, #tpu.memory_space<vmem>>, vector<1x128x128xbf16>
    %48 = vector.shape_cast %47 : vector<1x128x128xbf16> to vector<128x128xbf16>
    %cst_48 = arith.constant dense<0.000000e+00> : vector<64x128xf32>
    %49 = tpu.matmul %46, %48, %cst_48 {dimension_numbers = #tpu.dot_dimension_numbers<[1], [0], [0], [1], [0, 0, 1, 1], [], []>} : vector<64x128xbf16>, vector<128x128xbf16>, vector<64x128xf32> -> vector<64x128xf32>
    %50 = arith.addf %43, %49 : vector<64x128xf32>
    %c0_49 = arith.constant 0 : index
    %c1_50 = arith.constant 1 : index
    %c0_51 = arith.constant 0 : index
    %c0_52 = arith.constant 0 : index
    %51 = vector.load %arg3[%c0_49, %c1_50, %c0_51, %c0_52] : memref<1x9x9x128xbf16, #tpu.memory_space<vmem>>, vector<1x8x8x128xbf16>
    %52 = vector.shape_cast %51 : vector<1x8x8x128xbf16> to vector<8x8x128xbf16>
    %53 = vector.shape_cast %52 : vector<8x8x128xbf16> to vector<64x128xbf16>
    %c7 = arith.constant 7 : index
    %c0_53 = arith.constant 0 : index
    %c0_54 = arith.constant 0 : index
    %54 = vector.load %arg6[%c7, %c0_53, %c0_54] : memref<9x128x128xbf16, #tpu.memory_space<vmem>>, vector<1x128x128xbf16>
    %55 = vector.shape_cast %54 : vector<1x128x128xbf16> to vector<128x128xbf16>
    %cst_55 = arith.constant dense<0.000000e+00> : vector<64x128xf32>
    %56 = tpu.matmul %53, %55, %cst_55 {dimension_numbers = #tpu.dot_dimension_numbers<[1], [0], [0], [1], [0, 0, 1, 1], [], []>} : vector<64x128xbf16>, vector<128x128xbf16>, vector<64x128xf32> -> vector<64x128xf32>
    %57 = arith.addf %50, %56 : vector<64x128xf32>
    %c0_56 = arith.constant 0 : index
    %c1_57 = arith.constant 1 : index
    %c1_58 = arith.constant 1 : index
    %c0_59 = arith.constant 0 : index
    %58 = vector.load %arg2[%c0_56, %c1_57, %c1_58, %c0_59] : memref<1x9x9x128xbf16, #tpu.memory_space<vmem>>, vector<1x8x8x128xbf16>
    %59 = vector.shape_cast %58 : vector<1x8x8x128xbf16> to vector<8x8x128xbf16>
    %60 = vector.shape_cast %59 : vector<8x8x128xbf16> to vector<64x128xbf16>
    %c8 = arith.constant 8 : index
    %c0_60 = arith.constant 0 : index
    %c0_61 = arith.constant 0 : index
    %61 = vector.load %arg6[%c8, %c0_60, %c0_61] : memref<9x128x128xbf16, #tpu.memory_space<vmem>>, vector<1x128x128xbf16>
    %62 = vector.shape_cast %61 : vector<1x128x128xbf16> to vector<128x128xbf16>
    %cst_62 = arith.constant dense<0.000000e+00> : vector<64x128xf32>
    %63 = tpu.matmul %60, %62, %cst_62 {dimension_numbers = #tpu.dot_dimension_numbers<[1], [0], [0], [1], [0, 0, 1, 1], [], []>} : vector<64x128xbf16>, vector<128x128xbf16>, vector<64x128xf32> -> vector<64x128xf32>
    %64 = arith.addf %57, %63 : vector<64x128xf32>
    %65 = arith.truncf %64 : vector<64x128xf32> to vector<64x128xbf16>
    %c0_63 = arith.constant 0 : index
    %c0_64 = arith.constant 0 : index
    %c0_65 = arith.constant 0 : index
    %66 = vector.load %arg7[%c0_63, %c0_64, %c0_65] : memref<1x64x128xbf16, #tpu.memory_space<vmem>>, vector<1x64x128xbf16>
    %67 = vector.shape_cast %66 : vector<1x64x128xbf16> to vector<64x128xbf16>
    %68 = vector.shape_cast %65 : vector<64x128xbf16> to vector<1x64x128xbf16>
    tpu.vector_store %arg7[%c0_63, %c0_64, %c0_65], %68 {strides = array<i32>} : memref<1x64x128xbf16, #tpu.memory_space<vmem>>, vector<1x64x128xbf16>,
    %c0_66 = arith.constant 0 : index
    %c0_67 = arith.constant 0 : index
    %69 = vector.load %arg8[%c0_66, %c0_67] : memref<1x128xf32, #tpu.memory_space<vmem>>, vector<1x128xf32>
    %cst_68 = arith.constant dense<0.000000e+00> : vector<128xf32>
    %70 = vector.multi_reduction <add>, %64, %cst_68 [0] : vector<64x128xf32> to vector<128xf32>
    %71 = vector.shape_cast %70 : vector<128xf32> to vector<1x128xf32>
    %72 = arith.addf %69, %71 : vector<1x128xf32>
    %c0_69 = arith.constant 0 : index
    %c0_70 = arith.constant 0 : index
    %73 = vector.load %arg8[%c0_69, %c0_70] : memref<1x128xf32, #tpu.memory_space<vmem>>, vector<1x128xf32>
    tpu.vector_store %arg8[%c0_69, %c0_70], %72 {strides = array<i32>} : memref<1x128xf32, #tpu.memory_space<vmem>>, vector<1x128xf32>,
    %c0_71 = arith.constant 0 : index
    %c0_72 = arith.constant 0 : index
    %74 = vector.load %arg9[%c0_71, %c0_72] : memref<1x128xf32, #tpu.memory_space<vmem>>, vector<1x128xf32>
    %75 = arith.mulf %64, %64 : vector<64x128xf32>
    %cst_73 = arith.constant dense<0.000000e+00> : vector<128xf32>
    %76 = vector.multi_reduction <add>, %75, %cst_73 [0] : vector<64x128xf32> to vector<128xf32>
    %77 = vector.shape_cast %76 : vector<128xf32> to vector<1x128xf32>
    %78 = arith.addf %74, %77 : vector<1x128xf32>
    %c0_74 = arith.constant 0 : index
    %c0_75 = arith.constant 0 : index
    %79 = vector.load %arg9[%c0_74, %c0_75] : memref<1x128xf32, #tpu.memory_space<vmem>>, vector<1x128xf32>
    tpu.vector_store %arg9[%c0_74, %c0_75], %78 {strides = array<i32>} : memref<1x128xf32, #tpu.memory_space<vmem>>, vector<1x128xf32>,
    return
  }
  func.func @transform_0(%arg0: i32, %arg1: i32) -> (i32, i32, i32, i32) {
    %c0_i32 = arith.constant 0 : i32
    %c0_i32_0 = arith.constant 0 : i32
    %c0_i32_1 = arith.constant 0 : i32
    %c0_i32_2 = arith.constant 0 : i32
    return %arg1, %c0_i32, %c0_i32_0, %c0_i32_1 : i32, i32, i32, i32
  }
  func.func @transform_1(%arg0: i32, %arg1: i32) -> (i32, i32, i32, i32) {
    %c0_i32 = arith.constant 0 : i32
    %c0_i32_0 = arith.constant 0 : i32
    %c0_i32_1 = arith.constant 0 : i32
    %c0_i32_2 = arith.constant 0 : i32
    return %arg1, %c0_i32, %c0_i32_0, %c0_i32_1 : i32, i32, i32, i32
  }
  func.func @transform_2(%arg0: i32, %arg1: i32) -> (i32, i32, i32, i32) {
    %c0_i32 = arith.constant 0 : i32
    %c0_i32_0 = arith.constant 0 : i32
    %c0_i32_1 = arith.constant 0 : i32
    %c0_i32_2 = arith.constant 0 : i32
    return %arg1, %c0_i32, %c0_i32_0, %c0_i32_1 : i32, i32, i32, i32
  }
  func.func @transform_3(%arg0: i32, %arg1: i32) -> (i32, i32, i32, i32) {
    %c0_i32 = arith.constant 0 : i32
    %c0_i32_0 = arith.constant 0 : i32
    %c0_i32_1 = arith.constant 0 : i32
    %c0_i32_2 = arith.constant 0 : i32
    return %arg1, %c0_i32, %c0_i32_0, %c0_i32_1 : i32, i32, i32, i32
  }
  func.func @transform_4(%arg0: i32, %arg1: i32) -> (i32, i32, i32) {
    %c0_i32 = arith.constant 0 : i32
    %c0_i32_0 = arith.constant 0 : i32
    %c0_i32_1 = arith.constant 0 : i32
    return %c0_i32, %c0_i32_0, %arg0 : i32, i32, i32
  }
  func.func @transform_5(%arg0: i32, %arg1: i32) -> (i32, i32, i32) {
    %c0_i32 = arith.constant 0 : i32
    %c0_i32_0 = arith.constant 0 : i32
    return %arg1, %c0_i32, %arg0 : i32, i32, i32
  }
  func.func @transform_6(%arg0: i32, %arg1: i32) -> (i32, i32) {
    %c0_i32 = arith.constant 0 : i32
    %c0_i32_0 = arith.constant 0 : i32
    return %c0_i32, %arg0 : i32, i32
  }
  func.func @transform_7(%arg0: i32, %arg1: i32) -> (i32, i32) {
    %c0_i32 = arith.constant 0 : i32
    %c0_i32_0 = arith.constant 0 : i32
    return %c0_i32, %arg0 : i32, i32
  }
}

module attributes {stable_mosaic.version = 11 : i64} {
  func.func @kernel(%arg0: i32, %arg1: memref<128x128xbf16, #tpu.memory_space<vmem>>, %arg2: memref<1x128xf32, #tpu.memory_space<vmem>>, %arg3: memref<1x128xf32, #tpu.memory_space<vmem>>, %arg4: memref<128x128xbf16, #tpu.memory_space<vmem>>) attributes {dimension_semantics = [#tpu.dimension_semantics<parallel>], iteration_bounds = array<i64: 1>, scalar_prefetch = 0 : i64, scratch_operands = 0 : i64, tpu.core_type = #tpu.core_type<tc>, window_params = [{transform_indices = @transform_0, window_bounds = array<i64: 128, 128>}, {pipeline_mode = #tpu.pipeline_mode<synchronous>, transform_indices = @transform_1, window_bounds = array<i64: 1, 128>}, {pipeline_mode = #tpu.pipeline_mode<synchronous>, transform_indices = @transform_2, window_bounds = array<i64: 1, 128>}, {transform_indices = @transform_3, window_bounds = array<i64: 128, 128>}]} {
    %c0 = arith.constant 0 : index
    %c0_0 = arith.constant 0 : index
    %0 = vector.load %arg1[%c0, %c0_0] : memref<128x128xbf16, #tpu.memory_space<vmem>>, vector<128x128xbf16>
    %1 = arith.extf %0 : vector<128x128xbf16> to vector<128x128xf32>
    %c0_1 = arith.constant 0 : index
    %c0_2 = arith.constant 0 : index
    %2 = vector.load %arg2[%c0_1, %c0_2] : memref<1x128xf32, #tpu.memory_space<vmem>>, vector<1x128xf32>
    %3 = vector.broadcast %2 : vector<1x128xf32> to vector<128x128xf32>
    %4 = arith.mulf %1, %3 : vector<128x128xf32>
    %c0_3 = arith.constant 0 : index
    %c0_4 = arith.constant 0 : index
    %5 = vector.load %arg3[%c0_3, %c0_4] : memref<1x128xf32, #tpu.memory_space<vmem>>, vector<1x128xf32>
    %6 = vector.broadcast %5 : vector<1x128xf32> to vector<128x128xf32>
    %7 = arith.addf %4, %6 : vector<128x128xf32>
    %cst = arith.constant 0.000000e+00 : f32
    %8 = vector.broadcast %cst : f32 to vector<128x128xf32>
    %9 = arith.maximumf %7, %8 : vector<128x128xf32>
    %10 = arith.truncf %9 : vector<128x128xf32> to vector<128x128xbf16>
    %c0_5 = arith.constant 0 : index
    %c0_6 = arith.constant 0 : index
    %11 = vector.load %arg4[%c0_5, %c0_6] : memref<128x128xbf16, #tpu.memory_space<vmem>>, vector<128x128xbf16>
    tpu.vector_store %arg4[%c0_5, %c0_6], %10 {strides = array<i32>} : memref<128x128xbf16, #tpu.memory_space<vmem>>, vector<128x128xbf16>,
    return
  }
  func.func @transform_0(%arg0: i32) -> (i32, i32) {
    %c0_i32 = arith.constant 0 : i32
    %c0_i32_0 = arith.constant 0 : i32
    return %arg0, %c0_i32 : i32, i32
  }
  func.func @transform_1(%arg0: i32) -> (i32, i32) {
    %c0_i32 = arith.constant 0 : i32
    %c0_i32_0 = arith.constant 0 : i32
    %c0_i32_1 = arith.constant 0 : i32
    return %c0_i32, %c0_i32_0 : i32, i32
  }
  func.func @transform_2(%arg0: i32) -> (i32, i32) {
    %c0_i32 = arith.constant 0 : i32
    %c0_i32_0 = arith.constant 0 : i32
    %c0_i32_1 = arith.constant 0 : i32
    return %c0_i32, %c0_i32_0 : i32, i32
  }
  func.func @transform_3(%arg0: i32) -> (i32, i32) {
    %c0_i32 = arith.constant 0 : i32
    %c0_i32_0 = arith.constant 0 : i32
    return %arg0, %c0_i32 : i32, i32
  }
}

module attributes {stable_mosaic.version = 11 : i64} {
  func.func @kernel(%arg0: i32, %arg1: i32, %arg2: memref<1x10x10x128xbf16, #tpu.memory_space<vmem>>, %arg3: memref<9x128x128xbf16, #tpu.memory_space<vmem>>, %arg4: memref<1x64x128xbf16, #tpu.memory_space<vmem>>, %arg5: memref<1x128xf32, #tpu.memory_space<vmem>>, %arg6: memref<1x128xf32, #tpu.memory_space<vmem>>) attributes {dimension_semantics = [#tpu.dimension_semantics<parallel>, #tpu.dimension_semantics<arbitrary>], iteration_bounds = array<i64: 1, 2>, scalar_prefetch = 0 : i64, scratch_operands = 0 : i64, tpu.core_type = #tpu.core_type<tc>, window_params = [{transform_indices = @transform_0, window_bounds = array<i64: 1, 10, 10, 128>}, {transform_indices = @transform_1, window_bounds = array<i64: 9, 128, 128>}, {transform_indices = @transform_2, window_bounds = array<i64: 1, 64, 128>}, {transform_indices = @transform_3, window_bounds = array<i64: 1, 128>}, {transform_indices = @transform_4, window_bounds = array<i64: 1, 128>}]} {
    %c0_i32 = arith.constant 0 : i32
    %0 = arith.cmpi eq, %arg1, %c0_i32 : i32
    %1 = arith.extui %0 : i1 to i32
    %c0_i32_0 = arith.constant 0 : i32
    %2 = arith.cmpi ne, %1, %c0_i32_0 : i32
    scf.if %2 {
      %cst_76 = arith.constant 0.000000e+00 : f32
      %80 = vector.broadcast %cst_76 : f32 to vector<1x128xf32>
      %c0_77 = arith.constant 0 : index
      %c0_78 = arith.constant 0 : index
      %81 = vector.load %arg5[%c0_77, %c0_78] : memref<1x128xf32, #tpu.memory_space<vmem>>, vector<1x128xf32>
      tpu.vector_store %arg5[%c0_77, %c0_78], %80 {strides = array<i32>} : memref<1x128xf32, #tpu.memory_space<vmem>>, vector<1x128xf32>,
      %cst_79 = arith.constant 0.000000e+00 : f32
      %82 = vector.broadcast %cst_79 : f32 to vector<1x128xf32>
      %c0_80 = arith.constant 0 : index
      %c0_81 = arith.constant 0 : index
      %83 = vector.load %arg6[%c0_80, %c0_81] : memref<1x128xf32, #tpu.memory_space<vmem>>, vector<1x128xf32>
      tpu.vector_store %arg6[%c0_80, %c0_81], %82 {strides = array<i32>} : memref<1x128xf32, #tpu.memory_space<vmem>>, vector<1x128xf32>,
    } else {
    }
    %c0 = arith.constant 0 : index
    %c0_1 = arith.constant 0 : index
    %c0_2 = arith.constant 0 : index
    %c0_3 = arith.constant 0 : index
    %3 = vector.load %arg2[%c0, %c0_1, %c0_2, %c0_3] : memref<1x10x10x128xbf16, #tpu.memory_space<vmem>>, vector<1x8x8x128xbf16>
    %4 = vector.shape_cast %3 : vector<1x8x8x128xbf16> to vector<8x8x128xbf16>
    %5 = vector.shape_cast %4 : vector<8x8x128xbf16> to vector<64x128xbf16>
    %c0_4 = arith.constant 0 : index
    %c0_5 = arith.constant 0 : index
    %c0_6 = arith.constant 0 : index
    %6 = vector.load %arg3[%c0_4, %c0_5, %c0_6] : memref<9x128x128xbf16, #tpu.memory_space<vmem>>, vector<1x128x128xbf16>
    %7 = vector.shape_cast %6 : vector<1x128x128xbf16> to vector<128x128xbf16>
    %cst = arith.constant dense<0.000000e+00> : vector<64x128xf32>
    %8 = tpu.matmul %5, %7, %cst {dimension_numbers = #tpu.dot_dimension_numbers<[1], [0], [0], [1], [0, 0, 1, 1], [], []>} : vector<64x128xbf16>, vector<128x128xbf16>, vector<64x128xf32> -> vector<64x128xf32>
    %c0_7 = arith.constant 0 : index
    %c0_8 = arith.constant 0 : index
    %c1 = arith.constant 1 : index
    %c0_9 = arith.constant 0 : index
    %9 = vector.load %arg2[%c0_7, %c0_8, %c1, %c0_9] : memref<1x10x10x128xbf16, #tpu.memory_space<vmem>>, vector<1x8x8x128xbf16>
    %10 = vector.shape_cast %9 : vector<1x8x8x128xbf16> to vector<8x8x128xbf16>
    %11 = vector.shape_cast %10 : vector<8x8x128xbf16> to vector<64x128xbf16>
    %c1_10 = arith.constant 1 : index
    %c0_11 = arith.constant 0 : index
    %c0_12 = arith.constant 0 : index
    %12 = vector.load %arg3[%c1_10, %c0_11, %c0_12] : memref<9x128x128xbf16, #tpu.memory_space<vmem>>, vector<1x128x128xbf16>
    %13 = vector.shape_cast %12 : vector<1x128x128xbf16> to vector<128x128xbf16>
    %cst_13 = arith.constant dense<0.000000e+00> : vector<64x128xf32>
    %14 = tpu.matmul %11, %13, %cst_13 {dimension_numbers = #tpu.dot_dimension_numbers<[1], [0], [0], [1], [0, 0, 1, 1], [], []>} : vector<64x128xbf16>, vector<128x128xbf16>, vector<64x128xf32> -> vector<64x128xf32>
    %15 = arith.addf %8, %14 : vector<64x128xf32>
    %c0_14 = arith.constant 0 : index
    %c0_15 = arith.constant 0 : index
    %c2 = arith.constant 2 : index
    %c0_16 = arith.constant 0 : index
    %16 = vector.load %arg2[%c0_14, %c0_15, %c2, %c0_16] : memref<1x10x10x128xbf16, #tpu.memory_space<vmem>>, vector<1x8x8x128xbf16>
    %17 = vector.shape_cast %16 : vector<1x8x8x128xbf16> to vector<8x8x128xbf16>
    %18 = vector.shape_cast %17 : vector<8x8x128xbf16> to vector<64x128xbf16>
    %c2_17 = arith.constant 2 : index
    %c0_18 = arith.constant 0 : index
    %c0_19 = arith.constant 0 : index
    %19 = vector.load %arg3[%c2_17, %c0_18, %c0_19] : memref<9x128x128xbf16, #tpu.memory_space<vmem>>, vector<1x128x128xbf16>
    %20 = vector.shape_cast %19 : vector<1x128x128xbf16> to vector<128x128xbf16>
    %cst_20 = arith.constant dense<0.000000e+00> : vector<64x128xf32>
    %21 = tpu.matmul %18, %20, %cst_20 {dimension_numbers = #tpu.dot_dimension_numbers<[1], [0], [0], [1], [0, 0, 1, 1], [], []>} : vector<64x128xbf16>, vector<128x128xbf16>, vector<64x128xf32> -> vector<64x128xf32>
    %22 = arith.addf %15, %21 : vector<64x128xf32>
    %c0_21 = arith.constant 0 : index
    %c1_22 = arith.constant 1 : index
    %c0_23 = arith.constant 0 : index
    %c0_24 = arith.constant 0 : index
    %23 = vector.load %arg2[%c0_21, %c1_22, %c0_23, %c0_24] : memref<1x10x10x128xbf16, #tpu.memory_space<vmem>>, vector<1x8x8x128xbf16>
    %24 = vector.shape_cast %23 : vector<1x8x8x128xbf16> to vector<8x8x128xbf16>
    %25 = vector.shape_cast %24 : vector<8x8x128xbf16> to vector<64x128xbf16>
    %c3 = arith.constant 3 : index
    %c0_25 = arith.constant 0 : index
    %c0_26 = arith.constant 0 : index
    %26 = vector.load %arg3[%c3, %c0_25, %c0_26] : memref<9x128x128xbf16, #tpu.memory_space<vmem>>, vector<1x128x128xbf16>
    %27 = vector.shape_cast %26 : vector<1x128x128xbf16> to vector<128x128xbf16>
    %cst_27 = arith.constant dense<0.000000e+00> : vector<64x128xf32>
    %28 = tpu.matmul %25, %27, %cst_27 {dimension_numbers = #tpu.dot_dimension_numbers<[1], [0], [0], [1], [0, 0, 1, 1], [], []>} : vector<64x128xbf16>, vector<128x128xbf16>, vector<64x128xf32> -> vector<64x128xf32>
    %29 = arith.addf %22, %28 : vector<64x128xf32>
    %c0_28 = arith.constant 0 : index
    %c1_29 = arith.constant 1 : index
    %c1_30 = arith.constant 1 : index
    %c0_31 = arith.constant 0 : index
    %30 = vector.load %arg2[%c0_28, %c1_29, %c1_30, %c0_31] : memref<1x10x10x128xbf16, #tpu.memory_space<vmem>>, vector<1x8x8x128xbf16>
    %31 = vector.shape_cast %30 : vector<1x8x8x128xbf16> to vector<8x8x128xbf16>
    %32 = vector.shape_cast %31 : vector<8x8x128xbf16> to vector<64x128xbf16>
    %c4 = arith.constant 4 : index
    %c0_32 = arith.constant 0 : index
    %c0_33 = arith.constant 0 : index
    %33 = vector.load %arg3[%c4, %c0_32, %c0_33] : memref<9x128x128xbf16, #tpu.memory_space<vmem>>, vector<1x128x128xbf16>
    %34 = vector.shape_cast %33 : vector<1x128x128xbf16> to vector<128x128xbf16>
    %cst_34 = arith.constant dense<0.000000e+00> : vector<64x128xf32>
    %35 = tpu.matmul %32, %34, %cst_34 {dimension_numbers = #tpu.dot_dimension_numbers<[1], [0], [0], [1], [0, 0, 1, 1], [], []>} : vector<64x128xbf16>, vector<128x128xbf16>, vector<64x128xf32> -> vector<64x128xf32>
    %36 = arith.addf %29, %35 : vector<64x128xf32>
    %c0_35 = arith.constant 0 : index
    %c1_36 = arith.constant 1 : index
    %c2_37 = arith.constant 2 : index
    %c0_38 = arith.constant 0 : index
    %37 = vector.load %arg2[%c0_35, %c1_36, %c2_37, %c0_38] : memref<1x10x10x128xbf16, #tpu.memory_space<vmem>>, vector<1x8x8x128xbf16>
    %38 = vector.shape_cast %37 : vector<1x8x8x128xbf16> to vector<8x8x128xbf16>
    %39 = vector.shape_cast %38 : vector<8x8x128xbf16> to vector<64x128xbf16>
    %c5 = arith.constant 5 : index
    %c0_39 = arith.constant 0 : index
    %c0_40 = arith.constant 0 : index
    %40 = vector.load %arg3[%c5, %c0_39, %c0_40] : memref<9x128x128xbf16, #tpu.memory_space<vmem>>, vector<1x128x128xbf16>
    %41 = vector.shape_cast %40 : vector<1x128x128xbf16> to vector<128x128xbf16>
    %cst_41 = arith.constant dense<0.000000e+00> : vector<64x128xf32>
    %42 = tpu.matmul %39, %41, %cst_41 {dimension_numbers = #tpu.dot_dimension_numbers<[1], [0], [0], [1], [0, 0, 1, 1], [], []>} : vector<64x128xbf16>, vector<128x128xbf16>, vector<64x128xf32> -> vector<64x128xf32>
    %43 = arith.addf %36, %42 : vector<64x128xf32>
    %c0_42 = arith.constant 0 : index
    %c2_43 = arith.constant 2 : index
    %c0_44 = arith.constant 0 : index
    %c0_45 = arith.constant 0 : index
    %44 = vector.load %arg2[%c0_42, %c2_43, %c0_44, %c0_45] : memref<1x10x10x128xbf16, #tpu.memory_space<vmem>>, vector<1x8x8x128xbf16>
    %45 = vector.shape_cast %44 : vector<1x8x8x128xbf16> to vector<8x8x128xbf16>
    %46 = vector.shape_cast %45 : vector<8x8x128xbf16> to vector<64x128xbf16>
    %c6 = arith.constant 6 : index
    %c0_46 = arith.constant 0 : index
    %c0_47 = arith.constant 0 : index
    %47 = vector.load %arg3[%c6, %c0_46, %c0_47] : memref<9x128x128xbf16, #tpu.memory_space<vmem>>, vector<1x128x128xbf16>
    %48 = vector.shape_cast %47 : vector<1x128x128xbf16> to vector<128x128xbf16>
    %cst_48 = arith.constant dense<0.000000e+00> : vector<64x128xf32>
    %49 = tpu.matmul %46, %48, %cst_48 {dimension_numbers = #tpu.dot_dimension_numbers<[1], [0], [0], [1], [0, 0, 1, 1], [], []>} : vector<64x128xbf16>, vector<128x128xbf16>, vector<64x128xf32> -> vector<64x128xf32>
    %50 = arith.addf %43, %49 : vector<64x128xf32>
    %c0_49 = arith.constant 0 : index
    %c2_50 = arith.constant 2 : index
    %c1_51 = arith.constant 1 : index
    %c0_52 = arith.constant 0 : index
    %51 = vector.load %arg2[%c0_49, %c2_50, %c1_51, %c0_52] : memref<1x10x10x128xbf16, #tpu.memory_space<vmem>>, vector<1x8x8x128xbf16>
    %52 = vector.shape_cast %51 : vector<1x8x8x128xbf16> to vector<8x8x128xbf16>
    %53 = vector.shape_cast %52 : vector<8x8x128xbf16> to vector<64x128xbf16>
    %c7 = arith.constant 7 : index
    %c0_53 = arith.constant 0 : index
    %c0_54 = arith.constant 0 : index
    %54 = vector.load %arg3[%c7, %c0_53, %c0_54] : memref<9x128x128xbf16, #tpu.memory_space<vmem>>, vector<1x128x128xbf16>
    %55 = vector.shape_cast %54 : vector<1x128x128xbf16> to vector<128x128xbf16>
    %cst_55 = arith.constant dense<0.000000e+00> : vector<64x128xf32>
    %56 = tpu.matmul %53, %55, %cst_55 {dimension_numbers = #tpu.dot_dimension_numbers<[1], [0], [0], [1], [0, 0, 1, 1], [], []>} : vector<64x128xbf16>, vector<128x128xbf16>, vector<64x128xf32> -> vector<64x128xf32>
    %57 = arith.addf %50, %56 : vector<64x128xf32>
    %c0_56 = arith.constant 0 : index
    %c2_57 = arith.constant 2 : index
    %c2_58 = arith.constant 2 : index
    %c0_59 = arith.constant 0 : index
    %58 = vector.load %arg2[%c0_56, %c2_57, %c2_58, %c0_59] : memref<1x10x10x128xbf16, #tpu.memory_space<vmem>>, vector<1x8x8x128xbf16>
    %59 = vector.shape_cast %58 : vector<1x8x8x128xbf16> to vector<8x8x128xbf16>
    %60 = vector.shape_cast %59 : vector<8x8x128xbf16> to vector<64x128xbf16>
    %c8 = arith.constant 8 : index
    %c0_60 = arith.constant 0 : index
    %c0_61 = arith.constant 0 : index
    %61 = vector.load %arg3[%c8, %c0_60, %c0_61] : memref<9x128x128xbf16, #tpu.memory_space<vmem>>, vector<1x128x128xbf16>
    %62 = vector.shape_cast %61 : vector<1x128x128xbf16> to vector<128x128xbf16>
    %cst_62 = arith.constant dense<0.000000e+00> : vector<64x128xf32>
    %63 = tpu.matmul %60, %62, %cst_62 {dimension_numbers = #tpu.dot_dimension_numbers<[1], [0], [0], [1], [0, 0, 1, 1], [], []>} : vector<64x128xbf16>, vector<128x128xbf16>, vector<64x128xf32> -> vector<64x128xf32>
    %64 = arith.addf %57, %63 : vector<64x128xf32>
    %65 = arith.truncf %64 : vector<64x128xf32> to vector<64x128xbf16>
    %c0_63 = arith.constant 0 : index
    %c0_64 = arith.constant 0 : index
    %c0_65 = arith.constant 0 : index
    %66 = vector.load %arg4[%c0_63, %c0_64, %c0_65] : memref<1x64x128xbf16, #tpu.memory_space<vmem>>, vector<1x64x128xbf16>
    %67 = vector.shape_cast %66 : vector<1x64x128xbf16> to vector<64x128xbf16>
    %68 = vector.shape_cast %65 : vector<64x128xbf16> to vector<1x64x128xbf16>
    tpu.vector_store %arg4[%c0_63, %c0_64, %c0_65], %68 {strides = array<i32>} : memref<1x64x128xbf16, #tpu.memory_space<vmem>>, vector<1x64x128xbf16>,
    %c0_66 = arith.constant 0 : index
    %c0_67 = arith.constant 0 : index
    %69 = vector.load %arg5[%c0_66, %c0_67] : memref<1x128xf32, #tpu.memory_space<vmem>>, vector<1x128xf32>
    %cst_68 = arith.constant dense<0.000000e+00> : vector<128xf32>
    %70 = vector.multi_reduction <add>, %64, %cst_68 [0] : vector<64x128xf32> to vector<128xf32>
    %71 = vector.shape_cast %70 : vector<128xf32> to vector<1x128xf32>
    %72 = arith.addf %69, %71 : vector<1x128xf32>
    %c0_69 = arith.constant 0 : index
    %c0_70 = arith.constant 0 : index
    %73 = vector.load %arg5[%c0_69, %c0_70] : memref<1x128xf32, #tpu.memory_space<vmem>>, vector<1x128xf32>
    tpu.vector_store %arg5[%c0_69, %c0_70], %72 {strides = array<i32>} : memref<1x128xf32, #tpu.memory_space<vmem>>, vector<1x128xf32>,
    %c0_71 = arith.constant 0 : index
    %c0_72 = arith.constant 0 : index
    %74 = vector.load %arg6[%c0_71, %c0_72] : memref<1x128xf32, #tpu.memory_space<vmem>>, vector<1x128xf32>
    %75 = arith.mulf %64, %64 : vector<64x128xf32>
    %cst_73 = arith.constant dense<0.000000e+00> : vector<128xf32>
    %76 = vector.multi_reduction <add>, %75, %cst_73 [0] : vector<64x128xf32> to vector<128xf32>
    %77 = vector.shape_cast %76 : vector<128xf32> to vector<1x128xf32>
    %78 = arith.addf %74, %77 : vector<1x128xf32>
    %c0_74 = arith.constant 0 : index
    %c0_75 = arith.constant 0 : index
    %79 = vector.load %arg6[%c0_74, %c0_75] : memref<1x128xf32, #tpu.memory_space<vmem>>, vector<1x128xf32>
    tpu.vector_store %arg6[%c0_74, %c0_75], %78 {strides = array<i32>} : memref<1x128xf32, #tpu.memory_space<vmem>>, vector<1x128xf32>,
    return
  }
  func.func @transform_0(%arg0: i32, %arg1: i32) -> (i32, i32, i32, i32) {
    %c0_i32 = arith.constant 0 : i32
    %c0_i32_0 = arith.constant 0 : i32
    %c0_i32_1 = arith.constant 0 : i32
    %c0_i32_2 = arith.constant 0 : i32
    return %arg1, %c0_i32, %c0_i32_0, %c0_i32_1 : i32, i32, i32, i32
  }
  func.func @transform_1(%arg0: i32, %arg1: i32) -> (i32, i32, i32) {
    %c0_i32 = arith.constant 0 : i32
    %c0_i32_0 = arith.constant 0 : i32
    %c0_i32_1 = arith.constant 0 : i32
    return %c0_i32, %c0_i32_0, %arg0 : i32, i32, i32
  }
  func.func @transform_2(%arg0: i32, %arg1: i32) -> (i32, i32, i32) {
    %c0_i32 = arith.constant 0 : i32
    %c0_i32_0 = arith.constant 0 : i32
    return %arg1, %c0_i32, %arg0 : i32, i32, i32
  }
  func.func @transform_3(%arg0: i32, %arg1: i32) -> (i32, i32) {
    %c0_i32 = arith.constant 0 : i32
    %c0_i32_0 = arith.constant 0 : i32
    return %c0_i32, %arg0 : i32, i32
  }
  func.func @transform_4(%arg0: i32, %arg1: i32) -> (i32, i32) {
    %c0_i32 = arith.constant 0 : i32
    %c0_i32_0 = arith.constant 0 : i32
    return %c0_i32, %arg0 : i32, i32
  }
}

module attributes {stable_mosaic.version = 11 : i64} {
  func.func @kernel(%arg0: i32, %arg1: i32, %arg2: memref<1x8x8x128xbf16, #tpu.memory_space<vmem>>, %arg3: memref<1x128x128xbf16, #tpu.memory_space<vmem>>, %arg4: memref<1x64x128xbf16, #tpu.memory_space<vmem>>, %arg5: memref<1x128xf32, #tpu.memory_space<vmem>>, %arg6: memref<1x128xf32, #tpu.memory_space<vmem>>) attributes {dimension_semantics = [#tpu.dimension_semantics<parallel>, #tpu.dimension_semantics<arbitrary>], iteration_bounds = array<i64: 1, 2>, scalar_prefetch = 0 : i64, scratch_operands = 0 : i64, tpu.core_type = #tpu.core_type<tc>, window_params = [{transform_indices = @transform_0, window_bounds = array<i64: 1, 8, 8, 128>}, {transform_indices = @transform_1, window_bounds = array<i64: 1, 128, 128>}, {transform_indices = @transform_2, window_bounds = array<i64: 1, 64, 128>}, {transform_indices = @transform_3, window_bounds = array<i64: 1, 128>}, {transform_indices = @transform_4, window_bounds = array<i64: 1, 128>}]} {
    %c0_i32 = arith.constant 0 : i32
    %0 = arith.cmpi eq, %arg1, %c0_i32 : i32
    %1 = arith.extui %0 : i1 to i32
    %c0_i32_0 = arith.constant 0 : i32
    %2 = arith.cmpi ne, %1, %c0_i32_0 : i32
    scf.if %2 {
      %cst_20 = arith.constant 0.000000e+00 : f32
      %24 = vector.broadcast %cst_20 : f32 to vector<1x128xf32>
      %c0_21 = arith.constant 0 : index
      %c0_22 = arith.constant 0 : index
      %25 = vector.load %arg5[%c0_21, %c0_22] : memref<1x128xf32, #tpu.memory_space<vmem>>, vector<1x128xf32>
      tpu.vector_store %arg5[%c0_21, %c0_22], %24 {strides = array<i32>} : memref<1x128xf32, #tpu.memory_space<vmem>>, vector<1x128xf32>,
      %cst_23 = arith.constant 0.000000e+00 : f32
      %26 = vector.broadcast %cst_23 : f32 to vector<1x128xf32>
      %c0_24 = arith.constant 0 : index
      %c0_25 = arith.constant 0 : index
      %27 = vector.load %arg6[%c0_24, %c0_25] : memref<1x128xf32, #tpu.memory_space<vmem>>, vector<1x128xf32>
      tpu.vector_store %arg6[%c0_24, %c0_25], %26 {strides = array<i32>} : memref<1x128xf32, #tpu.memory_space<vmem>>, vector<1x128xf32>,
    } else {
    }
    %c0 = arith.constant 0 : index
    %c0_1 = arith.constant 0 : index
    %c0_2 = arith.constant 0 : index
    %c0_3 = arith.constant 0 : index
    %3 = vector.load %arg2[%c0, %c0_1, %c0_2, %c0_3] : memref<1x8x8x128xbf16, #tpu.memory_space<vmem>>, vector<1x8x8x128xbf16>
    %4 = vector.shape_cast %3 : vector<1x8x8x128xbf16> to vector<8x8x128xbf16>
    %5 = vector.shape_cast %4 : vector<8x8x128xbf16> to vector<64x128xbf16>
    %c0_4 = arith.constant 0 : index
    %c0_5 = arith.constant 0 : index
    %c0_6 = arith.constant 0 : index
    %6 = vector.load %arg3[%c0_4, %c0_5, %c0_6] : memref<1x128x128xbf16, #tpu.memory_space<vmem>>, vector<1x128x128xbf16>
    %7 = vector.shape_cast %6 : vector<1x128x128xbf16> to vector<128x128xbf16>
    %cst = arith.constant dense<0.000000e+00> : vector<64x128xf32>
    %8 = tpu.matmul %5, %7, %cst {dimension_numbers = #tpu.dot_dimension_numbers<[1], [0], [0], [1], [0, 0, 1, 1], [], []>} : vector<64x128xbf16>, vector<128x128xbf16>, vector<64x128xf32> -> vector<64x128xf32>
    %9 = arith.truncf %8 : vector<64x128xf32> to vector<64x128xbf16>
    %c0_7 = arith.constant 0 : index
    %c0_8 = arith.constant 0 : index
    %c0_9 = arith.constant 0 : index
    %10 = vector.load %arg4[%c0_7, %c0_8, %c0_9] : memref<1x64x128xbf16, #tpu.memory_space<vmem>>, vector<1x64x128xbf16>
    %11 = vector.shape_cast %10 : vector<1x64x128xbf16> to vector<64x128xbf16>
    %12 = vector.shape_cast %9 : vector<64x128xbf16> to vector<1x64x128xbf16>
    tpu.vector_store %arg4[%c0_7, %c0_8, %c0_9], %12 {strides = array<i32>} : memref<1x64x128xbf16, #tpu.memory_space<vmem>>, vector<1x64x128xbf16>,
    %c0_10 = arith.constant 0 : index
    %c0_11 = arith.constant 0 : index
    %13 = vector.load %arg5[%c0_10, %c0_11] : memref<1x128xf32, #tpu.memory_space<vmem>>, vector<1x128xf32>
    %cst_12 = arith.constant dense<0.000000e+00> : vector<128xf32>
    %14 = vector.multi_reduction <add>, %8, %cst_12 [0] : vector<64x128xf32> to vector<128xf32>
    %15 = vector.shape_cast %14 : vector<128xf32> to vector<1x128xf32>
    %16 = arith.addf %13, %15 : vector<1x128xf32>
    %c0_13 = arith.constant 0 : index
    %c0_14 = arith.constant 0 : index
    %17 = vector.load %arg5[%c0_13, %c0_14] : memref<1x128xf32, #tpu.memory_space<vmem>>, vector<1x128xf32>
    tpu.vector_store %arg5[%c0_13, %c0_14], %16 {strides = array<i32>} : memref<1x128xf32, #tpu.memory_space<vmem>>, vector<1x128xf32>,
    %c0_15 = arith.constant 0 : index
    %c0_16 = arith.constant 0 : index
    %18 = vector.load %arg6[%c0_15, %c0_16] : memref<1x128xf32, #tpu.memory_space<vmem>>, vector<1x128xf32>
    %19 = arith.mulf %8, %8 : vector<64x128xf32>
    %cst_17 = arith.constant dense<0.000000e+00> : vector<128xf32>
    %20 = vector.multi_reduction <add>, %19, %cst_17 [0] : vector<64x128xf32> to vector<128xf32>
    %21 = vector.shape_cast %20 : vector<128xf32> to vector<1x128xf32>
    %22 = arith.addf %18, %21 : vector<1x128xf32>
    %c0_18 = arith.constant 0 : index
    %c0_19 = arith.constant 0 : index
    %23 = vector.load %arg6[%c0_18, %c0_19] : memref<1x128xf32, #tpu.memory_space<vmem>>, vector<1x128xf32>
    tpu.vector_store %arg6[%c0_18, %c0_19], %22 {strides = array<i32>} : memref<1x128xf32, #tpu.memory_space<vmem>>, vector<1x128xf32>,
    return
  }
  func.func @transform_0(%arg0: i32, %arg1: i32) -> (i32, i32, i32, i32) {
    %c0_i32 = arith.constant 0 : i32
    %c0_i32_0 = arith.constant 0 : i32
    %c0_i32_1 = arith.constant 0 : i32
    %c0_i32_2 = arith.constant 0 : i32
    return %arg1, %c0_i32, %c0_i32_0, %c0_i32_1 : i32, i32, i32, i32
  }
  func.func @transform_1(%arg0: i32, %arg1: i32) -> (i32, i32, i32) {
    %c0_i32 = arith.constant 0 : i32
    %c0_i32_0 = arith.constant 0 : i32
    %c0_i32_1 = arith.constant 0 : i32
    return %c0_i32, %c0_i32_0, %arg0 : i32, i32, i32
  }
  func.func @transform_2(%arg0: i32, %arg1: i32) -> (i32, i32, i32) {
    %c0_i32 = arith.constant 0 : i32
    %c0_i32_0 = arith.constant 0 : i32
    return %arg1, %c0_i32, %arg0 : i32, i32, i32
  }
  func.func @transform_3(%arg0: i32, %arg1: i32) -> (i32, i32) {
    %c0_i32 = arith.constant 0 : i32
    %c0_i32_0 = arith.constant 0 : i32
    return %c0_i32, %arg0 : i32, i32
  }
  func.func @transform_4(%arg0: i32, %arg1: i32) -> (i32, i32) {
    %c0_i32 = arith.constant 0 : i32
    %c0_i32_0 = arith.constant 0 : i32
    return %c0_i32, %arg0 : i32, i32
  }
}

module attributes {stable_mosaic.version = 11 : i64} {
  func.func @kernel(%arg0: i32, %arg1: memref<128x128xbf16, #tpu.memory_space<vmem>>, %arg2: memref<1x128xf32, #tpu.memory_space<vmem>>, %arg3: memref<1x128xf32, #tpu.memory_space<vmem>>, %arg4: memref<128x128xbf16, #tpu.memory_space<vmem>>, %arg5: memref<1x128xf32, #tpu.memory_space<vmem>>, %arg6: memref<1x128xf32, #tpu.memory_space<vmem>>, %arg7: memref<128x128xbf16, #tpu.memory_space<vmem>>) attributes {dimension_semantics = [#tpu.dimension_semantics<parallel>], iteration_bounds = array<i64: 1>, scalar_prefetch = 0 : i64, scratch_operands = 0 : i64, tpu.core_type = #tpu.core_type<tc>, window_params = [{transform_indices = @transform_0, window_bounds = array<i64: 128, 128>}, {pipeline_mode = #tpu.pipeline_mode<synchronous>, transform_indices = @transform_1, window_bounds = array<i64: 1, 128>}, {pipeline_mode = #tpu.pipeline_mode<synchronous>, transform_indices = @transform_2, window_bounds = array<i64: 1, 128>}, {transform_indices = @transform_3, window_bounds = array<i64: 128, 128>}, {pipeline_mode = #tpu.pipeline_mode<synchronous>, transform_indices = @transform_4, window_bounds = array<i64: 1, 128>}, {pipeline_mode = #tpu.pipeline_mode<synchronous>, transform_indices = @transform_5, window_bounds = array<i64: 1, 128>}, {transform_indices = @transform_6, window_bounds = array<i64: 128, 128>}]} {
    %c0 = arith.constant 0 : index
    %c0_0 = arith.constant 0 : index
    %0 = vector.load %arg1[%c0, %c0_0] : memref<128x128xbf16, #tpu.memory_space<vmem>>, vector<128x128xbf16>
    %1 = arith.extf %0 : vector<128x128xbf16> to vector<128x128xf32>
    %c0_1 = arith.constant 0 : index
    %c0_2 = arith.constant 0 : index
    %2 = vector.load %arg2[%c0_1, %c0_2] : memref<1x128xf32, #tpu.memory_space<vmem>>, vector<1x128xf32>
    %3 = vector.broadcast %2 : vector<1x128xf32> to vector<128x128xf32>
    %4 = arith.mulf %1, %3 : vector<128x128xf32>
    %c0_3 = arith.constant 0 : index
    %c0_4 = arith.constant 0 : index
    %5 = vector.load %arg3[%c0_3, %c0_4] : memref<1x128xf32, #tpu.memory_space<vmem>>, vector<1x128xf32>
    %6 = vector.broadcast %5 : vector<1x128xf32> to vector<128x128xf32>
    %7 = arith.addf %4, %6 : vector<128x128xf32>
    %c0_5 = arith.constant 0 : index
    %c0_6 = arith.constant 0 : index
    %8 = vector.load %arg4[%c0_5, %c0_6] : memref<128x128xbf16, #tpu.memory_space<vmem>>, vector<128x128xbf16>
    %9 = arith.extf %8 : vector<128x128xbf16> to vector<128x128xf32>
    %c0_7 = arith.constant 0 : index
    %c0_8 = arith.constant 0 : index
    %10 = vector.load %arg5[%c0_7, %c0_8] : memref<1x128xf32, #tpu.memory_space<vmem>>, vector<1x128xf32>
    %11 = vector.broadcast %10 : vector<1x128xf32> to vector<128x128xf32>
    %12 = arith.mulf %9, %11 : vector<128x128xf32>
    %c0_9 = arith.constant 0 : index
    %c0_10 = arith.constant 0 : index
    %13 = vector.load %arg6[%c0_9, %c0_10] : memref<1x128xf32, #tpu.memory_space<vmem>>, vector<1x128xf32>
    %14 = vector.broadcast %13 : vector<1x128xf32> to vector<128x128xf32>
    %15 = arith.addf %12, %14 : vector<128x128xf32>
    %16 = arith.addf %7, %15 : vector<128x128xf32>
    %cst = arith.constant 0.000000e+00 : f32
    %17 = vector.broadcast %cst : f32 to vector<128x128xf32>
    %18 = arith.maximumf %16, %17 : vector<128x128xf32>
    %19 = arith.truncf %18 : vector<128x128xf32> to vector<128x128xbf16>
    %c0_11 = arith.constant 0 : index
    %c0_12 = arith.constant 0 : index
    %20 = vector.load %arg7[%c0_11, %c0_12] : memref<128x128xbf16, #tpu.memory_space<vmem>>, vector<128x128xbf16>
    tpu.vector_store %arg7[%c0_11, %c0_12], %19 {strides = array<i32>} : memref<128x128xbf16, #tpu.memory_space<vmem>>, vector<128x128xbf16>,
    return
  }
  func.func @transform_0(%arg0: i32) -> (i32, i32) {
    %c0_i32 = arith.constant 0 : i32
    %c0_i32_0 = arith.constant 0 : i32
    return %arg0, %c0_i32 : i32, i32
  }
  func.func @transform_1(%arg0: i32) -> (i32, i32) {
    %c0_i32 = arith.constant 0 : i32
    %c0_i32_0 = arith.constant 0 : i32
    %c0_i32_1 = arith.constant 0 : i32
    return %c0_i32, %c0_i32_0 : i32, i32
  }
  func.func @transform_2(%arg0: i32) -> (i32, i32) {
    %c0_i32 = arith.constant 0 : i32
    %c0_i32_0 = arith.constant 0 : i32
    %c0_i32_1 = arith.constant 0 : i32
    return %c0_i32, %c0_i32_0 : i32, i32
  }
  func.func @transform_3(%arg0: i32) -> (i32, i32) {
    %c0_i32 = arith.constant 0 : i32
    %c0_i32_0 = arith.constant 0 : i32
    return %arg0, %c0_i32 : i32, i32
  }
  func.func @transform_4(%arg0: i32) -> (i32, i32) {
    %c0_i32 = arith.constant 0 : i32
    %c0_i32_0 = arith.constant 0 : i32
    %c0_i32_1 = arith.constant 0 : i32
    return %c0_i32, %c0_i32_0 : i32, i32
  }
  func.func @transform_5(%arg0: i32) -> (i32, i32) {
    %c0_i32 = arith.constant 0 : i32
    %c0_i32_0 = arith.constant 0 : i32
    %c0_i32_1 = arith.constant 0 : i32
    return %c0_i32, %c0_i32_0 : i32, i32
  }
  func.func @transform_6(%arg0: i32) -> (i32, i32) {
    %c0_i32 = arith.constant 0 : i32
    %c0_i32_0 = arith.constant 0 : i32
    return %arg0, %c0_i32 : i32, i32
  }
}

</mosaic_0001>

<bundles_post_ra>
// kernel: residual_block_forward.6
= control target key start
LH: loop header
LB: loop body
LE: loop exit
PB: predicated region body
PF: predicated region fallthrough
CT: control target
= control target key end

     0   :  { %s336_s0 = inlined_call_operand.vmem [shape: bf16[128,128], index: 0, kind: input, shape index: {}]   ;;  %s337_s1 = inlined_call_operand.vmem [shape: f32[1,128], index: 1, kind: input, shape index: {}]   ;;  %s338_s2 = inlined_call_operand.vmem [shape: f32[1,128], index: 2, kind: input, shape index: {}]   ;;  %s339_s3 = inlined_call_operand.vmem [shape: bf16[128,128], index: 3, kind: output, shape index: {}]  }
   0x1   :  { %v139_v0 = vld [vmem:[%s336_s0] sm:$0xff]   ;;  %v210_v5 = vld [vmem:[%s336_s0 + $0x8] sm:$0xff]   ;;  %v211_v8 = vld [vmem:[%s336_s0 + $0x10] sm:$0xff]  }
   0x2   :  { %v252_v1 = vld [vmem:[%s337_s1] ss:$0 sm:$0xff]  ;;  %v140_v2 = vunpack.c.l.bf16 %v139_v0  ;;  %v141_v3 = vunpack.c.h.bf16 %v139_v0  ;;  %v144_v6 = vunpack.c.l.bf16 %v210_v5  ;;  %v145_v7 = vunpack.c.h.bf16 %v210_v5  ;;  %v212_v9 = vld [vmem:[%s336_s0 + $0x18] sm:$0xff]   ;;  %v214_v35 = vld [vmem:[%s336_s0 + $0x28] sm:$0xff]  }
   0x3   :  { %v257_v4 = vld [vmem:[%s338_s2] ss:$0 sm:$0xff]  ;;  %v148_v12 = vunpack.c.l.bf16 %v211_v8  ;;  %v149_v13 = vunpack.c.h.bf16 %v211_v8  ;;  %v152_v16 = vunpack.c.l.bf16 %v212_v9  ;;  %v153_v17 = vunpack.c.h.bf16 %v212_v9  ;;  %v215_v40 = vld [vmem:[%s336_s0 + $0x30] sm:$0xff]   ;;  %v216_v45 = vld [vmem:[%s336_s0 + $0x38] sm:$0xff]  }
   0x4   :  { %v50_v10 = vmul.f32 %v252_v1, %v140_v2  ;;  %v51_v11 = vmul.f32 %v252_v1, %v141_v3  ;;  %v52_v14 = vmul.f32 %v252_v1, %v144_v6  ;;  %v53_v15 = vmul.f32 %v252_v1, %v145_v7  ;;  %v213_v26 = vld [vmem:[%s336_s0 + $0x20] sm:$0xff]  }
   0x5   :  { %v54_v20 = vmul.f32 %v252_v1, %v148_v12  ;;  %v55_v21 = vmul.f32 %v252_v1, %v149_v13  ;;  %v56_v24 = vmul.f32 %v252_v1, %v152_v16  ;;  %v57_v25 = vmul.f32 %v252_v1, %v153_v17 }
   0x6   :  { %v70_v18 = vadd.f32 %v257_v4, %v50_v10  ;;  %v71_v19 = vadd.f32 %v257_v4, %v51_v11  ;;  %v72_v22 = vadd.f32 %v257_v4, %v52_v14  ;;  %v73_v23 = vadd.f32 %v257_v4, %v53_v15 }
   0x7   :  { %v74_v29 = vadd.f32 %v257_v4, %v54_v20  ;;  %v75_v30 = vadd.f32 %v257_v4, %v55_v21  ;;  %v76_v33 = vadd.f32 %v257_v4, %v56_v24  ;;  %v77_v34 = vadd.f32 %v257_v4, %v57_v25 }
   0x8   :  { %v86_v27 = vmax.f32 %v70_v18, 0.0  ;;  %v87_v28 = vmax.f32 %v71_v19, 0.0  ;;  %v88_v31 = vmax.f32 %v72_v22, 0.0  ;;  %v89_v32 = vmax.f32 %v73_v23, 0.0 }
   0x9   :  { %v90_v37 = vmax.f32 %v74_v29, 0.0  ;;  %v91_v38 = vmax.f32 %v75_v30, 0.0  ;;  %v156_v39 = vunpack.c.l.bf16 %v213_v26  ;;  %v92_v42 = vmax.f32 %v76_v33, 0.0 }
   0xa   :  { %v173_v36 = vpack.c.bf16 %v87_v28, %v86_v27  ;;  %v178_v41 = vpack.c.bf16 %v89_v32, %v88_v31  ;;  %v93_v43 = vmax.f32 %v77_v34, 0.0  ;;  %v157_v44 = vunpack.c.h.bf16 %v213_v26 }
   0xb   :  { %v183_v46 = vpack.c.bf16 %v91_v38, %v90_v37  ;;  %v58_v47 = vmul.f32 %v252_v1, %v156_v39  ;;  %v160_v48 = vunpack.c.l.bf16 %v214_v35  ;;  %v161_v49 = vunpack.c.h.bf16 %v214_v35 }
   0xc   :  { %174 = vst [vmem:[%s339_s3] sm:$0xff] %v173_v36   ;;  %v188_v50 = vpack.c.bf16 %v93_v43, %v92_v42  ;;  %v59_v51 = vmul.f32 %v252_v1, %v157_v44  ;;  %v164_v52 = vunpack.c.l.bf16 %v215_v40  ;;  %v165_v53 = vunpack.c.h.bf16 %v215_v40 }
   0xd   :  { %217 = vst [vmem:[%s339_s3 + $0x8] sm:$0xff] %v178_v41   ;;  %v78_v54 = vadd.f32 %v257_v4, %v58_v47  ;;  %v60_v55 = vmul.f32 %v252_v1, %v160_v48  ;;  %v61_v56 = vmul.f32 %v252_v1, %v161_v49  ;;  %v168_v57 = vunpack.c.l.bf16 %v216_v45 }
   0xe   :  { %218 = vst [vmem:[%s339_s3 + $0x10] sm:$0xff] %v183_v46   ;;  %v79_v58 = vadd.f32 %v257_v4, %v59_v51  ;;  %v62_v59 = vmul.f32 %v252_v1, %v164_v52  ;;  %v63_v60 = vmul.f32 %v252_v1, %v165_v53  ;;  %v169_v61 = vunpack.c.h.bf16 %v216_v45 }
   0xf   :  { %219 = vst [vmem:[%s339_s3 + $0x18] sm:$0xff] %v188_v50   ;;  %v94_v62 = vmax.f32 %v78_v54, 0.0  ;;  %v80_v63 = vadd.f32 %v257_v4, %v60_v55  ;;  %v81_v0 = vadd.f32 %v257_v4, %v61_v56  ;;  %v64_v2 = vmul.f32 %v252_v1, %v168_v57 }
  0x10   :  { %v95_v3 = vmax.f32 %v79_v58, 0.0  ;;  %v82_v5 = vadd.f32 %v257_v4, %v62_v59  ;;  %v83_v6 = vadd.f32 %v257_v4, %v63_v60  ;;  %v65_v7 = vmul.f32 %v252_v1, %v169_v61 }
  0x11   :  { %v96_v8 = vmax.f32 %v80_v63, 0.0  ;;  %v97_v9 = vmax.f32 %v81_v0, 0.0  ;;  %v84_v10 = vadd.f32 %v257_v4, %v64_v2 }
  0x12   :  { %v193_v11 = vpack.c.bf16 %v95_v3, %v94_v62  ;;  %v98_v12 = vmax.f32 %v82_v5, 0.0  ;;  %v99_v13 = vmax.f32 %v83_v6, 0.0  ;;  %v85_v14 = vadd.f32 %v257_v4, %v65_v7 }
  0x13   :  { %v198_v15 = vpack.c.bf16 %v97_v9, %v96_v8  ;;  %v100_v16 = vmax.f32 %v84_v10, 0.0 }
  0x14   :  { %220 = vst [vmem:[%s339_s3 + $0x20] sm:$0xff] %v193_v11   ;;  %v203_v17 = vpack.c.bf16 %v99_v13, %v98_v12  ;;  %v101_v18 = vmax.f32 %v85_v14, 0.0 }
  0x15   :  { %221 = vst [vmem:[%s339_s3 + $0x28] sm:$0xff] %v198_v15  }
  0x16   :  { %222 = vst [vmem:[%s339_s3 + $0x30] sm:$0xff] %v203_v17   ;;  %v208_v1 = vpack.c.bf16 %v101_v18, %v100_v16 }
  0x18   :  { %223 = vst [vmem:[%s339_s3 + $0x38] sm:$0xff] %v208_v1  }

// kernel: residual_block_forward.8
= control target key start
LH: loop header
LB: loop body
LE: loop exit
PB: predicated region body
PF: predicated region fallthrough
CT: control target
= control target key end

     0   :  { %s775_s15 = smov 0   ;;  %s777_s16 = smov 0   ;;  %s862_s0 = inlined_call_operand.vmem [shape: bf16[2,8,8,128], index: 0, kind: input, shape index: {}]   ;;  %s863_s1 = inlined_call_operand.vmem [shape: bf16[1,128,128], index: 1, kind: input, shape index: {}]   ;;  %s864_s2 = inlined_call_operand.vmem [shape: bf16[2,64,128], index: 2, kind: output, shape index: {0}]   ;;  %s865_s3 = inlined_call_operand.vmem [shape: f32[1,128], index: 3, kind: output, shape index: {1}]   ;;  %s866_s4 = inlined_call_operand.vmem [shape: f32[1,128], index: 4, kind: output, shape index: {2}]  }
   0x1   :  { %s779_s17 = smov 0  }
   0x2 LB: > { %s24_s18 = sadd.s32 1, %s743_s16  ;;  %p581_p0 = scmp.ge.s32.totalorder %s747_s17, 1  ;;  %s747_s17 = sphi %s779_s17, %s15_s17   ;;  %s743_s16 = sphi %s777_s16, %s868_s16   ;;  %s739_s15 = sphi %s775_s15, %s867_s15  }
   0x3   : > { %p25_p1 = scmp.ge.s32.totalorder %s24_s18, 2  ;;  %p190_p2 = scmp.lt.s32.totalorder %s747_s17, 3 }
   0x5   : > { %s870_s18 = smov (%p25_p1, %s24_s18), 0  ;;  %p191_p3 = pnand %p581_p0, %p190_p2 }
   0x6   : > { %p229_p4 = scmp.lt.s32.totalorder (!%p191_p3), %s739_s15, 1  ;;  %p586_p5 = scmp.ne.s32.totalorder (!%p191_p3), %s739_s15, 0 }
   0x7   : > { %194 = sbr.rel (%p191_p3) target bundleno = 218 (0xda), region = 28 }
   0xc   : > { %s230_s19 = scalar_select %p229_p4, %s739_s15, 1 }
   0xd   : > { %255 = sbr.rel (%p586_p5) target bundleno = 21 (0x15), region = 32 }
   0xe   : > { %s639_s20 = sshll.u32 %s230_s19, 5 }
   0xf   : > { %s796_s23 = scalar_lea.vmem %s862_s0, %s639_s20  ;;  %s801_s26 = scalar_lea.vmem %s864_s2, %s639_s20 }
  0x12   : > { %v749_v0 = vmov 0.0  }
  0x13   : > { %256 = vst [vmem:[%s865_s3] sm:$0x1] %v749_v0 }
  0x14   : > { %257 = vst [vmem:[%s866_s4] sm:$0x1] %v749_v0 }
  0x15 PF: > { %v652_v1 = vld [vmem:[%s863_s1 + $0x38] sm:$0xff]  ;;  %v651_v2 = vld [vmem:[%s863_s1 + $0x30] sm:$0xff]  ;;  %v650_v3 = vld [vmem:[%s863_s1 + $0x28] sm:$0xff] }
  0x16   : > { %354 = vmatpush.bf16.msra.mxu0 %v652_v1  ;;  %676 = vmatpush.bf16.msra.mxu1 %v652_v1  ;;  %v649_v4 = vld [vmem:[%s863_s1 + $0x20] sm:$0xff]  ;;  %v648_v5 = vld [vmem:[%s863_s1 + $0x18] sm:$0xff]  ;;  %v647_v6 = vld [vmem:[%s863_s1 + $0x10] sm:$0xff] }
  0x17   : > { %677 = vmatpush.bf16.msra.mxu2 %v652_v1  ;;  %678 = vmatpush.bf16.msra.mxu3 %v652_v1  ;;  %v646_v7 = vld [vmem:[%s863_s1 + $0x8] sm:$0xff]  ;;  %v645_v8 = vld [vmem:[%s863_s1] sm:$0xff]  ;;  %v643_v11 = vld [vmem:[%s796_s23 + $0x10] sm:$0xff] }
  0x18   : > { %v641_v9 = vld [vmem:[%s796_s23] sm:$0xff]  ;;  %v642_v10 = vld [vmem:[%s796_s23 + $0x8] sm:$0xff]  ;;  %v644_v12 = vld [vmem:[%s796_s23 + $0x18] sm:$0xff] }
  0x1a   : > { %355 = vmatpush.bf16.msra.mxu0 %v651_v2  ;;  %679 = vmatpush.bf16.msra.mxu1 %v651_v2  ;;  %v399_v56 = vld [vmem:[%s865_s3] sm:$0x1] }
  0x1b   : > { %680 = vmatpush.bf16.msra.mxu2 %v651_v2  ;;  %681 = vmatpush.bf16.msra.mxu3 %v651_v2  ;;  %v415_v59 = vld [vmem:[%s866_s4] sm:$0x1] }
  0x1e   : > { %356 = vmatpush.bf16.msra.mxu0 %v650_v3  ;;  %682 = vmatpush.bf16.msra.mxu1 %v650_v3 }
  0x1f   : > { %683 = vmatpush.bf16.msra.mxu2 %v650_v3  ;;  %684 = vmatpush.bf16.msra.mxu3 %v650_v3 }
  0x22   : > { %357 = vmatpush.bf16.msra.mxu0 %v649_v4  ;;  %685 = vmatpush.bf16.msra.mxu1 %v649_v4 }
  0x23   : > { %686 = vmatpush.bf16.msra.mxu2 %v649_v4  ;;  %687 = vmatpush.bf16.msra.mxu3 %v649_v4 }
  0x26   : > { %358 = vmatpush.bf16.msra.mxu0 %v648_v5  ;;  %688 = vmatpush.bf16.msra.mxu1 %v648_v5 }
  0x27   : > { %689 = vmatpush.bf16.msra.mxu2 %v648_v5  ;;  %690 = vmatpush.bf16.msra.mxu3 %v648_v5 }
  0x2a   : > { %359 = vmatpush.bf16.msra.mxu0 %v647_v6  ;;  %691 = vmatpush.bf16.msra.mxu1 %v647_v6 }
  0x2b   : > { %692 = vmatpush.bf16.msra.mxu2 %v647_v6  ;;  %693 = vmatpush.bf16.msra.mxu3 %v647_v6 }
  0x2e   : > { %360 = vmatpush.bf16.msra.mxu0 %v646_v7  ;;  %694 = vmatpush.bf16.msra.mxu1 %v646_v7 }
  0x2f   : > { %695 = vmatpush.bf16.msra.mxu2 %v646_v7  ;;  %696 = vmatpush.bf16.msra.mxu3 %v646_v7 }
  0x32   : > { %361 = vmatpush.bf16.msra.mxu0 %v645_v8  ;;  %697 = vmatpush.bf16.msra.mxu1 %v645_v8 }
  0x33   : > { %698 = vmatpush.bf16.msra.mxu2 %v645_v8  ;;  %699 = vmatpush.bf16.msra.mxu3 %v645_v8 }
  0x35   : > { %362 = vmatmul.bf16.vlgmr.msra.gmra.mxu0 %v641_v9  ;;  %367 = vmatmul.bf16.vlgmr.msra.gmra.mxu1 %v642_v10 }
  0x36   : > { %372 = vmatmul.bf16.vlgmr.msra.gmra.mxu2 %v643_v11  ;;  %377 = vmatmul.bf16.vlgmr.msra.gmra.mxu3 %v644_v12 }
  0xb2   : > { %v363_v13 = vpop.f32.mrf.mxu0  ;;  %v368_v14 = vpop.f32.mrf.mxu1 }
  0xb3   : > { %v416_v17 = vmul.f32 %v363_v13, %v363_v13  ;;  %v418_v24 = vmul.f32 %v368_v14, %v368_v14 }
  0xb9   : > { %v373_v15 = vpop.f32.mrf.mxu2  ;;  %v378_v16 = vpop.f32.mrf.mxu3 }
  0xba   : > { %v365_v18 = vpop.f32.mrf.mxu0  ;;  %v370_v19 = vpop.f32.mrf.mxu1  ;;  %v420_v30 = vmul.f32 %v373_v15, %v373_v15  ;;  %v422_v40 = vmul.f32 %v378_v16, %v378_v16 }
  0xbb   : > { %v656_v20 = vpack.c.bf16 %v365_v18, %v363_v13  ;;  %v400_v21 = vadd.f32 %v365_v18, %v363_v13  ;;  %v417_v22 = vmul.f32 %v365_v18, %v365_v18  ;;  %v661_v23 = vpack.c.bf16 %v370_v19, %v368_v14 }
  0xbc   : > { %v419_v28 = vmul.f32 %v370_v19, %v370_v19 }
  0xbd   : > { %657 = vst [vmem:[%s801_s26] sm:$0xff] %v656_v20   ;;  %v424_v25 = vadd.f32 %v417_v22, %v416_v17  ;;  %v401_v26 = vadd.f32 %v400_v21, %v368_v14 }
  0xbe   : > { %673 = vst [vmem:[%s801_s26 + $0x8] sm:$0xff] %v661_v23  }
  0xbf   : > { %v402_v27 = vadd.f32 %v401_v26, %v370_v19  ;;  %v425_v29 = vadd.f32 %v424_v25, %v418_v24 }
  0xc1   : > { %v426_v31 = vadd.f32 %v425_v29, %v419_v28  ;;  %v375_v32 = vpop.f32.mrf.mxu2  ;;  %v403_v33 = vadd.f32 %v402_v27, %v373_v15  ;;  %v380_v34 = vpop.f32.mrf.mxu3 }
  0xc2   : > { %v666_v35 = vpack.c.bf16 %v375_v32, %v373_v15  ;;  %v671_v36 = vpack.c.bf16 %v380_v34, %v378_v16  ;;  %v421_v38 = vmul.f32 %v375_v32, %v375_v32  ;;  %v423_v44 = vmul.f32 %v380_v34, %v380_v34 }
  0xc3   : > { %v404_v37 = vadd.f32 %v403_v33, %v375_v32  ;;  %v427_v39 = vadd.f32 %v426_v31, %v420_v30 }
  0xc4   : > { %674 = vst [vmem:[%s801_s26 + $0x10] sm:$0xff] %v666_v35  }
  0xc5   : > { %v428_v41 = vadd.f32 %v427_v39, %v421_v38  ;;  %675 = vst [vmem:[%s801_s26 + $0x18] sm:$0xff] %v671_v36   ;;  %v405_v42 = vadd.f32 %v404_v37, %v378_v16 }
  0xc7   : > { %v406_v43 = vadd.f32 %v405_v42, %v380_v34  ;;  %v429_v45 = vadd.f32 %v428_v41, %v422_v40 }
  0xc9   : > { %v407_v46 = vrot.slane %v406_v43, 4  ;;  %v430_v47 = vadd.f32 %v429_v45, %v423_v44 }
  0xcb   : > { %v408_v48 = vadd.f32 %v407_v46, %v406_v43  ;;  %v431_v49 = vrot.slane %v430_v47, 4 }
  0xcd   : > { %v409_v50 = vrot.slane %v408_v48, 2  ;;  %v432_v51 = vadd.f32 %v431_v49, %v430_v47 }
  0xcf   : > { %v410_v52 = vadd.f32 %v409_v50, %v408_v48  ;;  %v433_v53 = vrot.slane %v432_v51, 2 }
  0xd1   : > { %v411_v54 = vrot.slane %v410_v52, 1  ;;  %v434_v55 = vadd.f32 %v433_v53, %v432_v51 }
  0xd3   : > { %v412_v57 = vadd.f32 %v411_v54, %v410_v52  ;;  %v435_v58 = vrot.slane %v434_v55, 1 }
  0xd5   : > { %v413_v60 = vadd.f32 %v412_v57, %v399_v56  ;;  %v436_v61 = vadd.f32 %v435_v58, %v434_v55 }
  0xd7   : > { %414 = vst [vmem:[%s865_s3] sm:$0x1] %v413_v60  ;;  %v437_v62 = vadd.f32 %v436_v61, %v415_v59 }
  0xd9   : > { %438 = vst [vmem:[%s866_s4] sm:$0x1] %v437_v62 }
  0xda PF: > { %s15_s17 = sadd.s32 1, %s747_s17   ;;  %s867_s15 = smov %s743_s16 }
  0xdb   : > { %p12_p6 = scmp.ge.s32.totalorder %s15_s17, 4   ;;  %s868_s16 = smov %s870_s18 }
  0xdd   :  { %14 = sbr.rel (!%p12_p6) target bundleno = 2 (0x2), region = 89 }

// kernel: residual_block_forward.9
= control target key start
LH: loop header
LB: loop body
LE: loop exit
PB: predicated region body
PF: predicated region fallthrough
CT: control target
= control target key end

     0   :  { %s555_s0 = inlined_call_operand.vmem [shape: bf16[128,128], index: 0, kind: input, shape index: {}]   ;;  %s556_s1 = inlined_call_operand.vmem [shape: f32[1,128], index: 1, kind: input, shape index: {}]   ;;  %s557_s2 = inlined_call_operand.vmem [shape: f32[1,128], index: 2, kind: input, shape index: {}]   ;;  %s558_s3 = inlined_call_operand.vmem [shape: bf16[128,128], index: 3, kind: input, shape index: {}]   ;;  %s559_s4 = inlined_call_operand.vmem [shape: f32[1,128], index: 4, kind: input, shape index: {}]   ;;  %s560_s5 = inlined_call_operand.vmem [shape: f32[1,128], index: 5, kind: input, shape index: {}]   ;;  %s561_s6 = inlined_call_operand.vmem [shape: bf16[128,128], index: 6, kind: output, shape index: {}]  }
   0x1   :  { %v236_v0 = vld [vmem:[%s555_s0] sm:$0xff]   ;;  %v339_v12 = vld [vmem:[%s555_s0 + $0x8] sm:$0xff]   ;;  %v340_v18 = vld [vmem:[%s555_s0 + $0x10] sm:$0xff]  }
   0x2   :  { %v405_v1 = vld [vmem:[%s556_s1] ss:$0 sm:$0xff]  ;;  %v237_v2 = vunpack.c.l.bf16 %v236_v0  ;;  %v238_v3 = vunpack.c.h.bf16 %v236_v0  ;;  %v346_v13 = vld [vmem:[%s558_s3 + $0x8] sm:$0xff]   ;;  %v241_v16 = vunpack.c.l.bf16 %v339_v12  ;;  %v242_v17 = vunpack.c.h.bf16 %v339_v12  ;;  %v347_v31 = vld [vmem:[%s558_s3 + $0x10] sm:$0xff]  }
   0x3   :  { %v410_v4 = vld [vmem:[%s557_s2] ss:$0 sm:$0xff]  ;;  %v273_v21 = vunpack.c.l.bf16 %v346_v13  ;;  %v274_v22 = vunpack.c.h.bf16 %v346_v13  ;;  %v245_v29 = vunpack.c.l.bf16 %v340_v18  ;;  %v246_v30 = vunpack.c.h.bf16 %v340_v18  ;;  %v341_v40 = vld [vmem:[%s555_s0 + $0x18] sm:$0xff]  }
   0x4   :  { %v268_v5 = vld [vmem:[%s558_s3] sm:$0xff]   ;;  %v59_v9 = vmul.f32 %v405_v1, %v237_v2  ;;  %v60_v10 = vmul.f32 %v405_v1, %v238_v3  ;;  %v61_v25 = vmul.f32 %v405_v1, %v241_v16  ;;  %v62_v26 = vmul.f32 %v405_v1, %v242_v17  ;;  %v348_v45 = vld [vmem:[%s558_s3 + $0x18] sm:$0xff]   ;;  %v343_v16 = vld [vmem:[%s555_s0 + $0x28] sm:$0xff]  }
   0x5   :  { %v269_v6 = vunpack.c.l.bf16 %v268_v5  ;;  %v270_v7 = vunpack.c.h.bf16 %v268_v5  ;;  %v418_v8 = vld [vmem:[%s559_s4] ss:$0 sm:$0xff]  ;;  %v63_v38 = vmul.f32 %v405_v1, %v245_v29  ;;  %v64_v39 = vmul.f32 %v405_v1, %v246_v30  ;;  %v344_v30 = vld [vmem:[%s555_s0 + $0x30] sm:$0xff]  }
   0x6   :  { %v425_v11 = vld [vmem:[%s560_s5] ss:$0 sm:$0xff]  ;;  %v79_v19 = vadd.f32 %v410_v4, %v59_v9  ;;  %v80_v20 = vadd.f32 %v410_v4, %v60_v10  ;;  %v133_v27 = vmul.f32 %v418_v8, %v273_v21  ;;  %v134_v28 = vmul.f32 %v418_v8, %v274_v22 }
   0x7   :  { %v131_v14 = vmul.f32 %v418_v8, %v269_v6  ;;  %v132_v15 = vmul.f32 %v418_v8, %v270_v7  ;;  %v81_v34 = vadd.f32 %v410_v4, %v61_v25  ;;  %v82_v35 = vadd.f32 %v410_v4, %v62_v26  ;;  %v342_v54 = vld [vmem:[%s555_s0 + $0x20] sm:$0xff]   ;;  %v350_v25 = vld [vmem:[%s558_s3 + $0x28] sm:$0xff]  }
   0x8   :  { %v153_v36 = vadd.f32 %v425_v11, %v133_v27  ;;  %v154_v37 = vadd.f32 %v425_v11, %v134_v28  ;;  %v277_v43 = vunpack.c.l.bf16 %v347_v31  ;;  %v278_v44 = vunpack.c.h.bf16 %v347_v31  ;;  %v349_v5 = vld [vmem:[%s558_s3 + $0x20] sm:$0xff]  }
   0x9   :  { %v151_v23 = vadd.f32 %v425_v11, %v131_v14  ;;  %v152_v24 = vadd.f32 %v425_v11, %v132_v15  ;;  %v83_v48 = vadd.f32 %v410_v4, %v63_v38  ;;  %v84_v49 = vadd.f32 %v410_v4, %v64_v39 }
   0xa   :  { %v169_v46 = vadd.f32 %v153_v36, %v81_v34  ;;  %v170_v47 = vadd.f32 %v154_v37, %v82_v35  ;;  %v135_v51 = vmul.f32 %v418_v8, %v277_v43  ;;  %v136_v52 = vmul.f32 %v418_v8, %v278_v44  ;;  %v351_v43 = vld [vmem:[%s558_s3 + $0x30] sm:$0xff]  }
   0xb   :  { %v167_v32 = vadd.f32 %v151_v23, %v79_v19  ;;  %v168_v33 = vadd.f32 %v152_v24, %v80_v20  ;;  %v249_v53 = vunpack.c.l.bf16 %v341_v40  ;;  %v250_v57 = vunpack.c.h.bf16 %v341_v40 }
   0xc   :  { %v185_v55 = vmax.f32 %v169_v46, 0.0  ;;  %v186_v56 = vmax.f32 %v170_v47, 0.0  ;;  %v281_v58 = vunpack.c.l.bf16 %v348_v45  ;;  %v155_v59 = vadd.f32 %v425_v11, %v135_v51 }
   0xd   :  { %v183_v41 = vmax.f32 %v167_v32, 0.0  ;;  %v184_v42 = vmax.f32 %v168_v33, 0.0  ;;  %v156_v60 = vadd.f32 %v425_v11, %v136_v52  ;;  %v65_v61 = vmul.f32 %v405_v1, %v249_v53  ;;  %v345_v52 = vld [vmem:[%s555_s0 + $0x38] sm:$0xff]  }
   0xe   :  { %v282_v62 = vunpack.c.h.bf16 %v348_v45  ;;  %v307_v63 = vpack.c.bf16 %v186_v56, %v185_v55  ;;  %v66_v0 = vmul.f32 %v405_v1, %v250_v57  ;;  %v137_v2 = vmul.f32 %v418_v8, %v281_v58 }
   0xf   :  { %v302_v50 = vpack.c.bf16 %v184_v42, %v183_v41  ;;  %v253_v3 = vunpack.c.l.bf16 %v342_v54  ;;  %v171_v6 = vadd.f32 %v155_v59, %v83_v48  ;;  %v172_v7 = vadd.f32 %v156_v60, %v84_v49 }
  0x10   :  { %v85_v9 = vadd.f32 %v410_v4, %v65_v61  ;;  %v138_v10 = vmul.f32 %v418_v8, %v282_v62  ;;  %353 = vst [vmem:[%s561_s6 + $0x8] sm:$0xff] %v307_v63   ;;  %v86_v12 = vadd.f32 %v410_v4, %v66_v0  ;;  %v157_v13 = vadd.f32 %v425_v11, %v137_v2  ;;  %v352_v2 = vld [vmem:[%s558_s3 + $0x38] sm:$0xff]  }
  0x11   :  { %303 = vst [vmem:[%s561_s6] sm:$0xff] %v302_v50   ;;  %v254_v14 = vunpack.c.h.bf16 %v342_v54  ;;  %v67_v15 = vmul.f32 %v405_v1, %v253_v3  ;;  %v187_v17 = vmax.f32 %v171_v6, 0.0  ;;  %v188_v18 = vmax.f32 %v172_v7, 0.0 }
  0x12   :  { %v158_v19 = vadd.f32 %v425_v11, %v138_v10  ;;  %v285_v20 = vunpack.c.l.bf16 %v349_v5  ;;  %v173_v21 = vadd.f32 %v157_v13, %v85_v9  ;;  %v286_v24 = vunpack.c.h.bf16 %v349_v5 }
  0x13   :  { %v68_v22 = vmul.f32 %v405_v1, %v254_v14  ;;  %v87_v23 = vadd.f32 %v410_v4, %v67_v15  ;;  %v312_v26 = vpack.c.bf16 %v188_v18, %v187_v17  ;;  %v257_v29 = vunpack.c.l.bf16 %v343_v16 }
  0x14   :  { %v174_v27 = vadd.f32 %v158_v19, %v86_v12  ;;  %v139_v28 = vmul.f32 %v418_v8, %v285_v20  ;;  %v189_v31 = vmax.f32 %v173_v21, 0.0  ;;  %v140_v33 = vmul.f32 %v418_v8, %v286_v24 }
  0x15   :  { %v88_v32 = vadd.f32 %v410_v4, %v68_v22  ;;  %v258_v34 = vunpack.c.h.bf16 %v343_v16  ;;  %354 = vst [vmem:[%s561_s6 + $0x10] sm:$0xff] %v312_v26   ;;  %v69_v37 = vmul.f32 %v405_v1, %v257_v29  ;;  %v289_v38 = vunpack.c.l.bf16 %v350_v25 }
  0x16   :  { %v190_v35 = vmax.f32 %v174_v27, 0.0  ;;  %v159_v36 = vadd.f32 %v425_v11, %v139_v28  ;;  %v160_v39 = vadd.f32 %v425_v11, %v140_v33  ;;  %v290_v41 = vunpack.c.h.bf16 %v350_v25 }
  0x17   :  { %v70_v40 = vmul.f32 %v405_v1, %v258_v34  ;;  %v261_v42 = vunpack.c.l.bf16 %v344_v30  ;;  %v89_v46 = vadd.f32 %v410_v4, %v69_v37  ;;  %v141_v47 = vmul.f32 %v418_v8, %v289_v38 }
  0x18   :  { %v317_v44 = vpack.c.bf16 %v190_v35, %v189_v31  ;;  %v175_v45 = vadd.f32 %v159_v36, %v87_v23  ;;  %v176_v48 = vadd.f32 %v160_v39, %v88_v32  ;;  %v142_v50 = vmul.f32 %v418_v8, %v290_v41 }
  0x19   :  { %v90_v49 = vadd.f32 %v410_v4, %v70_v40  ;;  %v262_v51 = vunpack.c.h.bf16 %v344_v30  ;;  %v161_v54 = vadd.f32 %v425_v11, %v141_v47  ;;  %v71_v55 = vmul.f32 %v405_v1, %v261_v42 }
  0x1a   :  { %355 = vst [vmem:[%s561_s6 + $0x18] sm:$0xff] %v317_v44   ;;  %v191_v53 = vmax.f32 %v175_v45, 0.0  ;;  %v293_v56 = vunpack.c.l.bf16 %v351_v43  ;;  %v192_v57 = vmax.f32 %v176_v48, 0.0  ;;  %v162_v58 = vadd.f32 %v425_v11, %v142_v50 }
  0x1b   :  { %v72_v59 = vmul.f32 %v405_v1, %v262_v51  ;;  %v294_v60 = vunpack.c.h.bf16 %v351_v43  ;;  %v177_v61 = vadd.f32 %v161_v54, %v89_v46  ;;  %v91_v62 = vadd.f32 %v410_v4, %v71_v55 }
  0x1c   :  { %v143_v63 = vmul.f32 %v418_v8, %v293_v56  ;;  %v265_v0 = vunpack.c.l.bf16 %v345_v52  ;;  %v322_v3 = vpack.c.bf16 %v192_v57, %v191_v53  ;;  %v178_v5 = vadd.f32 %v162_v58, %v90_v49 }
  0x1d   :  { %v92_v6 = vadd.f32 %v410_v4, %v72_v59  ;;  %v144_v7 = vmul.f32 %v418_v8, %v294_v60  ;;  %v193_v9 = vmax.f32 %v177_v61, 0.0  ;;  %v266_v12 = vunpack.c.h.bf16 %v345_v52 }
  0x1e   :  { %v163_v10 = vadd.f32 %v425_v11, %v143_v63  ;;  %v73_v13 = vmul.f32 %v405_v1, %v265_v0  ;;  %356 = vst [vmem:[%s561_s6 + $0x20] sm:$0xff] %v322_v3   ;;  %v194_v14 = vmax.f32 %v178_v5, 0.0  ;;  %v297_v16 = vunpack.c.l.bf16 %v352_v2 }
  0x1f   :  { %v164_v15 = vadd.f32 %v425_v11, %v144_v7  ;;  %v298_v17 = vunpack.c.h.bf16 %v352_v2  ;;  %v74_v19 = vmul.f32 %v405_v1, %v266_v12 }
  0x20   :  { %v179_v18 = vadd.f32 %v163_v10, %v91_v62  ;;  %v93_v20 = vadd.f32 %v410_v4, %v73_v13  ;;  %v327_v21 = vpack.c.bf16 %v194_v14, %v193_v9  ;;  %v145_v23 = vmul.f32 %v418_v8, %v297_v16 }
  0x21   :  { %v180_v22 = vadd.f32 %v164_v15, %v92_v6  ;;  %v146_v24 = vmul.f32 %v418_v8, %v298_v17  ;;  %v94_v26 = vadd.f32 %v410_v4, %v74_v19 }
  0x22   :  { %v195_v25 = vmax.f32 %v179_v18, 0.0  ;;  %357 = vst [vmem:[%s561_s6 + $0x28] sm:$0xff] %v327_v21   ;;  %v165_v28 = vadd.f32 %v425_v11, %v145_v23 }
  0x23   :  { %v196_v27 = vmax.f32 %v180_v22, 0.0  ;;  %v166_v1 = vadd.f32 %v425_v11, %v146_v24 }
  0x24   :  { %v181_v30 = vadd.f32 %v165_v28, %v93_v20 }
  0x25   :  { %v332_v29 = vpack.c.bf16 %v196_v27, %v195_v25  ;;  %v182_v31 = vadd.f32 %v166_v1, %v94_v26 }
  0x26   :  { %v197_v8 = vmax.f32 %v181_v30, 0.0 }
  0x27   :  { %358 = vst [vmem:[%s561_s6 + $0x30] sm:$0xff] %v332_v29   ;;  %v198_v32 = vmax.f32 %v182_v31, 0.0 }
  0x29   :  { %v337_v33 = vpack.c.bf16 %v198_v32, %v197_v8 }
  0x2b   :  { %359 = vst [vmem:[%s561_s6 + $0x38] sm:$0xff] %v337_v33  }

// kernel: residual_block_forward.5
= control target key start
LH: loop header
LB: loop body
LE: loop exit
PB: predicated region body
PF: predicated region fallthrough
CT: control target
= control target key end

     0   :  { %s2946_s24 = smov 0   ;;  %s2948_s25 = smov 0   ;;  %s3420_s0 = inlined_call_operand.vmem [shape: bf16[2,9,9,128], index: 0, kind: input, shape index: {}]   ;;  %s3421_s1 = inlined_call_operand.vmem [shape: bf16[2,9,9,128], index: 1, kind: input, shape index: {}]   ;;  %s3422_s2 = inlined_call_operand.vmem [shape: bf16[2,9,9,128], index: 2, kind: input, shape index: {}]   ;;  %s3423_s3 = inlined_call_operand.vmem [shape: bf16[2,9,9,128], index: 3, kind: input, shape index: {}]   ;;  %s3424_s4 = inlined_call_operand.vmem [shape: bf16[9,128,128], index: 4, kind: input, shape index: {}]   ;;  %s3425_s5 = inlined_call_operand.vmem [shape: bf16[2,64,128], index: 5, kind: output, shape index: {0}]   ;;  %s3426_s6 = inlined_call_operand.vmem [shape: f32[1,128], index: 6, kind: output, shape index: {1}]   ;;  %s3427_s7 = inlined_call_operand.vmem [shape: f32[1,128], index: 7, kind: output, shape index: {2}]  }
   0x1   :  { %s2950_s26 = smov 0  }
   0x2 LB: > { %s27_s27 = sadd.s32 1, %s2899_s25  ;;  %p2163_p0 = scmp.ge.s32.totalorder %s2903_s26, 1  ;;  %s2903_s26 = sphi %s2950_s26, %s18_s26   ;;  %s2899_s25 = sphi %s2948_s25, %s3431_s25   ;;  %s2895_s24 = sphi %s2946_s24, %s3430_s24  }
   0x3   : > { %p28_p1 = scmp.ge.s32.totalorder %s27_s27, 2  ;;  %p295_p2 = scmp.lt.s32.totalorder %s2903_s26, 3 }
   0x5   : > { %s3433_s27 = smov (%p28_p1, %s27_s27), 0  ;;  %p296_p3 = pnand %p2163_p0, %p295_p2 }
   0x6   : > { %p355_p4 = scmp.lt.s32.totalorder (!%p296_p3), %s2895_s24, 1  ;;  %p2170_p5 = scmp.ne.s32.totalorder (!%p296_p3), %s2895_s24, 0 }
   0x7   : > { %299 = sbr.rel (%p296_p3) target bundleno = 358 (0x166), region = 40 }
   0xc   : > { %s356_s28 = scalar_select %p355_p4, %s2895_s24, 1 }
   0xd   : > { %396 = sbr.rel (%p2170_p5) target bundleno = 21 (0x15), region = 44 }
   0xe   : > { %s2855_s29 = smul.u32 72, %s356_s28  ;;  %s2719_s30 = sshll.u32 %s356_s28, 5 }
   0xf   : > { %s2967_s10 = scalar_lea.vmem %s3425_s5, %s2719_s30 }
  0x10   : > { %s2972_s13 = scalar_lea.vmem %s3420_s0, %s2855_s29  ;;  %s2977_s16 = scalar_lea.vmem %s3421_s1, %s2855_s29 }
  0x11   : > { %s2982_s19 = scalar_lea.vmem %s3422_s2, %s2855_s29  ;;  %s2987_s22 = scalar_lea.vmem %s3423_s3, %s2855_s29 }
  0x12   : > { %v2905_v0 = vmov 0.0  }
  0x13   : > { %397 = vst [vmem:[%s3426_s6] sm:$0x1] %v2905_v0 }
  0x14   : > { %398 = vst [vmem:[%s3427_s7] sm:$0x1] %v2905_v0 }
  0x15 PF: > { %v2743_v1 = vld [vmem:[%s3424_s4 + $0x78] sm:$0xff]  ;;  %v2742_v3 = vld [vmem:[%s3424_s4 + $0x70] sm:$0xff]  ;;  %v2741_v7 = vld [vmem:[%s3424_s4 + $0x68] sm:$0xff]  ;;  %vm666_vm0 = vsmask.f32 3328 }
  0x16   : > { %v2751_v2 = vld [vmem:[%s3424_s4 + $0xb8] sm:$0xff]  ;;  %2839 = vmatpush.bf16.msra.mxu1 %v2743_v1  ;;  %520 = vmatpush.bf16.msra.mxu0 %v2743_v1  ;;  %v2750_v4 = vld [vmem:[%s3424_s4 + $0xb0] sm:$0xff]  ;;  %v2749_v8 = vld [vmem:[%s3424_s4 + $0xa8] sm:$0xff]  ;;  %vm667_vm1 = vsmask.f32 7440 }
  0x17   : > { %862 = vmatpush.bf16.msra.mxu2 %v2751_v2  ;;  %v2763_v5 = vld [vmem:[%s3424_s4 + $0xf8] sm:$0xff]  ;;  %v2762_v6 = vld [vmem:[%s3424_s4 + $0xf0] sm:$0xff]  ;;  %v2761_v9 = vld [vmem:[%s3424_s4 + $0xe8] sm:$0xff] }
  0x18   : > { %996 = vmatpush.bf16.msra.mxu3 %v2763_v5  ;;  %v650_v10 = vld [vmem:[%s2972_s13] sm:$0xf]  ;;  %v652_v12 = vld [vmem:[%s2972_s13 + $0x8] sm:$0xf]  ;;  %v651_v17 = vld [vmem:[%s2972_s13 + $0x4] sm:$0x1] }
  0x19   : > { %v2740_v11 = vld [vmem:[%s3424_s4 + $0x60] sm:$0xff]  ;;  %v670_v14 = vshrl.u32 %v650_v10, 16  ;;  %v673_v15 = vshll.u32 %v650_v10, 16  ;;  %v684_v16 = vshrl.u32 %v652_v12, 16  ;;  %v653_v18 = vld [vmem:[%s2972_s13 + $0xc] sm:$0x1]  ;;  %vm3052_vm2 = vmor %vm666_vm0, %vm667_vm1 }
  0x1a   : > { %2840 = vmatpush.bf16.msra.mxu1 %v2742_v3  ;;  %521 = vmatpush.bf16.msra.mxu0 %v2742_v3  ;;  %v2748_v13 = vld [vmem:[%s3424_s4 + $0xa0] sm:$0xff]  ;;  %v687_v19 = vshll.u32 %v652_v12, 16  ;;  %v2739_v24 = vld [vmem:[%s3424_s4 + $0x58] sm:$0xff]  ;;  %v679_v28 = vshll.u32 %v651_v17, 16  ;;  %v693_v29 = vshll.u32 %v653_v18, 16  ;;  %v2738_v32 = vld [vmem:[%s3424_s4 + $0x50] sm:$0xff] }
  0x1b   : > { %863 = vmatpush.bf16.msra.mxu2 %v2750_v4  ;;  %v2760_v20 = vld [vmem:[%s3424_s4 + $0xe0] sm:$0xff]  ;;  %v672_v21 = vrot.slane %v670_v14, 4  ;;  %v675_v22 = vrot.slane %v673_v15, 5  ;;  %v686_v23 = vrot.slane %v684_v16, 4  ;;  %v2747_v26 = vld [vmem:[%s3424_s4 + $0x98] sm:$0xff]  ;;  %v2746_v35 = vld [vmem:[%s3424_s4 + $0x90] sm:$0xff] }
  0x1c   : > { %997 = vmatpush.bf16.msra.mxu3 %v2762_v6  ;;  %v689_v25 = vrot.slane %v687_v19, 5  ;;  %v2759_v31 = vld [vmem:[%s3424_s4 + $0xd8] sm:$0xff]  ;;  %v654_v33 = vld [vmem:[%s2972_s13 + $0x10] sm:$0xf]  ;;  %v681_v37 = vrot.slane %v679_v28, 5  ;;  %v695_v39 = vrot.slane %v693_v29, 5 }
  0x1d   : > { %v676_v27 = vor.u32 %v675_v22, %v672_v21  ;;  %v656_v34 = vld [vmem:[%s2972_s13 + $0x18] sm:$0xf]  ;;  %v2758_v41 = vld [vmem:[%s3424_s4 + $0xd0] sm:$0xff]  ;;  %v698_v42 = vshrl.u32 %v654_v33, 16  ;;  %v701_v43 = vshll.u32 %v654_v33, 16  ;;  %v2737_v46 = vld [vmem:[%s3424_s4 + $0x48] sm:$0xff] }
  0x1e   : > { %2841 = vmatpush.bf16.msra.mxu1 %v2741_v7  ;;  %522 = vmatpush.bf16.msra.mxu0 %v2741_v7  ;;  %v690_v30 = vor.u32 %v689_v25, %v686_v23  ;;  %v712_v44 = vshrl.u32 %v656_v34, 16  ;;  %v715_v45 = vshll.u32 %v656_v34, 16  ;;  %v2745_v47 = vld [vmem:[%s3424_s4 + $0x88] sm:$0xff]  ;;  %v2736_v50 = vld [vmem:[%s3424_s4 + $0x40] sm:$0xff]  ;;  %v655_v54 = vld [vmem:[%s2972_s13 + $0x14] sm:$0x1] }
  0x1f   : > { %864 = vmatpush.bf16.msra.mxu2 %v2749_v8  ;;  %v677_v36 = vrot.slane %v676_v27, 4  ;;  %v2197_v51 = vld [vmem:[%s2977_s16 + $0x20] sm:$0xf]  ;;  %v2734_v52 = vld [vmem:[%s2977_s16 + $0x24] sm:$0xf0]  ;;  %v700_v55 = vrot.slane %v698_v42, 4 }
  0x20   : > { %998 = vmatpush.bf16.msra.mxu3 %v2761_v9  ;;  %v691_v38 = vrot.slane %v690_v30, 4  ;;  %v2757_v53 = vld [vmem:[%s3424_s4 + $0xc8] sm:$0xff]  ;;  %v703_v56 = vrot.slane %v701_v43, 5  ;;  %v714_v57 = vrot.slane %v712_v44, 4  ;;  %v717_v58 = vrot.slane %v715_v45, 5  ;;  %v2731_v0 = vld [vmem:[%s3424_s4 + $0x38] sm:$0xff] }
  0x21   : > { %v682_v48 = vsel %vm3052_vm2, %v677_v36, %v681_v37  ;;  %v2189_v59 = vld [vmem:[%s2977_s16] sm:$0xf]  ;;  %v2732_v60 = vld [vmem:[%s2977_s16 + $0x4] sm:$0xf0]  ;;  %v657_v63 = vld [vmem:[%s2972_s13 + $0x1c] sm:$0x1]  ;;  %v2198_v2 = vor.u32 %v2734_v52, %v2197_v51 }
  0x22   : > { %2842 = vmatpush.bf16.msra.mxu1 %v2740_v11  ;;  %523 = vmatpush.bf16.msra.mxu0 %v2740_v11  ;;  %v696_v49 = vsel %vm3052_vm2, %v691_v38, %v695_v39  ;;  %v798_v61 = vunpack.c.l.b16 %v682_v48  ;;  %v2744_v1 = vld [vmem:[%s3424_s4 + $0x80] sm:$0xff]  ;;  %v2775_v3 = vld [vmem:[%s3424_s4 + $0x138] sm:$0xff]  ;;  %v707_v5 = vshll.u32 %v655_v54, 16  ;;  %v2190_v6 = vor.u32 %v2732_v60, %v2189_v59  ;;  %v2730_v14 = vld [vmem:[%s3424_s4 + $0x30] sm:$0xff] }
  0x23   : > { %865 = vmatpush.bf16.msra.mxu2 %v2748_v13  ;;  %v799_v62 = vunpack.c.l.b16 %v696_v49  ;;  %v2795_v4 = vld [vmem:[%s3424_s4 + $0x1b8] sm:$0xff]  ;;  %v704_v7 = vor.u32 %v703_v56, %v700_v55  ;;  %v718_v8 = vor.u32 %v717_v58, %v714_v57  ;;  %v721_v9 = vshll.u32 %v657_v63, 16  ;;  %v2756_v11 = vld [vmem:[%s3424_s4 + $0xc0] sm:$0xff]  ;;  %v2752_v13 = vld [vmem:[%s2982_s19 + $0x4] sm:$0xf0] }
  0x24   : > { %999 = vmatpush.bf16.msra.mxu3 %v2760_v20  ;;  %v2349_v12 = vld [vmem:[%s2982_s19] sm:$0xf]  ;;  %v2807_v15 = vld [vmem:[%s3424_s4 + $0x1f8] sm:$0xff]  ;;  %v2774_v16 = vld [vmem:[%s3424_s4 + $0x130] sm:$0xff]  ;;  %v709_v17 = vrot.slane %v707_v5, 5 }
  0x25   : > { %v806_v10 = vpack.c.b16 %v799_v62, %v798_v61  ;;  %v2794_v18 = vld [vmem:[%s3424_s4 + $0x1b0] sm:$0xff]  ;;  %v2350_v19 = vor.u32 %v2752_v13, %v2349_v12  ;;  %v705_v20 = vrot.slane %v704_v7, 4  ;;  %v719_v21 = vrot.slane %v718_v8, 4  ;;  %v2729_v23 = vld [vmem:[%s3424_s4 + $0x28] sm:$0xff]  ;;  %v658_v25 = vld [vmem:[%s2972_s13 + $0x20] sm:$0xf] }
  0x26   : > { %2843 = vmatpush.bf16.msra.mxu1 %v2739_v24  ;;  %524 = vmatpush.bf16.msra.mxu0 %v2739_v24  ;;  %v723_v22 = vrot.slane %v721_v9, 5  ;;  %v2806_v24 = vld [vmem:[%s3424_s4 + $0x1f0] sm:$0xff]  ;;  %v2773_v27 = vld [vmem:[%s3424_s4 + $0x128] sm:$0xff]  ;;  %v2772_v37 = vld [vmem:[%s3424_s4 + $0x120] sm:$0xff] }
  0x27   : > { %866 = vmatpush.bf16.msra.mxu2 %v2747_v26  ;;  %v660_v26 = vld [vmem:[%s2972_s13 + $0x28] sm:$0xf]  ;;  %v710_v29 = vsel %vm3052_vm2, %v705_v20, %v709_v17  ;;  %v2792_v38 = vld [vmem:[%s3424_s4 + $0x1a0] sm:$0xff]  ;;  %v2201_v39 = vld [vmem:[%s2977_s16 + $0x30] sm:$0xf] }
  0x28   : > { %1000 = vmatpush.bf16.msra.mxu3 %v2759_v31  ;;  %v2793_v28 = vld [vmem:[%s3424_s4 + $0x1a8] sm:$0xff]  ;;  %v724_v30 = vsel %vm3052_vm2, %v719_v21, %v723_v22  ;;  %v726_v31 = vshrl.u32 %v658_v25, 16  ;;  %v740_v33 = vshrl.u32 %v660_v26, 16  ;;  %v743_v34 = vshll.u32 %v660_v26, 16  ;;  %v2193_v42 = vld [vmem:[%s2977_s16 + $0x10] sm:$0xf] }
  0x29   : > { %v2805_v36 = vld [vmem:[%s3424_s4 + $0x1e8] sm:$0xff]  ;;  %v800_v43 = vunpack.c.l.b16 %v710_v29  ;;  %v801_v44 = vunpack.c.l.b16 %v724_v30  ;;  %v2733_v45 = vld [vmem:[%s2977_s16 + $0x14] sm:$0xf0]  ;;  %v659_v51 = vld [vmem:[%s2972_s13 + $0x24] sm:$0x1] }
  0x2a   : > { %2844 = vmatpush.bf16.msra.mxu1 %v2738_v32  ;;  %525 = vmatpush.bf16.msra.mxu0 %v2738_v32  ;;  %v729_v32 = vshll.u32 %v658_v25, 16  ;;  %v742_v48 = vrot.slane %v740_v33, 4  ;;  %v745_v49 = vrot.slane %v743_v34, 5  ;;  %v661_v52 = vld [vmem:[%s2972_s13 + $0x2c] sm:$0x1]  ;;  %v2194_v55 = vor.u32 %v2733_v45, %v2193_v42  ;;  %v2726_v63 = vld [vmem:[%s3424_s4 + $0x10] sm:$0xff] }
  0x2b   : > { %867 = vmatpush.bf16.msra.mxu2 %v2746_v35  ;;  %v2728_v35 = vld [vmem:[%s3424_s4 + $0x20] sm:$0xff]  ;;  %v807_v56 = vpack.c.b16 %v801_v44, %v800_v43  ;;  %v2353_v57 = vld [vmem:[%s2982_s19 + $0x10] sm:$0xf]  ;;  %v2753_v58 = vld [vmem:[%s2982_s19 + $0x14] sm:$0xf0]  ;;  %v735_v60 = vshll.u32 %v659_v51, 16 }
  0x2c   : > { %1001 = vmatpush.bf16.msra.mxu3 %v2758_v41  ;;  %v2735_v41 = vld [vmem:[%s2977_s16 + $0x34] sm:$0xf0]  ;;  %v746_v61 = vor.u32 %v745_v49, %v742_v48  ;;  %v749_v62 = vshll.u32 %v661_v52, 16  ;;  %v2725_v7 = vld [vmem:[%s3424_s4 + $0x8] sm:$0xff]  ;;  %v2804_v9 = vld [vmem:[%s3424_s4 + $0x1e0] sm:$0xff] }
  0x2d   : > { %v2202_v54 = vor.u32 %v2735_v41, %v2201_v39  ;;  %v2769_v8 = vld [vmem:[%s3424_s4 + $0x108] sm:$0xff]  ;;  %v2790_v12 = vld [vmem:[%s3424_s4 + $0x190] sm:$0xff]  ;;  %v2783_v21 = vld [vmem:[%s3424_s4 + $0x178] sm:$0xff] }
  0x2e   : > { %2845 = vmatpush.bf16.msra.mxu1 %v2737_v46  ;;  %526 = vmatpush.bf16.msra.mxu0 %v2737_v46  ;;  %v728_v46 = vrot.slane %v726_v31, 4  ;;  %v747_v5 = vrot.slane %v746_v61, 4  ;;  %v2768_v22 = vld [vmem:[%s3424_s4 + $0x100] sm:$0xff]  ;;  %v2720_v25 = vld [vmem:[%s2972_s13 + $0x4] sm:$0xf0]  ;;  %v2782_v34 = vld [vmem:[%s3424_s4 + $0x170] sm:$0xff] }
  0x2f   : > { %868 = vmatpush.bf16.msra.mxu2 %v2745_v47  ;;  %v731_v47 = vrot.slane %v729_v32, 5  ;;  %v2413_v26 = vld [vmem:[%s2987_s22] sm:$0xf]  ;;  %v2754_v42 = vld [vmem:[%s2982_s19 + $0x24] sm:$0xf0]  ;;  %v2814_v43 = vld [vmem:[%s3424_s4 + $0x230] sm:$0xff] }
  0x30   : > { %1002 = vmatpush.bf16.msra.mxu3 %v2757_v53  ;;  %v2771_v53 = vld [vmem:[%s3424_s4 + $0x118] sm:$0xff]  ;;  %v2357_v41 = vld [vmem:[%s2982_s19 + $0x20] sm:$0xf]  ;;  %v2781_v48 = vld [vmem:[%s3424_s4 + $0x168] sm:$0xff] }
  0x31   : > { %v732_v59 = vor.u32 %v731_v47, %v728_v46  ;;  %v2789_v49 = vld [vmem:[%s3424_s4 + $0x188] sm:$0xff] }
  0x32   : > { %2846 = vmatpush.bf16.msra.mxu1 %v2736_v50  ;;  %527 = vmatpush.bf16.msra.mxu0 %v2736_v50  ;;  %v2727_v50 = vld [vmem:[%s3424_s4 + $0x18] sm:$0xff]  ;;  %v2813_v51 = vld [vmem:[%s3424_s4 + $0x228] sm:$0xff] }
  0x33   : > { %869 = vmatpush.bf16.msra.mxu2 %v2744_v1  ;;  %v2354_v1 = vor.u32 %v2753_v58, %v2353_v57  ;;  %v2802_v57 = vld [vmem:[%s3424_s4 + $0x1d0] sm:$0xff]  ;;  %v2780_v58 = vld [vmem:[%s3424_s4 + $0x160] sm:$0xff] }
  0x34   : > { %1003 = vmatpush.bf16.msra.mxu3 %v2756_v11  ;;  %v664_v11 = vld [vmem:[%s2972_s13 + $0x38] sm:$0xf] }
  0x35   : > { %538 = vmatmul.bf16.vlgmr.msra.gmra.mxu1 %v2198_v2  ;;  %528 = vmatmul.bf16.vlgmr.msra.gmra.mxu0 %v2190_v6  ;;  %v2791_v2 = vld [vmem:[%s3424_s4 + $0x198] sm:$0xff]  ;;  %v751_v6 = vrot.slane %v749_v62, 5  ;;  %v771_v20 = vshll.u32 %v664_v11, 16 }
  0x36   : > { %621 = vmatpush.bf16.msrb.mxu1 %v2731_v0  ;;  %1130 = vmatpush.bf16.msrb.mxu0 %v2775_v3  ;;  %v2770_v0 = vld [vmem:[%s3424_s4 + $0x110] sm:$0xff]  ;;  %v733_v3 = vrot.slane %v732_v59, 4  ;;  %v2812_v59 = vld [vmem:[%s3424_s4 + $0x220] sm:$0xff] }
  0x37   : > { %1511 = vmatpush.bf16.msrb.mxu2 %v2795_v4  ;;  %1004 = vmatmul.bf16.vlgmr.msra.gmra.mxu3 %v2350_v19  ;;  %v737_v4 = vrot.slane %v735_v60, 5  ;;  %v768_v19 = vshrl.u32 %v664_v11, 16  ;;  %v773_v33 = vrot.slane %v771_v20, 5  ;;  %v2801_v60 = vld [vmem:[%s3424_s4 + $0x1c8] sm:$0xff]  ;;  %v2755_v11 = vld [vmem:[%s2982_s19 + $0x34] sm:$0xf0] }
  0x38   : > { %870 = vmatmul.bf16.vlgmr.msra.gmra.mxu2 %v806_v10  ;;  %1646 = vmatpush.bf16.msrb.mxu3 %v2807_v15  ;;  %v662_v10 = vld [vmem:[%s2972_s13 + $0x30] sm:$0xf]  ;;  %v2803_v15 = vld [vmem:[%s3424_s4 + $0x1d8] sm:$0xff]  ;;  %v2722_v20 = vld [vmem:[%s2972_s13 + $0x24] sm:$0xf0] }
  0x39   : > { %v738_v13 = vsel %vm3052_vm2, %v733_v3, %v737_v4  ;;  %v754_v17 = vshrl.u32 %v662_v10, 16  ;;  %v770_v32 = vrot.slane %v768_v19, 4  ;;  %v2765_v3 = vld [vmem:[%s2987_s22 + $0x14] sm:$0xf0]  ;;  %v2245_v19 = vld [vmem:[%s2972_s13 + $0x20] sm:$0xf] }
  0x3a   : > { %622 = vmatpush.bf16.msrb.mxu1 %v2730_v14  ;;  %1131 = vmatpush.bf16.msrb.mxu0 %v2774_v16  ;;  %v752_v14 = vsel %vm3052_vm2, %v747_v5, %v751_v6  ;;  %v2724_v16 = vld [vmem:[%s3424_s4] sm:$0xff]  ;;  %v2778_v6 = vld [vmem:[%s3424_s4 + $0x150] sm:$0xff] }
  0x3b   : > { %1512 = vmatpush.bf16.msrb.mxu2 %v2794_v18  ;;  %v757_v18 = vshll.u32 %v662_v10, 16  ;;  %v803_v29 = vunpack.c.l.b16 %v752_v14  ;;  %v756_v30 = vrot.slane %v754_v17, 4  ;;  %v774_v46 = vor.u32 %v773_v33, %v770_v32  ;;  %v2361_v10 = vld [vmem:[%s2982_s19 + $0x30] sm:$0xf]  ;;  %v2811_v14 = vld [vmem:[%s3424_s4 + $0x218] sm:$0xff] }
  0x3c   : > { %1647 = vmatpush.bf16.msrb.mxu3 %v2806_v24  ;;  %v2815_v24 = vld [vmem:[%s3424_s4 + $0x238] sm:$0xff]  ;;  %v2810_v17 = vld [vmem:[%s3424_s4 + $0x210] sm:$0xff]  ;;  %v1167_v32 = vld [vmem:[%s2982_s19] sm:$0xf] }
  0x3d   : > { %v759_v31 = vrot.slane %v757_v18, 5  ;;  %v2809_v18 = vld [vmem:[%s3424_s4 + $0x208] sm:$0xff] }
  0x3e   : > { %623 = vmatpush.bf16.msrb.mxu1 %v2729_v23  ;;  %1132 = vmatpush.bf16.msrb.mxu0 %v2773_v27  ;;  %v2237_v23 = vld [vmem:[%s2972_s13] sm:$0xf]  ;;  %v2764_v27 = vld [vmem:[%s2987_s22 + $0x4] sm:$0xf0] }
  0x3f   : > { %1513 = vmatpush.bf16.msrb.mxu2 %v2793_v28  ;;  %v802_v28 = vunpack.c.l.b16 %v738_v13  ;;  %v760_v44 = vor.u32 %v759_v31, %v756_v30  ;;  %v2777_v13 = vld [vmem:[%s3424_s4 + $0x148] sm:$0xff]  ;;  %v2808_v31 = vld [vmem:[%s3424_s4 + $0x200] sm:$0xff] }
  0x40   : > { %1648 = vmatpush.bf16.msrb.mxu3 %v2805_v36  ;;  %v665_v36 = vld [vmem:[%s2972_s13 + $0x3c] sm:$0x1]  ;;  %v1169_v33 = vld [vmem:[%s2982_s19 + $0x8] sm:$0xf] }
  0x41   : > { %v808_v39 = vpack.c.b16 %v803_v29, %v802_v28  ;;  %v777_v47 = vshll.u32 %v665_v36, 16  ;;  %v761_v52 = vrot.slane %v760_v44, 4  ;;  %v2605_v28 = vld [vmem:[%s2977_s16 + $0x8] sm:$0xf]  ;;  %v2796_v29 = vld [vmem:[%s2977_s16 + $0xc] sm:$0xf0] }
  0x42   : > { %624 = vmatpush.bf16.msrb.mxu1 %v2728_v35  ;;  %1133 = vmatpush.bf16.msrb.mxu0 %v2772_v37  ;;  %v663_v35 = vld [vmem:[%s2972_s13 + $0x34] sm:$0x1]  ;;  %v2238_v37 = vor.u32 %v2720_v25, %v2237_v23  ;;  %v2533_v23 = vld [vmem:[%s2972_s13 + $0x8] sm:$0xf]  ;;  %v2246_v25 = vor.u32 %v2722_v20, %v2245_v19  ;;  %v2606_v30 = vor.u32 %v2796_v29, %v2605_v28  ;;  %v1184_v36 = vshrl.u32 %v1167_v32, 16 }
  0x43   : > { %1514 = vmatpush.bf16.msrb.mxu2 %v2792_v38  ;;  %v2414_v38 = vor.u32 %v2764_v27, %v2413_v26  ;;  %v763_v45 = vshll.u32 %v663_v35, 16  ;;  %v2653_v35 = vld [vmem:[%s2972_s13 + $0x10] sm:$0xf]  ;;  %v2655_v19 = vld [vmem:[%s2972_s13 + $0x18] sm:$0xf] }
  0x44   : > { %1649 = vmatpush.bf16.msrb.mxu3 %v2804_v9  ;;  %v1717_v44 = vshll.u32 %v2653_v35, 16  ;;  %v2657_v20 = vld [vmem:[%s2972_s13 + $0x20] sm:$0xf]  ;;  %v1728_v29 = vshrl.u32 %v2655_v19, 16 }
  0x45   : > { %543 = vmatmul.bf16.gmra.mxu1 %v2202_v54  ;;  %533 = vmatmul.bf16.gmra.mxu0 %v2194_v55  ;;  %v775_v54 = vrot.slane %v774_v46, 4  ;;  %v779_v55 = vrot.slane %v777_v47, 5  ;;  %v2723_v46 = vld [vmem:[%s2972_s13 + $0x34] sm:$0xf0]  ;;  %v2425_v47 = vld [vmem:[%s2987_s22 + $0x30] sm:$0xf] }
  0x46   : > { %625 = vmatpush.bf16.msrb.mxu1 %v2727_v50  ;;  %1134 = vmatpush.bf16.msrb.mxu0 %v2771_v53  ;;  %v2358_v50 = vor.u32 %v2754_v42, %v2357_v41  ;;  %v765_v53 = vrot.slane %v763_v45, 5  ;;  %v2249_v45 = vld [vmem:[%s2972_s13 + $0x30] sm:$0xf] }
  0x47   : > { %1515 = vmatpush.bf16.msrb.mxu2 %v2791_v2  ;;  %1009 = vmatmul.bf16.gmra.mxu3 %v2354_v1  ;;  %v780_v62 = vsel %vm3052_vm2, %v775_v54, %v779_v55  ;;  %v2721_v1 = vld [vmem:[%s2972_s13 + $0x14] sm:$0xf0]  ;;  %v2417_v2 = vld [vmem:[%s2987_s22 + $0x10] sm:$0xf] }
  0x48   : > { %875 = vmatmul.bf16.gmra.mxu2 %v807_v56  ;;  %1650 = vmatpush.bf16.msrb.mxu3 %v2803_v15  ;;  %v2788_v56 = vld [vmem:[%s3424_s4 + $0x180] sm:$0xff]  ;;  %v766_v61 = vsel %vm3052_vm2, %v761_v52, %v765_v53  ;;  %v805_v5 = vunpack.c.l.b16 %v780_v62  ;;  %v1186_v52 = vrot.slane %v1184_v36, 4  ;;  %v2654_v62 = vld [vmem:[%s2972_s13 + $0x14] sm:$0x1] }
  0x49   : > { %v804_v4 = vunpack.c.l.b16 %v766_v61  ;;  %v2800_v15 = vld [vmem:[%s3424_s4 + $0x1c0] sm:$0xff]  ;;  %v2652_v61 = vld [vmem:[%s2972_s13 + $0xc] sm:$0x1] }
  0x4a   : > { %626 = vmatpush.bf16.msrb.mxu1 %v2726_v63  ;;  %1135 = vmatpush.bf16.msrb.mxu0 %v2770_v0  ;;  %v2779_v63 = vld [vmem:[%s3424_s4 + $0x158] sm:$0xff]  ;;  %v2241_v0 = vld [vmem:[%s2972_s13 + $0x10] sm:$0xf] }
  0x4b   : > { %1516 = vmatpush.bf16.msrb.mxu2 %v2790_v12  ;;  %v809_v9 = vpack.c.b16 %v805_v5, %v804_v4  ;;  %v2362_v12 = vor.u32 %v2755_v11, %v2361_v10  ;;  %v1723_v11 = vshll.u32 %v2654_v62, 16 }
  0x4c   : > { %1651 = vmatpush.bf16.msrb.mxu3 %v2802_v57 }
  0x4e   : > { %627 = vmatpush.bf16.msrb.mxu1 %v2725_v7  ;;  %1136 = vmatpush.bf16.msrb.mxu0 %v2769_v8  ;;  %v2242_v7 = vor.u32 %v2721_v1, %v2241_v0  ;;  %v2418_v8 = vor.u32 %v2765_v3, %v2417_v2 }
  0x4f   : > { %1517 = vmatpush.bf16.msrb.mxu2 %v2789_v49  ;;  %v2537_v49 = vld [vmem:[%s2972_s13 + $0x18] sm:$0xf] }
  0x50   : > { %1652 = vmatpush.bf16.msrb.mxu3 %v2801_v60  ;;  %v1719_v60 = vrot.slane %v1717_v44, 5  ;;  %v1730_v44 = vrot.slane %v1728_v29, 4 }
  0x52   : > { %628 = vmatpush.bf16.msrb.mxu1 %v2724_v16  ;;  %1137 = vmatpush.bf16.msrb.mxu0 %v2768_v22  ;;  %v2776_v16 = vld [vmem:[%s3424_s4 + $0x140] sm:$0xff]  ;;  %v2766_v22 = vld [vmem:[%s2987_s22 + $0x24] sm:$0xf0] }
  0x53   : > { %1518 = vmatpush.bf16.msrb.mxu2 %v2788_v56  ;;  %v2785_v56 = vld [vmem:[%s2972_s13 + $0x1c] sm:$0xf0] }
  0x54   : > { %1653 = vmatpush.bf16.msrb.mxu3 %v2800_v15  ;;  %v2538_v3 = vor.u32 %v2785_v56, %v2537_v49  ;;  %v1173_v15 = vld [vmem:[%s2982_s19 + $0x18] sm:$0xf] }
  0x55   : > { %629 = vmatmul.bf16.vlgmr.msrb.gmra.mxu1 %v2238_v37  ;;  %1138 = vmatmul.bf16.vlgmr.msrb.gmra.mxu0 %v2414_v38  ;;  %v1187_v37 = vshll.u32 %v1167_v32, 16  ;;  %v1198_v38 = vshrl.u32 %v1169_v33, 16  ;;  %v1229_v28 = vshll.u32 %v1173_v15, 16  ;;  %v1745_v32 = vshll.u32 %v2657_v20, 16 }
  0x56   : > { %1376 = vmatpush.bf16.msra.mxu1 %v2783_v21  ;;  %1892 = vmatpush.bf16.msra.mxu0 %v2815_v24  ;;  %v2421_v21 = vld [vmem:[%s2987_s22 + $0x20] sm:$0xf] }
  0x57   : > { %1014 = vmatmul.bf16.gmra.mxu3 %v2358_v50  ;;  %2847 = vmatpush.bf16.msra.mxu2 %v2815_v24  ;;  %v2784_v24 = vld [vmem:[%s2972_s13 + $0xc] sm:$0xf0]  ;;  %v2422_v26 = vor.u32 %v2766_v22, %v2421_v21  ;;  %v1168_v50 = vld [vmem:[%s2982_s19 + $0x4] sm:$0x1]  ;;  %v1189_v53 = vrot.slane %v1187_v37, 5  ;;  %v1200_v54 = vrot.slane %v1198_v38, 4 }
  0x58   : > { %880 = vmatmul.bf16.gmra.mxu2 %v808_v39  ;;  %v2534_v27 = vor.u32 %v2784_v24, %v2533_v23  ;;  %v1201_v39 = vshll.u32 %v1169_v33, 16  ;;  %v1193_v0 = vshll.u32 %v1168_v50, 16  ;;  %v1725_v24 = vrot.slane %v1723_v11, 5  ;;  %v1172_v37 = vld [vmem:[%s2982_s19 + $0x14] sm:$0x1] }
  0x59   : > { %v1190_v4 = vor.u32 %v1189_v53, %v1186_v52  ;;  %v2656_v52 = vld [vmem:[%s2972_s13 + $0x1c] sm:$0x1]  ;;  %v2658_v53 = vld [vmem:[%s2972_s13 + $0x24] sm:$0x1] }
  0x5a   : > { %1377 = vmatpush.bf16.msra.mxu1 %v2782_v34  ;;  %1893 = vmatpush.bf16.msra.mxu0 %v2814_v43  ;;  %v2651_v34 = vld [vmem:[%s2972_s13 + $0x8] sm:$0xf]  ;;  %v1203_v55 = vrot.slane %v1201_v39, 5 }
  0x5b   : > { %2848 = vmatpush.bf16.msra.mxu2 %v2814_v43  ;;  %v1700_v41 = vshrl.u32 %v2651_v34, 16  ;;  %v1703_v42 = vshll.u32 %v2651_v34, 16  ;;  %v1714_v43 = vshrl.u32 %v2653_v35, 16 }
  0x5c   : > { %v1204_v5 = vor.u32 %v1203_v55, %v1200_v54  ;;  %v2541_v54 = vld [vmem:[%s2972_s13 + $0x28] sm:$0xf]  ;;  %v2786_v55 = vld [vmem:[%s2972_s13 + $0x2c] sm:$0xf0] }
  0x5d   : > { %v1702_v57 = vrot.slane %v1700_v41, 4 }
  0x5e   : > { %1378 = vmatpush.bf16.msra.mxu1 %v2781_v48  ;;  %1894 = vmatpush.bf16.msra.mxu0 %v2813_v51  ;;  %v2767_v48 = vld [vmem:[%s2987_s22 + $0x34] sm:$0xf0] }
  0x5f   : > { %2849 = vmatpush.bf16.msra.mxu2 %v2813_v51  ;;  %v1170_v51 = vld [vmem:[%s2982_s19 + $0xc] sm:$0x1]  ;;  %v2426_v2 = vor.u32 %v2767_v48, %v2425_v47  ;;  %v1747_v47 = vrot.slane %v1745_v32, 5 }
  0x60   : > { %v1207_v1 = vshll.u32 %v1170_v51, 16 }
  0x62   : > { %1379 = vmatpush.bf16.msra.mxu1 %v2780_v58  ;;  %1895 = vmatpush.bf16.msra.mxu0 %v2812_v59  ;;  %v1705_v58 = vrot.slane %v1703_v42, 5  ;;  %v1231_v42 = vrot.slane %v1229_v28, 5 }
  0x63   : > { %2850 = vmatpush.bf16.msra.mxu2 %v2812_v59  ;;  %v1716_v59 = vrot.slane %v1714_v43, 4  ;;  %v1174_v43 = vld [vmem:[%s2982_s19 + $0x1c] sm:$0x1] }
  0x65   : > { %634 = vmatmul.bf16.gmra.mxu1 %v2242_v7  ;;  %1143 = vmatmul.bf16.gmra.mxu0 %v2418_v8  ;;  %v2797_v7 = vld [vmem:[%s2977_s16 + $0x1c] sm:$0xf0]  ;;  %v1706_v8 = vor.u32 %v1705_v58, %v1702_v57  ;;  %v1720_v10 = vor.u32 %v1719_v60, %v1716_v59  ;;  %v1221_v57 = vshll.u32 %v1172_v37, 16  ;;  %v1235_v59 = vshll.u32 %v1174_v43, 16  ;;  %v1176_v43 = vld [vmem:[%s2982_s19 + $0x24] sm:$0x1] }
  0x66   : > { %1380 = vmatpush.bf16.msra.mxu1 %v2779_v63  ;;  %1896 = vmatpush.bf16.msra.mxu0 %v2811_v14  ;;  %v2250_v63 = vor.u32 %v2723_v46, %v2249_v45 }
  0x67   : > { %1019 = vmatmul.bf16.gmra.mxu3 %v2362_v12  ;;  %2851 = vmatpush.bf16.msra.mxu2 %v2811_v14  ;;  %v1195_v12 = vrot.slane %v1193_v0, 5  ;;  %v1171_v14 = vld [vmem:[%s2982_s19 + $0x10] sm:$0xf]  ;;  %v1707_v21 = vrot.slane %v1706_v8, 4  ;;  %v1721_v23 = vrot.slane %v1720_v10, 4  ;;  %v1237_v8 = vrot.slane %v1235_v59, 5 }
  0x68   : > { %885 = vmatmul.bf16.gmra.mxu2 %v809_v9  ;;  %v1709_v9 = vshll.u32 %v2652_v61, 16  ;;  %v1737_v61 = vshll.u32 %v2656_v52, 16  ;;  %v2545_v52 = vld [vmem:[%s2972_s13 + $0x38] sm:$0xf]  ;;  %v2664_v59 = vld [vmem:[%s2972_s13 + $0x3c] sm:$0x1] }
  0x69   : > { %v1726_v36 = vsel %vm3052_vm2, %v1721_v23, %v1725_v24 }
  0x6a   : > { %1381 = vmatpush.bf16.msra.mxu1 %v2778_v6  ;;  %1897 = vmatpush.bf16.msra.mxu0 %v2810_v17  ;;  %v2609_v6 = vld [vmem:[%s2977_s16 + $0x18] sm:$0xf]  ;;  %v1711_v22 = vrot.slane %v1709_v9, 5  ;;  %v1829_v51 = vunpack.c.l.b16 %v1726_v36  ;;  %v1739_v10 = vrot.slane %v1737_v61, 5 }
  0x6b   : > { %2852 = vmatpush.bf16.msra.mxu2 %v2810_v17  ;;  %v1205_v17 = vrot.slane %v1204_v5, 4 }
  0x6c   : > { %v1712_v35 = vsel %vm3052_vm2, %v1707_v21, %v1711_v22  ;;  %v2663_v22 = vld [vmem:[%s2972_s13 + $0x38] sm:$0xf] }
  0x6d   : > { %v1828_v50 = vunpack.c.l.b16 %v1712_v35  ;;  %v1787_v35 = vshll.u32 %v2663_v22, 16 }
  0x6e   : > { %1382 = vmatpush.bf16.msra.mxu1 %v2777_v13  ;;  %1898 = vmatpush.bf16.msra.mxu0 %v2809_v18  ;;  %v1209_v13 = vrot.slane %v1207_v1, 5 }
  0x6f   : > { %2853 = vmatpush.bf16.msra.mxu2 %v2809_v18  ;;  %v2610_v18 = vor.u32 %v2797_v7, %v2609_v6  ;;  %v1836_v1 = vpack.c.b16 %v1829_v51, %v1828_v50  ;;  %v1223_v6 = vrot.slane %v1221_v57, 5  ;;  %v2787_v57 = vld [vmem:[%s2972_s13 + $0x3c] sm:$0xf0] }
  0x70   : > { %v1210_v34 = vsel %vm3052_vm2, %v1205_v17, %v1209_v13  ;;  %v1175_v13 = vld [vmem:[%s2982_s19 + $0x20] sm:$0xf]  ;;  %v2661_v17 = vld [vmem:[%s2972_s13 + $0x30] sm:$0xf] }
  0x71   : > { %v1313_v49 = vunpack.c.l.b16 %v1210_v34  ;;  %v1243_v21 = vshll.u32 %v1175_v13, 16  ;;  %v1784_v34 = vshrl.u32 %v2663_v22, 16 }
  0x72   : > { %1383 = vmatpush.bf16.msra.mxu1 %v2776_v16  ;;  %1899 = vmatpush.bf16.msra.mxu0 %v2808_v31  ;;  %v1191_v16 = vrot.slane %v1190_v4, 4  ;;  %v2798_v4 = vld [vmem:[%s2977_s16 + $0x2c] sm:$0xf0] }
  0x73   : > { %2854 = vmatpush.bf16.msra.mxu2 %v2808_v31  ;;  %v1742_v31 = vshrl.u32 %v2657_v20, 16  ;;  %v1240_v20 = vshrl.u32 %v1175_v13, 16  ;;  %v1245_v37 = vrot.slane %v1243_v21, 5 }
  0x74   : > { %v1196_v33 = vsel %vm3052_vm2, %v1191_v16, %v1195_v12  ;;  %v2659_v16 = vld [vmem:[%s2972_s13 + $0x28] sm:$0xf] }
  0x75   : > { %639 = vmatmul.bf16.gmra.mxu1 %v2246_v25  ;;  %1148 = vmatmul.bf16.gmra.mxu0 %v2422_v26  ;;  %v1212_v25 = vshrl.u32 %v1171_v14, 16  ;;  %v1215_v26 = vshll.u32 %v1171_v14, 16  ;;  %v1744_v46 = vrot.slane %v1742_v31, 4  ;;  %v1312_v48 = vunpack.c.l.b16 %v1196_v33 }
  0x76   : > { %v1756_v28 = vshrl.u32 %v2659_v16, 16  ;;  %v1759_v29 = vshll.u32 %v2659_v16, 16  ;;  %v1773_v31 = vshll.u32 %v2661_v17, 16  ;;  %v1242_v36 = vrot.slane %v1240_v20, 4 }
  0x77   : > { %1654 = vmatmul.bf16.vlgmr.msrb.gmra.mxu3 %v2606_v30  ;;  %v1731_v30 = vshll.u32 %v2655_v19, 16  ;;  %v1214_v38 = vrot.slane %v1212_v25, 4  ;;  %v1217_v39 = vrot.slane %v1215_v26, 5  ;;  %v1748_v62 = vor.u32 %v1747_v47, %v1744_v46  ;;  %v2660_v47 = vld [vmem:[%s2972_s13 + $0x2c] sm:$0x1] }
  0x78   : > { %1519 = vmatmul.bf16.vlgmr.msrb.gmra.mxu2 %v2534_v27  ;;  %v1226_v27 = vshrl.u32 %v1173_v15, 16  ;;  %v1320_v0 = vpack.c.b16 %v1313_v49, %v1312_v48  ;;  %v1177_v15 = vld [vmem:[%s2982_s19 + $0x28] sm:$0xf]  ;;  %v1758_v48 = vrot.slane %v1756_v28, 4  ;;  %v1761_v49 = vrot.slane %v1759_v29, 5 }
  0x79   : > { %v1733_v45 = vrot.slane %v1731_v30, 5  ;;  %v1218_v56 = vor.u32 %v1217_v39, %v1214_v38  ;;  %v1749_v11 = vrot.slane %v1748_v62, 4  ;;  %v1254_v25 = vshrl.u32 %v1177_v15, 16  ;;  %v1181_v28 = vld [vmem:[%s2982_s19 + $0x38] sm:$0xf] }
  0x7a   : > { %v1228_v41 = vrot.slane %v1226_v27, 4  ;;  %v1257_v26 = vshll.u32 %v1177_v15, 16  ;;  %v2665_v27 = vld [vmem:[%s2972_s13 + $0x40] sm:$0xf]  ;;  %v1770_v30 = vshrl.u32 %v2661_v17, 16  ;;  %v1775_v51 = vrot.slane %v1773_v31, 5 }
  0x7b   : > { %v1734_v60 = vor.u32 %v1733_v45, %v1730_v44  ;;  %v1219_v5 = vrot.slane %v1218_v56, 4  ;;  %v1798_v38 = vshrl.u32 %v2665_v27, 16  ;;  %v1801_v39 = vshll.u32 %v2665_v27, 16  ;;  %v1178_v44 = vld [vmem:[%s2982_s19 + $0x2c] sm:$0x1] }
  0x7c   : > { %v1232_v58 = vor.u32 %v1231_v42, %v1228_v41  ;;  %v1256_v45 = vrot.slane %v1254_v25, 4  ;;  %v1259_v46 = vrot.slane %v1257_v26, 5  ;;  %v1772_v50 = vrot.slane %v1770_v30, 4  ;;  %v1179_v25 = vld [vmem:[%s2982_s19 + $0x30] sm:$0xf] }
  0x7d   : > { %v1735_v9 = vrot.slane %v1734_v60, 4  ;;  %v1800_v60 = vrot.slane %v1798_v38, 4  ;;  %v1803_v61 = vrot.slane %v1801_v39, 5  ;;  %v1249_v62 = vshll.u32 %v1176_v43, 16 }
  0x7e   : > { %v1233_v7 = vrot.slane %v1232_v58, 4  ;;  %v1246_v58 = vor.u32 %v1245_v37, %v1242_v36  ;;  %v1282_v36 = vshrl.u32 %v1181_v28, 16  ;;  %v1285_v37 = vshll.u32 %v1181_v28, 16 }
  0x7f   : > { %v1740_v23 = vsel %vm3052_vm2, %v1735_v9, %v1739_v10  ;;  %v2799_v9 = vld [vmem:[%s2977_s16 + $0x3c] sm:$0xf0]  ;;  %v1804_v13 = vor.u32 %v1803_v61, %v1800_v60  ;;  %v1251_v15 = vrot.slane %v1249_v62, 5 }
  0x80   : > { %v1238_v19 = vsel %vm3052_vm2, %v1233_v7, %v1237_v8  ;;  %v1830_v41 = vunpack.c.l.b16 %v1740_v23  ;;  %v2546_v7 = vor.u32 %v2787_v57, %v2545_v52  ;;  %v2617_v8 = vld [vmem:[%s2977_s16 + $0x38] sm:$0xf] }
  0x81   : > { %v1315_v33 = vunpack.c.l.b16 %v1238_v19  ;;  %v2618_v19 = vor.u32 %v2799_v9, %v2617_v8  ;;  %v1805_v26 = vrot.slane %v1804_v13, 4 }
  0x85   : > { %644 = vmatmul.bf16.gmra.mxu1 %v2250_v63  ;;  %1153 = vmatmul.bf16.gmra.mxu0 %v2426_v2  ;;  %v1751_v63 = vshll.u32 %v2658_v53, 16  ;;  %v2542_v2 = vor.u32 %v2786_v55, %v2541_v54  ;;  %v2662_v53 = vld [vmem:[%s2972_s13 + $0x34] sm:$0x1]  ;;  %v1786_v54 = vrot.slane %v1784_v34, 4  ;;  %v1789_v55 = vrot.slane %v1787_v35, 5 }
  0x86   : > { %v1271_v35 = vshll.u32 %v1179_v25, 16 }
  0x87   : > { %1659 = vmatmul.bf16.gmra.mxu3 %v2610_v18  ;;  %v1753_v12 = vrot.slane %v1751_v63, 5  ;;  %v1224_v18 = vsel %vm3052_vm2, %v1219_v5, %v1223_v6  ;;  %v1260_v63 = vor.u32 %v1259_v46, %v1256_v45  ;;  %v1776_v5 = vor.u32 %v1775_v51, %v1772_v50  ;;  %v1182_v51 = vld [vmem:[%s2982_s19 + $0x3c] sm:$0x1] }
  0x88   : > { %1524 = vmatmul.bf16.gmra.mxu2 %v2538_v3  ;;  %v2613_v3 = vld [vmem:[%s2977_s16 + $0x28] sm:$0xf]  ;;  %v1314_v32 = vunpack.c.l.b16 %v1224_v18  ;;  %v1779_v6 = vshll.u32 %v2662_v53, 16  ;;  %v1790_v10 = vor.u32 %v1789_v55, %v1786_v54  ;;  %v1287_v50 = vrot.slane %v1285_v37, 5 }
  0x89   : > { %v2614_v14 = vor.u32 %v2798_v4, %v2613_v3  ;;  %v1754_v24 = vsel %vm3052_vm2, %v1749_v11, %v1753_v12  ;;  %v1762_v4 = vor.u32 %v1761_v49, %v1758_v48  ;;  %v1793_v11 = vshll.u32 %v2664_v59, 16 }
  0x8a   : > { %v1831_v42 = vunpack.c.l.b16 %v1754_v24  ;;  %v1321_v56 = vpack.c.b16 %v1315_v33, %v1314_v32  ;;  %v1247_v12 = vrot.slane %v1246_v58, 4  ;;  %v1261_v16 = vrot.slane %v1260_v63, 4 }
  0x8b   : > { %v1763_v20 = vrot.slane %v1762_v4, 4  ;;  %v1777_v21 = vrot.slane %v1776_v5, 4  ;;  %v1781_v22 = vrot.slane %v1779_v6, 5  ;;  %v1791_v23 = vrot.slane %v1790_v10, 4 }
  0x8c   : > { %v1837_v3 = vpack.c.b16 %v1831_v42, %v1830_v41  ;;  %v1795_v24 = vrot.slane %v1793_v11, 5  ;;  %v1252_v29 = vsel %vm3052_vm2, %v1247_v12, %v1251_v15  ;;  %v1268_v33 = vshrl.u32 %v1179_v25, 16 }
  0x8d   : > { %v1782_v32 = vsel %vm3052_vm2, %v1777_v21, %v1781_v22  ;;  %v1316_v39 = vunpack.c.l.b16 %v1252_v29  ;;  %v1273_v48 = vrot.slane %v1271_v35, 5  ;;  %v1284_v49 = vrot.slane %v1282_v36, 4 }
  0x8e   : > { %v1796_v34 = vsel %vm3052_vm2, %v1791_v23, %v1795_v24  ;;  %v1833_v43 = vunpack.c.l.b16 %v1782_v32  ;;  %v1270_v45 = vrot.slane %v1268_v33, 4  ;;  %v1291_v60 = vshll.u32 %v1182_v51, 16 }
  0x8f   : > { %v1288_v59 = vor.u32 %v1287_v50, %v1284_v49 }
  0x90   : > { %v1274_v58 = vor.u32 %v1273_v48, %v1270_v45 }
  0x91   : > { %v1289_v63 = vrot.slane %v1288_v59, 4 }
  0x92   : > { %v1275_v61 = vrot.slane %v1274_v58, 4 }
  0x95   : > { %1384 = vmatmul.bf16.vlgmr.msra.gmra.mxu1 %v1320_v0  ;;  %1900 = vmatmul.bf16.vlgmr.msra.gmra.mxu0 %v1836_v1  ;;  %v1263_v0 = vshll.u32 %v1178_v44, 16  ;;  %v1765_v1 = vshll.u32 %v2660_v47, 16  ;;  %v1834_v44 = vunpack.c.l.b16 %v1796_v34  ;;  %v1180_v47 = vld [vmem:[%s2982_s19 + $0x34] sm:$0x1] }
  0x96   : > { %v1277_v54 = vshll.u32 %v1180_v47, 16 }
  0x97   : > { %1664 = vmatmul.bf16.gmra.mxu3 %v2614_v14  ;;  %v1265_v17 = vrot.slane %v1263_v0, 5  ;;  %v1767_v18 = vrot.slane %v1765_v1, 5  ;;  %v1293_v0 = vrot.slane %v1291_v60, 5 }
  0x98   : > { %1529 = vmatmul.bf16.gmra.mxu2 %v2542_v2  ;;  %v2666_v2 = vld [vmem:[%s2972_s13 + $0x44] sm:$0x1]  ;;  %v1279_v62 = vrot.slane %v1277_v54, 5 }
  0x99   : > { %v1807_v14 = vshll.u32 %v2666_v2, 16  ;;  %v1266_v30 = vsel %vm3052_vm2, %v1261_v16, %v1265_v17  ;;  %v1768_v31 = vsel %vm3052_vm2, %v1763_v20, %v1767_v18  ;;  %v1294_v5 = vsel %vm3052_vm2, %v1289_v63, %v1293_v0 }
  0x9a   : > { %v1317_v41 = vunpack.c.l.b16 %v1266_v30  ;;  %v1832_v42 = vunpack.c.l.b16 %v1768_v31  ;;  %v1280_v4 = vsel %vm3052_vm2, %v1275_v61, %v1279_v62  ;;  %v1319_v8 = vunpack.c.l.b16 %v1294_v5 }
  0x9b   : > { %v1809_v27 = vrot.slane %v1807_v14, 5 }
  0x9c   : > { %v1322_v52 = vpack.c.b16 %v1317_v41, %v1316_v39  ;;  %v1838_v53 = vpack.c.b16 %v1833_v43, %v1832_v42 }
  0x9d   : > { %v1810_v38 = vsel %vm3052_vm2, %v1805_v26, %v1809_v27 }
  0x9e   : > { %v1835_v46 = vunpack.c.l.b16 %v1810_v38 }
  0xa0   : > { %v1839_v57 = vpack.c.b16 %v1835_v46, %v1834_v44 }
  0xa5   : > { %1389 = vmatmul.bf16.gmra.mxu1 %v1321_v56  ;;  %1905 = vmatmul.bf16.gmra.mxu0 %v1837_v3 }
  0xa7   : > { %1669 = vmatmul.bf16.gmra.mxu3 %v2618_v19 }
  0xa8   : > { %1534 = vmatmul.bf16.gmra.mxu2 %v2546_v7  ;;  %v1318_v7 = vunpack.c.l.b16 %v1280_v4 }
  0xaa   : > { %v1323_v9 = vpack.c.b16 %v1319_v8, %v1318_v7 }
  0xb2   : > { %v539_v55 = vpop.f32.mrf.mxu1  ;;  %v529_v56 = vpop.f32.mrf.mxu0 }
  0xb5   : > { %1394 = vmatmul.bf16.gmra.mxu1 %v1322_v52  ;;  %1910 = vmatmul.bf16.gmra.mxu0 %v1838_v53 }
  0xb8   : > { %1915 = vmatmul.bf16.vlgmr.msra.gmra.mxu2 %v1839_v57 }
  0xba   : > { %v541_v2 = vpop.f32.mrf.mxu1  ;;  %v531_v3 = vpop.f32.mrf.mxu0 }
  0xbb   : > { %v871_v1 = vpop.f32.mrf.mxu2  ;;  %v1005_v6 = vpop.f32.mrf.mxu3 }
  0xc2   : > { %v544_v11 = vpop.f32.mrf.mxu1  ;;  %v534_v12 = vpop.f32.mrf.mxu0 }
  0xc3   : > { %v873_v10 = vpop.f32.mrf.mxu2  ;;  %v3359_v13 = vpop.f32.mrf.mxu3 }
  0xc5   : > { %1399 = vmatmul.bf16.gmra.mxu1 %v1323_v9 }
  0xca   : > { %v546_v15 = vpop.f32.mrf.mxu1  ;;  %v536_v16 = vpop.f32.mrf.mxu0 }
  0xcb   : > { %v876_v14 = vpop.f32.mrf.mxu2  ;;  %v1010_v17 = vpop.f32.mrf.mxu3 }
  0xd2   : > { %v630_v19 = vpop.f32.mrf.mxu1  ;;  %v1139_v20 = vpop.f32.mrf.mxu0 }
  0xd3   : > { %v878_v18 = vpop.f32.mrf.mxu2  ;;  %v631_v21 = vadd.f32 %v630_v19, %v529_v56  ;;  %v3361_v22 = vpop.f32.mrf.mxu3 }
  0xd5   : > { %v891_v40 = vadd.f32 %v871_v1, %v631_v21 }
  0xd7   : > { %v1025_v23 = vadd.f32 %v1005_v6, %v891_v40 }
  0xd9   : > { %v1159_v24 = vadd.f32 %v1139_v20, %v1025_v23 }
  0xda   : > { %v632_v26 = vpop.f32.mrf.mxu1  ;;  %v1141_v27 = vpop.f32.mrf.mxu0 }
  0xdb   : > { %v881_v25 = vpop.f32.mrf.mxu2  ;;  %v633_v28 = vadd.f32 %v632_v26, %v531_v3  ;;  %v1015_v30 = vpop.f32.mrf.mxu3 }
  0xdd   : > { %v892_v29 = vadd.f32 %v873_v10, %v633_v28 }
  0xe2   : > { %v635_v32 = vpop.f32.mrf.mxu1  ;;  %v1144_v33 = vpop.f32.mrf.mxu0 }
  0xe3   : > { %v883_v31 = vpop.f32.mrf.mxu2  ;;  %v636_v34 = vadd.f32 %v635_v32, %v534_v12  ;;  %v3363_v39 = vpop.f32.mrf.mxu3  ;;  %v1026_v12 = vadd.f32 %v3359_v13, %v892_v29 }
  0xe5   : > { %v893_v35 = vadd.f32 %v876_v14, %v636_v34 }
  0xe7   : > { %v1027_v36 = vadd.f32 %v1010_v17, %v893_v35 }
  0xe9   : > { %v1161_v37 = vadd.f32 %v1144_v33, %v1027_v36 }
  0xea   : > { %v637_v41 = vpop.f32.mrf.mxu1  ;;  %v1146_v42 = vpop.f32.mrf.mxu0 }
  0xeb   : > { %v886_v38 = vpop.f32.mrf.mxu2  ;;  %v638_v43 = vadd.f32 %v637_v41, %v536_v16  ;;  %v3365_v49 = vpop.f32.mrf.mxu3  ;;  %v1160_v16 = vadd.f32 %v1141_v27, %v1026_v12 }
  0xed   : > { %v894_v44 = vadd.f32 %v878_v18, %v638_v43 }
  0xef   : > { %v1028_v27 = vadd.f32 %v3361_v22, %v894_v44 }
  0xf2   : > { %v640_v46 = vpop.f32.mrf.mxu1  ;;  %v1149_v47 = vpop.f32.mrf.mxu0 }
  0xf3   : > { %v888_v45 = vpop.f32.mrf.mxu2  ;;  %v641_v48 = vadd.f32 %v640_v46, %v539_v55  ;;  %v3373_v59 = vpop.f32.mrf.mxu3 }
  0xf5   : > { %v895_v50 = vadd.f32 %v881_v25, %v641_v48 }
  0xf7   : > { %v1029_v51 = vadd.f32 %v1015_v30, %v895_v50 }
  0xf9   : > { %v3367_v52 = vadd.f32 %v1149_v47, %v1029_v51 }
  0xfa   : > { %v642_v54 = vpop.f32.mrf.mxu1  ;;  %v3369_v56 = vpop.f32.mrf.mxu0 }
  0xfb   : > { %v1520_v53 = vpop.f32.mrf.mxu2  ;;  %v643_v57 = vadd.f32 %v642_v54, %v541_v2  ;;  %v1655_v0 = vpop.f32.mrf.mxu3 }
  0xfd   : > { %v3371_v58 = vadd.f32 %v883_v31, %v643_v57 }
 0x102   : > { %v645_v61 = vpop.f32.mrf.mxu1  ;;  %v3375_v62 = vpop.f32.mrf.mxu0 }
 0x103   : > { %v1522_v60 = vpop.f32.mrf.mxu2  ;;  %v646_v55 = vadd.f32 %v645_v61, %v544_v11  ;;  %v1657_v2 = vpop.f32.mrf.mxu3 }
 0x105   : > { %v3377_v63 = vadd.f32 %v886_v38, %v646_v55  ;;  %v1162_v38 = vadd.f32 %v1146_v42, %v1028_v27 }
 0x10a   : > { %v647_v3 = vpop.f32.mrf.mxu1  ;;  %v3379_v4 = vpop.f32.mrf.mxu0 }
 0x10b   : > { %v1525_v1 = vpop.f32.mrf.mxu2  ;;  %v648_v5 = vadd.f32 %v647_v3, %v546_v15  ;;  %v1660_v20 = vpop.f32.mrf.mxu3 }
 0x10d   : > { %v3381_v6 = vadd.f32 %v888_v45, %v648_v5 }
 0x112   : > { %v1385_v7 = vpop.f32.mrf.mxu1  ;;  %v1901_v8 = vpop.f32.mrf.mxu0 }
 0x113   : > { %v1405_v9 = vadd.f32 %v1385_v7, %v1159_v24  ;;  %v1527_v10 = vpop.f32.mrf.mxu2  ;;  %v1662_v34 = vpop.f32.mrf.mxu3 }
 0x115   : > { %v1540_v14 = vadd.f32 %v1520_v53, %v1405_v9 }
 0x117   : > { %v1675_v11 = vadd.f32 %v1655_v0, %v1540_v14  ;;  %v1030_v0 = vadd.f32 %v3363_v39, %v3371_v58 }
 0x119   : > { %v1921_v40 = vadd.f32 %v1901_v8, %v1675_v11 }
 0x11a   : > { %v1387_v17 = vpop.f32.mrf.mxu1  ;;  %v1903_v18 = vpop.f32.mrf.mxu0 }
 0x11b   : > { %v1406_v19 = vadd.f32 %v1387_v17, %v1160_v16  ;;  %v1530_v15 = vpop.f32.mrf.mxu2  ;;  %v1962_v26 = vmul.f32 %v1921_v40, %v1921_v40 }
 0x11d   : > { %v1541_v21 = vadd.f32 %v1522_v60, %v1406_v19 }
 0x11f   : > { %v1676_v23 = vadd.f32 %v1657_v2, %v1541_v21  ;;  %v1164_v2 = vadd.f32 %v3369_v56, %v1030_v0 }
 0x121   : > { %v1922_v25 = vadd.f32 %v1903_v18, %v1676_v23 }
 0x122   : > { %v1390_v28 = vpop.f32.mrf.mxu1  ;;  %v1906_v30 = vpop.f32.mrf.mxu0 }
 0x123   : > { %v2819_v24 = vpack.c.bf16 %v1922_v25, %v1921_v40  ;;  %v1946_v31 = vadd.f32 %v1922_v25, %v1921_v40  ;;  %v1963_v32 = vmul.f32 %v1922_v25, %v1922_v25  ;;  %v1407_v13 = vadd.f32 %v1390_v28, %v1161_v37  ;;  %v1532_v36 = vpop.f32.mrf.mxu2  ;;  %v1665_v37 = vpop.f32.mrf.mxu3 }
 0x124   : > { %v1032_v25 = vadd.f32 %v3373_v59, %v3381_v6 }
 0x125   : > { %2820 = vst [vmem:[%s2967_s10] sm:$0xff] %v2819_v24   ;;  %v1970_v29 = vadd.f32 %v1963_v32, %v1962_v26  ;;  %v1542_v33 = vadd.f32 %v1525_v1, %v1407_v13 }
 0x127   : > { %v1677_v35 = vadd.f32 %v1660_v20, %v1542_v33 }
 0x129   : > { %v1923_v41 = vadd.f32 %v1906_v30, %v1677_v35  ;;  %v1166_v30 = vadd.f32 %v3379_v4, %v1032_v25 }
 0x12a   : > { %v1392_v43 = vpop.f32.mrf.mxu1  ;;  %v1908_v45 = vpop.f32.mrf.mxu0 }
 0x12b   : > { %v1947_v46 = vadd.f32 %v1946_v31, %v1923_v41  ;;  %v1964_v47 = vmul.f32 %v1923_v41, %v1923_v41  ;;  %v1408_v48 = vadd.f32 %v1392_v43, %v1162_v38  ;;  %v1535_v22 = vpop.f32.mrf.mxu2  ;;  %v1667_v8 = vpop.f32.mrf.mxu3 }
 0x12d   : > { %v1971_v50 = vadd.f32 %v1970_v29, %v1964_v47  ;;  %v1543_v51 = vadd.f32 %v1527_v10, %v1408_v48 }
 0x12f   : > { %v1678_v53 = vadd.f32 %v1662_v34, %v1543_v51 }
 0x131   : > { %v1924_v54 = vadd.f32 %v1908_v45, %v1678_v53 }
 0x132   : > { %v1395_v44 = vpop.f32.mrf.mxu1  ;;  %v1911_v42 = vpop.f32.mrf.mxu0 }
 0x133   : > { %v2824_v57 = vpack.c.bf16 %v1924_v54, %v1923_v41  ;;  %v1948_v60 = vadd.f32 %v1947_v46, %v1924_v54  ;;  %v1965_v61 = vmul.f32 %v1924_v54, %v1924_v54  ;;  %v1409_v55 = vadd.f32 %v1395_v44, %v3367_v52  ;;  %v1537_v16 = vpop.f32.mrf.mxu2  ;;  %v1670_v23 = vpop.f32.mrf.mxu3  ;;  %v1961_v44 = vld [vmem:[%s3427_s7] sm:$0x1] }
 0x134   : > { %v1031_v52 = vadd.f32 %v3365_v49, %v3377_v63 }
 0x135   : > { %2836 = vst [vmem:[%s2967_s10 + $0x8] sm:$0xff] %v2824_v57   ;;  %v1972_v1 = vadd.f32 %v1971_v50, %v1965_v61  ;;  %v1544_v3 = vadd.f32 %v1530_v15, %v1409_v55 }
 0x136   : > { %v1165_v18 = vadd.f32 %v3375_v62, %v1031_v52 }
 0x137   : > { %v1679_v5 = vadd.f32 %v1665_v37, %v1544_v3  ;;  %v1945_v37 = vld [vmem:[%s3426_s6] sm:$0x1] }
 0x139   : > { %v1925_v7 = vadd.f32 %v1911_v42, %v1679_v5 }
 0x13a   : > { %v1397_v9 = vpop.f32.mrf.mxu1  ;;  %v1913_v39 = vpop.f32.mrf.mxu0 }
 0x13b   : > { %v1949_v10 = vadd.f32 %v1948_v60, %v1925_v7  ;;  %v1966_v12 = vmul.f32 %v1925_v7, %v1925_v7  ;;  %v1410_v14 = vadd.f32 %v1397_v9, %v1164_v2  ;;  %v1916_v49 = vpop.f32.mrf.mxu2  ;;  %v1672_v33 = vpop.f32.mrf.mxu3 }
 0x13d   : > { %v1973_v11 = vadd.f32 %v1972_v1, %v1966_v12  ;;  %v1545_v17 = vadd.f32 %v1532_v36, %v1410_v14 }
 0x13f   : > { %v1680_v58 = vadd.f32 %v1667_v8, %v1545_v17 }
 0x141   : > { %v1926_v19 = vadd.f32 %v1913_v39, %v1680_v58 }
 0x142   : > { %v1400_v20 = vpop.f32.mrf.mxu1 }
 0x143   : > { %v2829_v56 = vpack.c.bf16 %v1926_v19, %v1925_v7  ;;  %v1950_v21 = vadd.f32 %v1949_v10, %v1926_v19  ;;  %v1967_v40 = vmul.f32 %v1926_v19, %v1926_v19  ;;  %v1411_v15 = vadd.f32 %v1400_v20, %v1165_v18  ;;  %v1918_v35 = vpop.f32.mrf.mxu2 }
 0x145   : > { %2837 = vst [vmem:[%s2967_s10 + $0x10] sm:$0xff] %v2829_v56   ;;  %v1974_v26 = vadd.f32 %v1973_v11, %v1967_v40  ;;  %v1546_v28 = vadd.f32 %v1535_v22, %v1411_v15 }
 0x147   : > { %v1681_v63 = vadd.f32 %v1670_v23, %v1546_v28 }
 0x149   : > { %v1927_v24 = vadd.f32 %v1916_v49, %v1681_v63 }
 0x14a   : > { %v1402_v62 = vpop.f32.mrf.mxu1 }
 0x14b   : > { %v1951_v31 = vadd.f32 %v1950_v21, %v1927_v24  ;;  %v1968_v32 = vmul.f32 %v1927_v24, %v1927_v24  ;;  %v1412_v13 = vadd.f32 %v1402_v62, %v1166_v30 }
 0x14d   : > { %v1975_v27 = vadd.f32 %v1974_v26, %v1968_v32  ;;  %v1547_v29 = vadd.f32 %v1537_v16, %v1412_v13 }
 0x14f   : > { %v1682_v34 = vadd.f32 %v1672_v33, %v1547_v29 }
 0x151   : > { %v1928_v36 = vadd.f32 %v1918_v35, %v1682_v34 }
 0x153   : > { %v2834_v59 = vpack.c.bf16 %v1928_v36, %v1927_v24  ;;  %v1952_v6 = vadd.f32 %v1951_v31, %v1928_v36  ;;  %v1969_v38 = vmul.f32 %v1928_v36, %v1928_v36 }
 0x155   : > { %2838 = vst [vmem:[%s2967_s10 + $0x18] sm:$0xff] %v2834_v59   ;;  %v1953_v41 = vrot.slane %v1952_v6, 4  ;;  %v1976_v43 = vadd.f32 %v1975_v27, %v1969_v38 }
 0x157   : > { %v1954_v45 = vadd.f32 %v1953_v41, %v1952_v6  ;;  %v1977_v46 = vrot.slane %v1976_v43, 4 }
 0x159   : > { %v1955_v4 = vrot.slane %v1954_v45, 2  ;;  %v1978_v47 = vadd.f32 %v1977_v46, %v1976_v43 }
 0x15b   : > { %v1956_v48 = vadd.f32 %v1955_v4, %v1954_v45  ;;  %v1979_v50 = vrot.slane %v1978_v47, 2 }
 0x15d   : > { %v1957_v51 = vrot.slane %v1956_v48, 1  ;;  %v1980_v53 = vadd.f32 %v1979_v50, %v1978_v47 }
 0x15f   : > { %v1958_v54 = vadd.f32 %v1957_v51, %v1956_v48  ;;  %v1981_v22 = vrot.slane %v1980_v53, 1 }
 0x161   : > { %v1959_v57 = vadd.f32 %v1958_v54, %v1945_v37  ;;  %v1982_v60 = vadd.f32 %v1981_v22, %v1980_v53 }
 0x163   : > { %1960 = vst [vmem:[%s3426_s6] sm:$0x1] %v1959_v57  ;;  %v1983_v61 = vadd.f32 %v1982_v60, %v1961_v44 }
 0x165   : > { %1984 = vst [vmem:[%s3427_s7] sm:$0x1] %v1983_v61 }
 0x166 PF: > { %s18_s26 = sadd.s32 1, %s2903_s26   ;;  %s3430_s24 = smov %s2899_s25 }
 0x167   : > { %p15_p6 = scmp.ge.s32.totalorder %s18_s26, 4   ;;  %s3431_s25 = smov %s3433_s27 }
 0x169   :  { %17 = sbr.rel (!%p15_p6) target bundleno = 2 (0x2), region = 120 }

// kernel: residual_block_forward.7
= control target key start
LH: loop header
LB: loop body
LE: loop exit
PB: predicated region body
PF: predicated region fallthrough
CT: control target
= control target key end

     0   :  { %s2862_s15 = smov 0   ;;  %s2864_s16 = smov 0   ;;  %s3515_s0 = inlined_call_operand.vmem [shape: bf16[2,10,10,128], index: 0, kind: input, shape index: {}]   ;;  %s3516_s1 = inlined_call_operand.vmem [shape: bf16[9,128,128], index: 1, kind: input, shape index: {}]   ;;  %s3517_s2 = inlined_call_operand.vmem [shape: bf16[2,64,128], index: 2, kind: output, shape index: {0}]   ;;  %s3518_s3 = inlined_call_operand.vmem [shape: f32[1,128], index: 3, kind: output, shape index: {1}]   ;;  %s3519_s4 = inlined_call_operand.vmem [shape: f32[1,128], index: 4, kind: output, shape index: {2}]  }
   0x1   :  { %s2866_s17 = smov 0  }
   0x2 LB: > { %s24_s18 = sadd.s32 1, %s2830_s16  ;;  %p2101_p0 = scmp.ge.s32.totalorder %s2834_s17, 1  ;;  %s2834_s17 = sphi %s2866_s17, %s15_s17   ;;  %s2830_s16 = sphi %s2864_s16, %s3525_s16   ;;  %s2826_s15 = sphi %s2862_s15, %s3524_s15  }
   0x3   : > { %p25_p1 = scmp.ge.s32.totalorder %s24_s18, 2  ;;  %p190_p2 = scmp.lt.s32.totalorder %s2834_s17, 3 }
   0x5   : > { %s3527_s18 = smov (%p25_p1, %s24_s18), 0  ;;  %p191_p3 = pnand %p2101_p0, %p190_p2 }
   0x6   : > { %p229_p4 = scmp.lt.s32.totalorder (!%p191_p3), %s2826_s15, 1  ;;  %p2105_p5 = scmp.ne.s32.totalorder (!%p191_p3), %s2826_s15, 0 }
   0x7   : > { %194 = sbr.rel (%p191_p3) target bundleno = 358 (0x166), region = 28 }
   0xc   : > { %s230_s19 = scalar_select %p229_p4, %s2826_s15, 1 }
   0xd   : > { %255 = sbr.rel (%p2105_p5) target bundleno = 21 (0x15), region = 32 }
   0xe   : > { %s2786_s20 = smul.u32 80, %s230_s19  ;;  %s2662_s21 = sshll.u32 %s230_s19, 5 }
   0xf   : > { %s2883_s24 = scalar_lea.vmem %s3517_s2, %s2662_s21 }
  0x10   : > { %s2888_s27 = scalar_lea.vmem %s3515_s0, %s2786_s20 }
  0x12   : > { %v2836_v0 = vmov 0.0  }
  0x13   : > { %256 = vst [vmem:[%s3518_s3] sm:$0x1] %v2836_v0 }
  0x14   : > { %257 = vst [vmem:[%s3519_s4] sm:$0x1] %v2836_v0 }
  0x15 PF: > { %v2682_v1 = vld [vmem:[%s3516_s1 + $0x78] sm:$0xff]  ;;  %v2681_v3 = vld [vmem:[%s3516_s1 + $0x70] sm:$0xff]  ;;  %v262_v7 = vld [vmem:[%s2888_s27 + $0x20] sm:$0xf]  ;;  %vm290_vm0 = vsmask.f32 3328 }
  0x16   : > { %v2690_v2 = vld [vmem:[%s3516_s1 + $0xb8] sm:$0xff]  ;;  %2770 = vmatpush.bf16.msra.mxu1 %v2682_v1  ;;  %486 = vmatpush.bf16.msra.mxu0 %v2682_v1  ;;  %v2689_v4 = vld [vmem:[%s3516_s1 + $0xb0] sm:$0xff]  ;;  %v2680_v8 = vld [vmem:[%s3516_s1 + $0x68] sm:$0xff]  ;;  %v350_v12 = vshrl.u32 %v262_v7, 16  ;;  %v353_v13 = vshll.u32 %v262_v7, 16  ;;  %vm640_vm3 = vcmask 1042432  }
  0x17   : > { %756 = vmatpush.bf16.msra.mxu2 %v2690_v2  ;;  %v2702_v5 = vld [vmem:[%s3516_s1 + $0xf8] sm:$0xff]  ;;  %v2701_v6 = vld [vmem:[%s3516_s1 + $0xf0] sm:$0xff]  ;;  %v263_v9 = vld [vmem:[%s2888_s27 + $0x28] sm:$0xf]  ;;  %vm291_vm1 = vsmask.f32 7440 }
  0x18   : > { %891 = vmatpush.bf16.msra.mxu3 %v2702_v5  ;;  %v2688_v10 = vld [vmem:[%s3516_s1 + $0xa8] sm:$0xff]  ;;  %v2923_v11 = vld [vmem:[%s2888_s27 + $0x24] sm:$0x1]  ;;  %v364_v14 = vshrl.u32 %v263_v9, 16  ;;  %v367_v17 = vshll.u32 %v263_v9, 16  ;;  %v352_v19 = vrot.slane %v350_v12, 4  ;;  %vm2960_vm2 = vmor %vm290_vm0, %vm291_vm1 }
  0x19   : > { %v2679_v15 = vld [vmem:[%s3516_s1 + $0x60] sm:$0xff]  ;;  %v2929_v16 = vld [vmem:[%s2888_s27 + $0x2c] sm:$0x1]  ;;  %v355_v20 = vrot.slane %v353_v13, 5  ;;  %v359_v23 = vshll.u32 %v2923_v11, 16  ;;  %v2678_v41 = vld [vmem:[%s3516_s1 + $0x58] sm:$0xff] }
  0x1a   : > { %2771 = vmatpush.bf16.msra.mxu1 %v2681_v3  ;;  %487 = vmatpush.bf16.msra.mxu0 %v2681_v3  ;;  %v2700_v18 = vld [vmem:[%s3516_s1 + $0xe8] sm:$0xff]  ;;  %v366_v21 = vrot.slane %v364_v14, 4  ;;  %v258_v22 = vld [vmem:[%s2888_s27] sm:$0xf]  ;;  %v369_v24 = vrot.slane %v367_v17, 5  ;;  %v373_v29 = vshll.u32 %v2929_v16, 16 }
  0x1b   : > { %757 = vmatpush.bf16.msra.mxu2 %v2689_v4  ;;  %v259_v25 = vld [vmem:[%s2888_s27 + $0x8] sm:$0xf]  ;;  %v2938_v26 = vld [vmem:[%s2888_s27 + $0x4] sm:$0x1]  ;;  %v356_v28 = vor.u32 %v355_v20, %v352_v19  ;;  %v2945_v30 = vld [vmem:[%s2888_s27 + $0xc] sm:$0x1] }
  0x1c   : > { %892 = vmatpush.bf16.msra.mxu3 %v2701_v6  ;;  %v2687_v27 = vld [vmem:[%s3516_s1 + $0xa0] sm:$0xff]  ;;  %v294_v31 = vshrl.u32 %v258_v22, 16  ;;  %v297_v32 = vshll.u32 %v258_v22, 16  ;;  %v370_v33 = vor.u32 %v369_v24, %v366_v21  ;;  %v303_v34 = vshll.u32 %v2938_v26, 16  ;;  %v2686_v46 = vld [vmem:[%s3516_s1 + $0x98] sm:$0xff]  ;;  %v2677_v59 = vld [vmem:[%s3516_s1 + $0x50] sm:$0xff] }
  0x1d   : > { %v308_v35 = vshrl.u32 %v259_v25, 16  ;;  %v311_v36 = vshll.u32 %v259_v25, 16  ;;  %v2699_v37 = vld [vmem:[%s3516_s1 + $0xe0] sm:$0xff]  ;;  %v317_v40 = vshll.u32 %v2945_v30, 16  ;;  %v357_v42 = vrot.slane %v356_v28, 4  ;;  %v2698_v58 = vld [vmem:[%s3516_s1 + $0xd8] sm:$0xff] }
  0x1e   : > { %2772 = vmatpush.bf16.msra.mxu1 %v2680_v8  ;;  %488 = vmatpush.bf16.msra.mxu0 %v2680_v8  ;;  %v296_v38 = vrot.slane %v294_v31, 4  ;;  %v299_v39 = vrot.slane %v297_v32, 5  ;;  %v361_v43 = vrot.slane %v359_v23, 5  ;;  %v371_v48 = vrot.slane %v370_v33, 4  ;;  %v616_v51 = vld [vmem:[%s2888_s27] sm:$0xe] }
  0x1f   : > { %758 = vmatpush.bf16.msra.mxu2 %v2688_v10  ;;  %v310_v44 = vrot.slane %v308_v35, 4  ;;  %v313_v45 = vrot.slane %v311_v36, 5  ;;  %v375_v49 = vrot.slane %v373_v29, 5  ;;  %v305_v52 = vrot.slane %v303_v34, 5  ;;  %v617_v54 = vld [vmem:[%s2888_s27 + $0x8] sm:$0xe] }
  0x20   : > { %893 = vmatpush.bf16.msra.mxu3 %v2700_v18  ;;  %v300_v50 = vor.u32 %v299_v39, %v296_v38  ;;  %vm641_vm4 = vcmask 1046532   ;;  %v264_v55 = vld [vmem:[%s2888_s27 + $0x30] sm:$0xf]  ;;  %v319_v57 = vrot.slane %v317_v40, 5  ;;  %v362_v60 = vsel %vm2960_vm2, %v357_v42, %v361_v43  ;;  %v265_v0 = vld [vmem:[%s2888_s27 + $0x38] sm:$0xf] }
  0x21   : > { %v314_v53 = vor.u32 %v313_v45, %v310_v44  ;;  %v2202_v62 = vrot.slane %v616_v51, 9  ;;  %v645_v63 = vrot.slane %v2938_v26, 5  ;;  %v2685_v1 = vld [vmem:[%s3516_s1 + $0x90] sm:$0xff]  ;;  %v376_v2 = vsel %vm2960_vm2, %v371_v48, %v375_v49  ;;  %vm2984_vm5 = vmor %vm640_vm3, %vm641_vm4  ;;  %v261_v20 = vld [vmem:[%s2888_s27 + $0x18] sm:$0xf] }
  0x22   : > { %2773 = vmatpush.bf16.msra.mxu1 %v2679_v15  ;;  %489 = vmatpush.bf16.msra.mxu0 %v2679_v15  ;;  %v301_v56 = vrot.slane %v300_v50, 4  ;;  %v2203_v4 = vrot.slane %v617_v54, 9  ;;  %v649_v5 = vrot.slane %v2945_v30, 5  ;;  %v378_v6 = vshrl.u32 %v264_v55, 16  ;;  %v260_v7 = vld [vmem:[%s2888_s27 + $0x10] sm:$0xf] }
  0x23   : > { %759 = vmatpush.bf16.msra.mxu2 %v2687_v27  ;;  %v315_v61 = vrot.slane %v314_v53, 4  ;;  %v381_v9 = vshll.u32 %v264_v55, 16  ;;  %v2992_v10 = vunpack.c.l.b16 %v362_v60  ;;  %v2697_v13 = vld [vmem:[%s3516_s1 + $0xd0] sm:$0xff]  ;;  %v392_v14 = vshrl.u32 %v265_v0, 16  ;;  %v2676_v15 = vld [vmem:[%s3516_s1 + $0x48] sm:$0xff]  ;;  %v2675_v39 = vld [vmem:[%s3516_s1 + $0x40] sm:$0xff] }
  0x24   : > { %894 = vmatpush.bf16.msra.mxu3 %v2699_v37  ;;  %v306_v8 = vsel %vm2960_vm2, %v301_v56, %v305_v52  ;;  %v3002_v17 = vunpack.c.l.b16 %v376_v2  ;;  %v646_v18 = vsel %vm2984_vm5, %v2202_v62, %v645_v63  ;;  %v395_v19 = vshll.u32 %v265_v0, 16  ;;  %v2684_v22 = vld [vmem:[%s3516_s1 + $0x88] sm:$0xff]  ;;  %v3015_v25 = vld [vmem:[%s2888_s27 + $0x34] sm:$0x1]  ;;  %v3021_v30 = vld [vmem:[%s2888_s27 + $0x3c] sm:$0x1] }
  0x25   : > { %v320_v12 = vsel %vm2960_vm2, %v315_v61, %v319_v57  ;;  %v322_v21 = vshrl.u32 %v260_v7, 16  ;;  %v3010_v23 = vunpack.c.l.b16 %v306_v8  ;;  %v650_v24 = vsel %vm2984_vm5, %v2203_v4, %v649_v5  ;;  %v2696_v29 = vld [vmem:[%s3516_s1 + $0xc8] sm:$0xff]  ;;  %v3024_v34 = vld [vmem:[%s2888_s27 + $0x14] sm:$0x1]  ;;  %v2674_v40 = vld [vmem:[%s3516_s1 + $0x38] sm:$0xff] }
  0x26   : > { %2774 = vmatpush.bf16.msra.mxu1 %v2678_v41  ;;  %490 = vmatpush.bf16.msra.mxu0 %v2678_v41  ;;  %v380_v26 = vrot.slane %v378_v6, 4  ;;  %v325_v27 = vshll.u32 %v260_v7, 16  ;;  %v423_v28 = vunpack.c.l.b16 %v320_v12  ;;  %v383_v31 = vrot.slane %v381_v9, 5  ;;  %v2683_v43 = vld [vmem:[%s3516_s1 + $0x80] sm:$0xff]  ;;  %v3037_v45 = vld [vmem:[%s2888_s27 + $0x1c] sm:$0x1] }
  0x27   : > { %760 = vmatpush.bf16.msra.mxu2 %v2686_v46  ;;  %v394_v32 = vrot.slane %v392_v14, 4  ;;  %v397_v33 = vrot.slane %v395_v19, 5  ;;  %v324_v35 = vrot.slane %v322_v21, 4  ;;  %v336_v37 = vshrl.u32 %v261_v20, 16  ;;  %v2710_v49 = vld [vmem:[%s3516_s1 + $0x138] sm:$0xff]  ;;  %v2695_v61 = vld [vmem:[%s3516_s1 + $0xc0] sm:$0xff] }
  0x28   : > { %895 = vmatpush.bf16.msra.mxu3 %v2698_v58  ;;  %v327_v36 = vrot.slane %v325_v27, 5  ;;  %v339_v38 = vshll.u32 %v261_v20, 16  ;;  %v692_v41 = vunpack.c.l.b16 %v646_v18  ;;  %v693_v42 = vunpack.c.l.b16 %v650_v24  ;;  %v2730_v52 = vld [vmem:[%s3516_s1 + $0x1b8] sm:$0xff]  ;;  %v2284_v58 = vld [vmem:[%s2888_s27 + $0x8] sm:$0xf]  ;;  %v2709_v2 = vld [vmem:[%s3516_s1 + $0x130] sm:$0xff] }
  0x29   : > { %v387_v44 = vshll.u32 %v3015_v25, 16  ;;  %v338_v46 = vrot.slane %v336_v37, 4  ;;  %v384_v50 = vor.u32 %v383_v31, %v380_v26  ;;  %v401_v51 = vshll.u32 %v3021_v30, 16  ;;  %v618_v0 = vld [vmem:[%s2888_s27 + $0x10] sm:$0xe]  ;;  %v2738_v5 = vld [vmem:[%s3516_s1 + $0x1f8] sm:$0xff] }
  0x2a   : > { %2775 = vmatpush.bf16.msra.mxu1 %v2677_v59  ;;  %491 = vmatpush.bf16.msra.mxu0 %v2677_v59  ;;  %v341_v48 = vrot.slane %v339_v38, 5  ;;  %v331_v53 = vshll.u32 %v3024_v34, 16  ;;  %v432_v54 = vpack.c.b16 %v3002_v17, %v2992_v10  ;;  %v430_v55 = vpack.c.b16 %v423_v28, %v3010_v23  ;;  %v2691_v59 = vld [vmem:[%s2888_s27 + $0xc] sm:$0xf0]  ;;  %v619_v10 = vld [vmem:[%s2888_s27 + $0x18] sm:$0xe] }
  0x2b   : > { %761 = vmatpush.bf16.msra.mxu2 %v2685_v1  ;;  %v398_v56 = vor.u32 %v397_v33, %v394_v32  ;;  %v328_v57 = vor.u32 %v327_v36, %v324_v35  ;;  %v700_v60 = vpack.c.b16 %v693_v42, %v692_v41  ;;  %v345_v63 = vshll.u32 %v3037_v45, 16  ;;  %v2673_v1 = vld [vmem:[%s3516_s1 + $0x30] sm:$0xff]  ;;  %v2330_v20 = vld [vmem:[%s2888_s27 + $0x8] sm:$0xf] }
  0x2c   : > { %896 = vmatpush.bf16.msra.mxu3 %v2697_v13  ;;  %v342_v62 = vor.u32 %v341_v48, %v338_v46  ;;  %v389_v4 = vrot.slane %v387_v44, 5  ;;  %v385_v6 = vrot.slane %v384_v50, 4  ;;  %v403_v7 = vrot.slane %v401_v51, 5  ;;  %v2729_v12 = vld [vmem:[%s3516_s1 + $0x1b0] sm:$0xff]  ;;  %v2672_v21 = vld [vmem:[%s3516_s1 + $0x28] sm:$0xff]  ;;  %v2707_v44 = vld [vmem:[%s3516_s1 + $0x120] sm:$0xff] }
  0x2d   : > { %v333_v8 = vrot.slane %v331_v53, 5  ;;  %v2285_v9 = vor.u32 %v2691_v59, %v2284_v58  ;;  %v399_v13 = vrot.slane %v398_v56, 4  ;;  %v329_v14 = vrot.slane %v328_v57, 4  ;;  %v2332_v24 = vld [vmem:[%s2888_s27 + $0x10] sm:$0xf]  ;;  %v2708_v27 = vld [vmem:[%s3516_s1 + $0x128] sm:$0xff] }
  0x2e   : > { %2776 = vmatpush.bf16.msra.mxu1 %v2676_v15  ;;  %492 = vmatpush.bf16.msra.mxu0 %v2676_v15  ;;  %v2204_v15 = vrot.slane %v618_v0, 9  ;;  %v653_v17 = vrot.slane %v3024_v34, 5  ;;  %v343_v18 = vrot.slane %v342_v62, 4  ;;  %v347_v19 = vrot.slane %v345_v63, 5  ;;  %v2737_v26 = vld [vmem:[%s3516_s1 + $0x1f0] sm:$0xff]  ;;  %v2736_v41 = vld [vmem:[%s3516_s1 + $0x1e8] sm:$0xff] }
  0x2f   : > { %762 = vmatpush.bf16.msra.mxu2 %v2684_v22  ;;  %v2205_v22 = vrot.slane %v619_v10, 9  ;;  %v657_v23 = vrot.slane %v3037_v45, 5  ;;  %v390_v28 = vsel %vm2960_vm2, %v385_v6, %v389_v4  ;;  %v404_v31 = vsel %vm2960_vm2, %v399_v13, %v403_v7  ;;  %v2727_v45 = vld [vmem:[%s3516_s1 + $0x1a0] sm:$0xff]  ;;  %v2670_v56 = vld [vmem:[%s3516_s1 + $0x18] sm:$0xff]  ;;  %v3117_v57 = vld [vmem:[%s2888_s27 + $0x14] sm:$0x1] }
  0x30   : > { %897 = vmatpush.bf16.msra.mxu3 %v2696_v29  ;;  %v2728_v29 = vld [vmem:[%s3516_s1 + $0x1a8] sm:$0xff]  ;;  %v334_v32 = vsel %vm2960_vm2, %v329_v14, %v333_v8  ;;  %v654_v33 = vsel %vm2984_vm5, %v2204_v15, %v653_v17  ;;  %v945_v34 = vshrl.u32 %v2330_v20, 16  ;;  %v348_v35 = vsel %vm2960_vm2, %v343_v18, %v347_v19  ;;  %v2706_v58 = vld [vmem:[%s3516_s1 + $0x118] sm:$0xff]  ;;  %v2692_v0 = vld [vmem:[%s2888_s27 + $0x1c] sm:$0xf0] }
  0x31   : > { %v948_v36 = vshll.u32 %v2330_v20, 16  ;;  %v959_v37 = vshrl.u32 %v2332_v24, 16  ;;  %v962_v38 = vshll.u32 %v2332_v24, 16  ;;  %v428_v42 = vunpack.c.l.b16 %v390_v28  ;;  %v2288_v63 = vld [vmem:[%s2888_s27 + $0x18] sm:$0xf]  ;;  %v2705_v6 = vld [vmem:[%s3516_s1 + $0x110] sm:$0xff] }
  0x32   : > { %2777 = vmatpush.bf16.msra.mxu1 %v2675_v39  ;;  %493 = vmatpush.bf16.msra.mxu0 %v2675_v39  ;;  %v2671_v39 = vld [vmem:[%s3516_s1 + $0x20] sm:$0xff]  ;;  %v424_v46 = vunpack.c.l.b16 %v334_v32  ;;  %v425_v48 = vunpack.c.l.b16 %v348_v35  ;;  %v947_v50 = vrot.slane %v945_v34, 4  ;;  %v968_v4 = vshll.u32 %v3117_v57, 16  ;;  %v621_v8 = vld [vmem:[%s2888_s27 + $0x28] sm:$0xe]  ;;  %v2726_v13 = vld [vmem:[%s3516_s1 + $0x198] sm:$0xff] }
  0x33   : > { %763 = vmatpush.bf16.msra.mxu2 %v2683_v43  ;;  %v429_v43 = vunpack.c.l.b16 %v404_v31  ;;  %v950_v53 = vrot.slane %v948_v36, 5  ;;  %v620_v7 = vld [vmem:[%s2888_s27 + $0x20] sm:$0xe]  ;;  %v2289_v10 = vor.u32 %v2692_v0, %v2288_v63  ;;  %v2334_v18 = vld [vmem:[%s2888_s27 + $0x18] sm:$0xf] }
  0x34   : > { %898 = vmatpush.bf16.msra.mxu3 %v2695_v61  ;;  %v970_v17 = vrot.slane %v968_v4, 5  ;;  %v2735_v19 = vld [vmem:[%s3516_s1 + $0x1e0] sm:$0xff]  ;;  %v2206_v20 = vrot.slane %v620_v7, 9  ;;  %v2734_v28 = vld [vmem:[%s3516_s1 + $0x1d8] sm:$0xff]  ;;  %v2338_v4 = vld [vmem:[%s2888_s27 + $0x28] sm:$0xf] }
  0x35   : > { %504 = vmatmul.bf16.vlgmr.msra.gmra.mxu1 %v432_v54  ;;  %494 = vmatmul.bf16.vlgmr.msra.gmra.mxu0 %v430_v55  ;;  %v961_v54 = vrot.slane %v959_v37, 4  ;;  %v964_v55 = vrot.slane %v962_v38, 5  ;;  %v433_v59 = vpack.c.b16 %v429_v43, %v428_v42  ;;  %v2336_v24 = vld [vmem:[%s2888_s27 + $0x20] sm:$0xf]  ;;  %v2718_v37 = vld [vmem:[%s3516_s1 + $0x178] sm:$0xff]  ;;  %v2724_v7 = vld [vmem:[%s3516_s1 + $0x188] sm:$0xff] }
  0x36   : > { %587 = vmatpush.bf16.msrb.mxu1 %v2674_v40  ;;  %1137 = vmatpush.bf16.msrb.mxu0 %v2710_v49  ;;  %v658_v40 = vsel %vm2984_vm5, %v2205_v22, %v657_v23  ;;  %v694_v49 = vunpack.c.l.b16 %v654_v33  ;;  %v2207_v22 = vrot.slane %v621_v8, 9  ;;  %v665_v23 = vrot.slane %v2929_v16, 5  ;;  %v2667_v34 = vld [vmem:[%s3516_s1] sm:$0xff]  ;;  %v3177_v42 = vld [vmem:[%s3516_s1 + $0x238] sm:$0xff] }
  0x37   : > { %1446 = vmatpush.bf16.msrb.mxu2 %v2730_v52  ;;  %899 = vmatmul.bf16.vlgmr.msra.gmra.mxu3 %v2285_v9  ;;  %v695_v51 = vunpack.c.l.b16 %v658_v40  ;;  %v3111_v52 = vld [vmem:[%s2888_s27 + $0xc] sm:$0x1]  ;;  %v976_v16 = vshll.u32 %v2334_v18, 16  ;;  %v987_v32 = vshrl.u32 %v2336_v24, 16  ;;  %v990_v33 = vshll.u32 %v2336_v24, 16  ;;  %v2703_v38 = vld [vmem:[%s3516_s1 + $0x100] sm:$0xff] }
  0x38   : > { %764 = vmatmul.bf16.vlgmr.msra.gmra.mxu2 %v700_v60  ;;  %1692 = vmatpush.bf16.msrb.mxu3 %v2738_v5  ;;  %v431_v60 = vpack.c.b16 %v425_v48, %v424_v46  ;;  %v954_v61 = vshll.u32 %v3111_v52, 16  ;;  %v2669_v5 = vld [vmem:[%s3516_s1 + $0x10] sm:$0xff]  ;;  %v2668_v9 = vld [vmem:[%s3516_s1 + $0x8] sm:$0xff]  ;;  %v666_v36 = vsel %vm2984_vm5, %v2207_v22, %v665_v23  ;;  %v673_v23 = vrot.slane %v3021_v30, 5  ;;  %v2723_v24 = vld [vmem:[%s3516_s1 + $0x180] sm:$0xff] }
  0x39   : > { %v701_v62 = vpack.c.b16 %v695_v51, %v694_v49  ;;  %v697_v48 = vunpack.c.l.b16 %v666_v36  ;;  %v3181_v49 = vld [vmem:[%s2888_s27 + $0x1c] sm:$0x1]  ;;  %v992_v51 = vrot.slane %v990_v33, 5 }
  0x3a   : > { %588 = vmatpush.bf16.msrb.mxu1 %v2673_v1  ;;  %1138 = vmatpush.bf16.msrb.mxu0 %v2709_v2  ;;  %v951_v1 = vor.u32 %v950_v53, %v947_v50  ;;  %v965_v2 = vor.u32 %v964_v55, %v961_v54  ;;  %v989_v50 = vrot.slane %v987_v32, 4  ;;  %v3184_v53 = vld [vmem:[%s2888_s27 + $0x24] sm:$0x1]  ;;  %v2717_v54 = vld [vmem:[%s3516_s1 + $0x170] sm:$0xff] }
  0x3b   : > { %1447 = vmatpush.bf16.msrb.mxu2 %v2729_v12  ;;  %v956_v12 = vrot.slane %v954_v61, 5  ;;  %v2292_v61 = vld [vmem:[%s2888_s27 + $0x28] sm:$0xf]  ;;  %v996_v0 = vshll.u32 %v3184_v53, 16 }
  0x3c   : > { %1693 = vmatpush.bf16.msrb.mxu3 %v2737_v26  ;;  %v952_v14 = vrot.slane %v951_v1, 4  ;;  %v966_v15 = vrot.slane %v965_v2, 4  ;;  %v2704_v26 = vld [vmem:[%s3516_s1 + $0x108] sm:$0xff]  ;;  %v993_v63 = vor.u32 %v992_v51, %v989_v50  ;;  %v3197_v1 = vld [vmem:[%s3516_s1 + $0x230] sm:$0xff]  ;;  %v2532_v50 = vld [vmem:[%s2888_s27 + $0x18] sm:$0xf] }
  0x3d   : > { %v2716_v2 = vld [vmem:[%s3516_s1 + $0x168] sm:$0xff] }
  0x3e   : > { %589 = vmatpush.bf16.msrb.mxu1 %v2672_v21  ;;  %1139 = vmatpush.bf16.msrb.mxu0 %v2708_v27  ;;  %v661_v21 = vrot.slane %v2923_v11, 5  ;;  %v2725_v27 = vld [vmem:[%s3516_s1 + $0x190] sm:$0xff]  ;;  %v973_v11 = vshrl.u32 %v2334_v18, 16  ;;  %v971_v31 = vsel %vm2960_vm2, %v966_v15, %v970_v17  ;;  %v3213_v15 = vld [vmem:[%s3516_s1 + $0x228] sm:$0xff]  ;;  %v1001_v17 = vshrl.u32 %v2338_v4, 16 }
  0x3f   : > { %1448 = vmatpush.bf16.msrb.mxu2 %v2728_v29  ;;  %v957_v29 = vsel %vm2960_vm2, %v952_v14, %v956_v12  ;;  %v2340_v12 = vld [vmem:[%s2888_s27 + $0x30] sm:$0xf]  ;;  %v998_v14 = vrot.slane %v996_v0, 5  ;;  %v1004_v18 = vshll.u32 %v2338_v4, 16  ;;  %v2342_v0 = vld [vmem:[%s2888_s27 + $0x38] sm:$0xf] }
  0x40   : > { %1694 = vmatpush.bf16.msrb.mxu3 %v2736_v41  ;;  %v662_v35 = vsel %vm2984_vm5, %v2206_v20, %v661_v21  ;;  %v1073_v40 = vunpack.c.l.b16 %v957_v29  ;;  %v1074_v41 = vunpack.c.l.b16 %v971_v31  ;;  %v975_v43 = vrot.slane %v973_v11, 4  ;;  %v3237_v31 = vld [vmem:[%s3516_s1 + $0x220] sm:$0xff] }
  0x41   : > { %v696_v46 = vunpack.c.l.b16 %v662_v35  ;;  %v669_v21 = vrot.slane %v3015_v25, 5  ;;  %v2732_v25 = vld [vmem:[%s3516_s1 + $0x1c8] sm:$0xff]  ;;  %v1006_v29 = vrot.slane %v1004_v18, 5  ;;  %v2344_v18 = vld [vmem:[%s2888_s27 + $0x40] sm:$0xf] }
  0x42   : > { %590 = vmatpush.bf16.msrb.mxu1 %v2671_v39  ;;  %1140 = vmatpush.bf16.msrb.mxu0 %v2707_v44  ;;  %v2156_v39 = vld [vmem:[%s2888_s27] sm:$0xf]  ;;  %v978_v44 = vrot.slane %v976_v16, 5  ;;  %v1003_v16 = vrot.slane %v1001_v17, 4  ;;  %v3247_v35 = vld [vmem:[%s2888_s27 + $0x2c] sm:$0x1] }
  0x43   : > { %1449 = vmatpush.bf16.msrb.mxu2 %v2727_v45  ;;  %v2663_v45 = vld [vmem:[%s2888_s27 + $0x4] sm:$0xf0]  ;;  %v1010_v51 = vshll.u32 %v3247_v35, 16 }
  0x44   : > { %1695 = vmatpush.bf16.msrb.mxu3 %v2735_v19  ;;  %v2157_v55 = vor.u32 %v2663_v45, %v2156_v39  ;;  %v2733_v19 = vld [vmem:[%s3516_s1 + $0x1d0] sm:$0xff] }
  0x45   : > { %509 = vmatmul.bf16.gmra.mxu1 %v433_v59  ;;  %499 = vmatmul.bf16.gmra.mxu0 %v431_v60  ;;  %v982_v59 = vshll.u32 %v3181_v49, 16  ;;  %v702_v60 = vpack.c.b16 %v697_v48, %v696_v46  ;;  %v1007_v48 = vor.u32 %v1006_v29, %v1003_v16  ;;  %v3293_v29 = vld [vmem:[%s3516_s1 + $0x210] sm:$0xff] }
  0x46   : > { %591 = vmatpush.bf16.msrb.mxu1 %v2670_v56  ;;  %1141 = vmatpush.bf16.msrb.mxu0 %v2706_v58  ;;  %v1081_v56 = vpack.c.b16 %v1074_v41, %v1073_v40  ;;  %v979_v58 = vor.u32 %v978_v44, %v975_v43  ;;  %v3250_v40 = vld [vmem:[%s2888_s27 + $0x34] sm:$0x1]  ;;  %v2530_v41 = vld [vmem:[%s2888_s27 + $0x10] sm:$0xf]  ;;  %v2664_v44 = vld [vmem:[%s2888_s27 + $0x14] sm:$0xf0] }
  0x47   : > { %1450 = vmatpush.bf16.msrb.mxu2 %v2726_v13  ;;  %904 = vmatmul.bf16.gmra.mxu3 %v2289_v10  ;;  %v984_v10 = vrot.slane %v982_v59, 5  ;;  %v994_v13 = vrot.slane %v993_v63, 4  ;;  %v2160_v43 = vld [vmem:[%s2888_s27 + $0x10] sm:$0xf]  ;;  %v1024_v59 = vshll.u32 %v3250_v40, 16 }
  0x48   : > { %769 = vmatmul.bf16.gmra.mxu2 %v701_v62  ;;  %1696 = vmatpush.bf16.msrb.mxu3 %v2734_v28  ;;  %v2693_v62 = vld [vmem:[%s2888_s27 + $0x2c] sm:$0xf0]  ;;  %v1018_v28 = vshll.u32 %v2340_v12, 16  ;;  %v2694_v63 = vld [vmem:[%s2888_s27 + $0x3c] sm:$0xf0] }
  0x49   : > { %v2293_v8 = vor.u32 %v2693_v62, %v2292_v61  ;;  %v999_v11 = vsel %vm2960_vm2, %v994_v13, %v998_v14  ;;  %v2161_v61 = vor.u32 %v2664_v44, %v2160_v43  ;;  %v1026_v17 = vrot.slane %v1024_v59, 5  ;;  %v3306_v44 = vld [vmem:[%s2888_s27 + $0x3c] sm:$0x1] }
  0x4a   : > { %592 = vmatpush.bf16.msrb.mxu1 %v2669_v5  ;;  %1142 = vmatpush.bf16.msrb.mxu0 %v2705_v6  ;;  %v622_v5 = vld [vmem:[%s2888_s27 + $0x30] sm:$0xe]  ;;  %v623_v6 = vld [vmem:[%s2888_s27 + $0x38] sm:$0xe]  ;;  %v1076_v39 = vunpack.c.l.b16 %v999_v11  ;;  %v1046_v11 = vshll.u32 %v2344_v18, 16 }
  0x4b   : > { %1451 = vmatpush.bf16.msrb.mxu2 %v2725_v27  ;;  %v2208_v20 = vrot.slane %v622_v5, 9  ;;  %v2209_v22 = vrot.slane %v623_v6, 9  ;;  %v1015_v27 = vshrl.u32 %v2340_v12, 16  ;;  %v1008_v5 = vrot.slane %v1007_v48, 4  ;;  %v3268_v6 = vld [vmem:[%s2888_s27 + $0x14] sm:$0x1] }
  0x4c   : > { %1697 = vmatpush.bf16.msrb.mxu3 %v2733_v19  ;;  %v1029_v19 = vshrl.u32 %v2342_v0, 16 }
  0x4d   : > { %v670_v32 = vsel %vm2984_vm5, %v2208_v20, %v669_v21  ;;  %v674_v33 = vsel %vm2984_vm5, %v2209_v22, %v673_v23  ;;  %v1017_v36 = vrot.slane %v1015_v27, 4  ;;  %v3280_v20 = vld [vmem:[%s3516_s1 + $0x218] sm:$0xff]  ;;  %v2731_v21 = vld [vmem:[%s3516_s1 + $0x1c0] sm:$0xff]  ;;  %v1032_v22 = vshll.u32 %v2342_v0, 16 }
  0x4e   : > { %593 = vmatpush.bf16.msrb.mxu1 %v2668_v9  ;;  %1143 = vmatpush.bf16.msrb.mxu0 %v2704_v26  ;;  %v980_v9 = vrot.slane %v979_v58, 4  ;;  %v2715_v26 = vld [vmem:[%s3516_s1 + $0x160] sm:$0xff]  ;;  %v698_v45 = vunpack.c.l.b16 %v670_v32  ;;  %v699_v46 = vunpack.c.l.b16 %v674_v33  ;;  %v1200_v27 = vrot.slane %v3111_v52, 5  ;;  %v2394_v32 = vld [vmem:[%s2888_s27 + $0x8] sm:$0xe] }
  0x4f   : > { %1452 = vmatpush.bf16.msrb.mxu2 %v2724_v7  ;;  %v1012_v7 = vrot.slane %v1010_v51, 5  ;;  %v1048_v51 = vrot.slane %v1046_v11, 5 }
  0x50   : > { %v985_v30 = vsel %vm2960_vm2, %v980_v9, %v984_v10  ;;  %1698 = vmatpush.bf16.msrb.mxu3 %v2732_v25  ;;  %v703_v4 = vpack.c.b16 %v699_v46, %v698_v45  ;;  %v1204_v25 = vrot.slane %v3117_v57, 5  ;;  %v1031_v57 = vrot.slane %v1029_v19, 4 }
  0x51   : > { %v1013_v52 = vsel %vm2960_vm2, %v1008_v5, %v1012_v7  ;;  %v2484_v5 = vld [vmem:[%s2888_s27 + $0x10] sm:$0xf] }
  0x52   : > { %594 = vmatpush.bf16.msrb.mxu1 %v2667_v34  ;;  %1144 = vmatpush.bf16.msrb.mxu0 %v2703_v38  ;;  %v2714_v34 = vld [vmem:[%s3516_s1 + $0x158] sm:$0xff]  ;;  %v1075_v38 = vunpack.c.l.b16 %v985_v30  ;;  %v1043_v30 = vshrl.u32 %v2344_v18, 16 }
  0x53   : > { %1453 = vmatpush.bf16.msrb.mxu2 %v2723_v24  ;;  %v1509_v24 = vshll.u32 %v3268_v6, 16 }
  0x54   : > { %v1082_v62 = vpack.c.b16 %v1076_v39, %v1075_v38  ;;  %1699 = vmatpush.bf16.msrb.mxu3 %v2731_v21  ;;  %v1034_v38 = vrot.slane %v1032_v22, 5 }
  0x55   : > { %595 = vmatmul.bf16.vlgmr.msrb.gmra.mxu1 %v2157_v55  ;;  %1145 = vmatmul.bf16.vlgmr.msrb.gmra.mxu0 %v1081_v56  ;;  %v1503_v55 = vshll.u32 %v2530_v41, 16  ;;  %v1514_v56 = vshrl.u32 %v2532_v50, 16 }
  0x56   : > { %1311 = vmatpush.bf16.msra.mxu1 %v2718_v37  ;;  %1866 = vmatpush.bf16.msra.mxu0 %v3177_v42  ;;  %v1020_v37 = vrot.slane %v1018_v28, 5 }
  0x57   : > { %909 = vmatmul.bf16.gmra.mxu3 %v2293_v8  ;;  %2778 = vmatpush.bf16.msra.mxu2 %v3177_v42  ;;  %v2296_v42 = vld [vmem:[%s2888_s27 + $0x38] sm:$0xf]  ;;  %v3271_v8 = vld [vmem:[%s2888_s27 + $0x1c] sm:$0x1]  ;;  %v1505_v10 = vrot.slane %v1503_v55, 5  ;;  %v1516_v12 = vrot.slane %v1514_v56, 4 }
  0x58   : > { %774 = vmatmul.bf16.gmra.mxu2 %v702_v60  ;;  %v1021_v58 = vor.u32 %v1020_v37, %v1017_v36  ;;  %v2713_v60 = vld [vmem:[%s3516_s1 + $0x150] sm:$0xff]  ;;  %v2297_v13 = vor.u32 %v2694_v63, %v2296_v42  ;;  %v1523_v28 = vshll.u32 %v3271_v8, 16  ;;  %v2402_v37 = vrot.slane %v2394_v32, 9  ;;  %v2164_v56 = vld [vmem:[%s2888_s27 + $0x20] sm:$0xf] }
  0x59   : > { %v2395_v36 = vld [vmem:[%s2888_s27 + $0x10] sm:$0xe]  ;;  %v2665_v42 = vld [vmem:[%s2888_s27 + $0x24] sm:$0xf0]  ;;  %v1038_v63 = vshll.u32 %v3306_v44, 16 }
  0x5a   : > { %1312 = vmatpush.bf16.msra.mxu1 %v2717_v54  ;;  %1867 = vmatpush.bf16.msra.mxu0 %v3197_v1  ;;  %v1500_v54 = vshrl.u32 %v2530_v41, 16  ;;  %v1022_v14 = vrot.slane %v1021_v58, 4  ;;  %v1511_v41 = vrot.slane %v1509_v24, 5  ;;  %v2403_v43 = vrot.slane %v2395_v36, 9  ;;  %v2739_v36 = vld [vmem:[%s3516_s1 + $0x200] sm:$0xff] }
  0x5b   : > { %2779 = vmatpush.bf16.msra.mxu2 %v3197_v1  ;;  %v2712_v1 = vld [vmem:[%s3516_s1 + $0x148] sm:$0xff]  ;;  %v1525_v46 = vrot.slane %v1523_v28, 5  ;;  %v1201_v48 = vsel %vm2984_vm5, %v2402_v37, %v1200_v27  ;;  %v1077_v58 = vunpack.c.l.b16 %v1013_v52  ;;  %v2165_v19 = vor.u32 %v2665_v42, %v2164_v56  ;;  %v2168_v56 = vld [vmem:[%s2888_s27 + $0x30] sm:$0xf] }
  0x5c   : > { %v1502_v9 = vrot.slane %v1500_v54, 4  ;;  %v1027_v33 = vsel %vm2960_vm2, %v1022_v14, %v1026_v17  ;;  %v1205_v54 = vsel %vm2984_vm5, %v2403_v43, %v1204_v25  ;;  %v1247_v55 = vunpack.c.l.b16 %v1201_v48  ;;  %v3339_v27 = vld [vmem:[%s2888_s27 + $0x2c] sm:$0x1] }
  0x5d   : > { %v1078_v59 = vunpack.c.l.b16 %v1027_v33 }
  0x5e   : > { %1313 = vmatpush.bf16.msra.mxu1 %v2716_v2  ;;  %1868 = vmatpush.bf16.msra.mxu0 %v3213_v15  ;;  %v1517_v2 = vshll.u32 %v2532_v50, 16  ;;  %v1506_v23 = vor.u32 %v1505_v10, %v1502_v9  ;;  %v1045_v50 = vrot.slane %v1043_v30, 4 }
  0x5f   : > { %2780 = vmatpush.bf16.msra.mxu2 %v3213_v15  ;;  %v2740_v15 = vld [vmem:[%s3516_s1 + $0x208] sm:$0xff] }
  0x60   : > { %v1507_v39 = vrot.slane %v1506_v23, 4 }
  0x62   : > { %1314 = vmatpush.bf16.msra.mxu1 %v2715_v26  ;;  %1869 = vmatpush.bf16.msra.mxu0 %v3237_v31  ;;  %v1519_v26 = vrot.slane %v1517_v2, 5  ;;  %v1512_v0 = vsel %vm2960_vm2, %v1507_v39, %v1511_v41  ;;  %v2534_v2 = vld [vmem:[%s2888_s27 + $0x20] sm:$0xf] }
  0x63   : > { %2781 = vmatpush.bf16.msra.mxu2 %v3237_v31  ;;  %v1528_v10 = vshrl.u32 %v2534_v2, 16  ;;  %v1049_v31 = vor.u32 %v1048_v51, %v1045_v50  ;;  %v1628_v23 = vunpack.c.l.b16 %v1512_v0  ;;  %v2397_v39 = vld [vmem:[%s2888_s27 + $0x20] sm:$0xe]  ;;  %v1208_v51 = vrot.slane %v3181_v49, 5 }
  0x64   : > { %v1520_v16 = vor.u32 %v1519_v26, %v1516_v12  ;;  %v1531_v12 = vshll.u32 %v2534_v2, 16  ;;  %v3336_v26 = vld [vmem:[%s2888_s27 + $0x24] sm:$0x1] }
  0x65   : > { %600 = vmatmul.bf16.gmra.mxu1 %v2161_v61  ;;  %1150 = vmatmul.bf16.gmra.mxu0 %v1082_v62  ;;  %v1248_v61 = vunpack.c.l.b16 %v1205_v54  ;;  %v1035_v62 = vor.u32 %v1034_v38, %v1031_v57  ;;  %v1530_v21 = vrot.slane %v1528_v10, 4  ;;  %v1050_v32 = vrot.slane %v1049_v31, 4  ;;  %v2396_v38 = vld [vmem:[%s2888_s27 + $0x18] sm:$0xe] }
  0x66   : > { %1315 = vmatpush.bf16.msra.mxu1 %v2714_v34  ;;  %1870 = vmatpush.bf16.msra.mxu0 %v3280_v20  ;;  %v2711_v34 = vld [vmem:[%s3516_s1 + $0x140] sm:$0xff]  ;;  %v1521_v45 = vrot.slane %v1520_v16, 4  ;;  %v1533_v22 = vrot.slane %v1531_v12, 5  ;;  %v1040_v16 = vrot.slane %v1038_v63, 5  ;;  %v1537_v57 = vshll.u32 %v3336_v26, 16 }
  0x67   : > { %914 = vmatmul.bf16.gmra.mxu3 %v2297_v13  ;;  %v3330_v9 = vpack.c.b16 %v1248_v61, %v1247_v55  ;;  %v2719_v13 = vld [vmem:[%s2888_s27 + $0x14] sm:$0xf0]  ;;  %2782 = vmatpush.bf16.msra.mxu2 %v3280_v20  ;;  %v1036_v11 = vrot.slane %v1035_v62, 4  ;;  %v1551_v20 = vshll.u32 %v3339_v27, 16  ;;  %v2404_v48 = vrot.slane %v2396_v38, 9 }
  0x68   : > { %779 = vmatmul.bf16.gmra.mxu2 %v703_v4  ;;  %v2536_v4 = vld [vmem:[%s2888_s27 + $0x28] sm:$0xf]  ;;  %v1526_v7 = vsel %vm2960_vm2, %v1521_v45, %v1525_v46  ;;  %v2485_v30 = vor.u32 %v2719_v13, %v2484_v5  ;;  %v1534_v33 = vor.u32 %v1533_v22, %v1530_v21  ;;  %v1539_v45 = vrot.slane %v1537_v57, 5  ;;  %v2594_v63 = vld [vmem:[%s2888_s27 + $0x10] sm:$0xe] }
  0x69   : > { %v1542_v17 = vshrl.u32 %v2536_v4, 16  ;;  %v1545_v18 = vshll.u32 %v2536_v4, 16  ;;  %v1629_v24 = vunpack.c.l.b16 %v1526_v7  ;;  %v1041_v41 = vsel %vm2960_vm2, %v1036_v11, %v1040_v16  ;;  %v2595_v4 = vld [vmem:[%s2888_s27 + $0x18] sm:$0xe]  ;;  %v2538_v5 = vld [vmem:[%s2888_s27 + $0x30] sm:$0xf] }
  0x6a   : > { %1316 = vmatpush.bf16.msra.mxu1 %v2713_v60  ;;  %1871 = vmatpush.bf16.msra.mxu0 %v3293_v29  ;;  %v3319_v60 = vld [vmem:[%s2888_s27 + $0x44] sm:$0x1]  ;;  %v1553_v46 = vrot.slane %v1551_v20, 5  ;;  %v2405_v54 = vrot.slane %v2397_v39, 9  ;;  %v1212_v55 = vrot.slane %v3184_v53, 5  ;;  %v1079_v42 = vunpack.c.l.b16 %v1041_v41 }
  0x6b   : > { %v1052_v14 = vshll.u32 %v3319_v60, 16  ;;  %v1544_v28 = vrot.slane %v1542_v17, 4  ;;  %v1547_v25 = vrot.slane %v1545_v18, 5  ;;  %2783 = vmatpush.bf16.msra.mxu2 %v3293_v29  ;;  %v1535_v29 = vrot.slane %v1534_v33, 4  ;;  %v2540_v7 = vld [vmem:[%s2888_s27 + $0x38] sm:$0xf] }
  0x6c   : > { %v1213_v61 = vsel %vm2984_vm5, %v2405_v54, %v1212_v55  ;;  %v1755_v62 = vrot.slane %v3268_v6, 5  ;;  %v1556_v12 = vshrl.u32 %v2538_v5, 16  ;;  %v1559_v13 = vshll.u32 %v2538_v5, 16  ;;  %v2488_v18 = vld [vmem:[%s2888_s27 + $0x20] sm:$0xf] }
  0x6d   : > { %v1054_v52 = vrot.slane %v1052_v14, 5  ;;  %v1548_v37 = vor.u32 %v1547_v25, %v1544_v28  ;;  %v1250_v0 = vunpack.c.l.b16 %v1213_v61  ;;  %v1540_v53 = vsel %vm2960_vm2, %v1535_v29, %v1539_v45  ;;  %v2398_v54 = vld [vmem:[%s2888_s27 + $0x28] sm:$0xe]  ;;  %v2399_v55 = vld [vmem:[%s2888_s27 + $0x30] sm:$0xe] }
  0x6e   : > { %1317 = vmatpush.bf16.msra.mxu1 %v2712_v1  ;;  %1872 = vmatpush.bf16.msra.mxu0 %v2740_v15  ;;  %v1083_v1 = vpack.c.b16 %v1078_v59, %v1077_v58  ;;  %v1209_v59 = vsel %vm2984_vm5, %v2404_v48, %v1208_v51  ;;  %v1570_v6 = vshrl.u32 %v2540_v7, 16  ;;  %v1759_v17 = vrot.slane %v3271_v8, 5  ;;  %v2492_v48 = vld [vmem:[%s2888_s27 + $0x30] sm:$0xf]  ;;  %v2596_v5 = vld [vmem:[%s2888_s27 + $0x20] sm:$0xe] }
  0x6f   : > { %v1055_v43 = vsel %vm2960_vm2, %v1050_v32, %v1054_v52  ;;  %2784 = vmatpush.bf16.msra.mxu2 %v2740_v15  ;;  %v1549_v50 = vrot.slane %v1548_v37, 4  ;;  %v2666_v15 = vld [vmem:[%s2888_s27 + $0x34] sm:$0xf0]  ;;  %v1249_v49 = vunpack.c.l.b16 %v1209_v59  ;;  %v1630_v21 = vunpack.c.l.b16 %v1540_v53  ;;  %v3376_v32 = vld [vmem:[%s2888_s27 + $0x34] sm:$0x1] }
  0x70   : > { %v1080_v58 = vunpack.c.l.b16 %v1055_v43  ;;  %v2169_v31 = vor.u32 %v2666_v15, %v2168_v56  ;;  %v1558_v28 = vrot.slane %v1556_v12, 4  ;;  %v1561_v25 = vrot.slane %v1559_v13, 5  ;;  %v3379_v52 = vld [vmem:[%s2888_s27 + $0x3c] sm:$0x1]  ;;  %v2542_v56 = vld [vmem:[%s2888_s27 + $0x40] sm:$0xf] }
  0x71   : > { %v1554_v2 = vsel %vm2960_vm2, %v1549_v50, %v1553_v46  ;;  %v3370_v10 = vpack.c.b16 %v1250_v0, %v1249_v49  ;;  %v1579_v37 = vshll.u32 %v3379_v52, 16  ;;  %v2407_v59 = vrot.slane %v2399_v55, 9  ;;  %v2544_v15 = vld [vmem:[%s2888_s27 + $0x48] sm:$0xf] }
  0x72   : > { %1318 = vmatpush.bf16.msra.mxu1 %v2711_v34  ;;  %v1636_v34 = vpack.c.b16 %v1629_v24, %v1628_v23  ;;  %1873 = vmatpush.bf16.msra.mxu0 %v2739_v36  ;;  %v1084_v14 = vpack.c.b16 %v1080_v58, %v1079_v42  ;;  %v1631_v22 = vunpack.c.l.b16 %v1554_v2  ;;  %v2602_v23 = vrot.slane %v2594_v63, 9  ;;  %v2597_v12 = vld [vmem:[%s2888_s27 + $0x28] sm:$0xe] }
  0x73   : > { %2785 = vmatpush.bf16.msra.mxu2 %v2739_v36  ;;  %v2603_v24 = vrot.slane %v2595_v4, 9  ;;  %v1562_v20 = vor.u32 %v1561_v25, %v1558_v28  ;;  %v1581_v45 = vrot.slane %v1579_v37, 5  ;;  %v2406_v42 = vrot.slane %v2398_v54, 9 }
  0x74   : > { %v1637_v33 = vpack.c.b16 %v1631_v22, %v1630_v21  ;;  %v1756_v8 = vsel %vm2984_vm5, %v2602_v23, %v1755_v62  ;;  %v1216_v58 = vrot.slane %v3247_v35, 5  ;;  %v1220_v61 = vrot.slane %v3250_v40, 5  ;;  %v2721_v62 = vld [vmem:[%s2888_s27 + $0x34] sm:$0xf0] }
  0x75   : > { %605 = vmatmul.bf16.gmra.mxu1 %v2165_v19  ;;  %1155 = vmatmul.bf16.gmra.mxu0 %v1083_v1  ;;  %v2720_v19 = vld [vmem:[%s2888_s27 + $0x24] sm:$0xf0]  ;;  %v1573_v1 = vshll.u32 %v2540_v7, 16  ;;  %v1760_v57 = vsel %vm2984_vm5, %v2603_v24, %v1759_v17  ;;  %v1802_v38 = vunpack.c.l.b16 %v1756_v8  ;;  %v1563_v41 = vrot.slane %v1562_v20, 4  ;;  %v3406_v17 = vld [vmem:[%s2888_s27 + $0x44] sm:$0x1] }
  0x76   : > { %v2489_v16 = vor.u32 %v2720_v19, %v2488_v18  ;;  %v1803_v39 = vunpack.c.l.b16 %v1760_v57  ;;  %v1584_v63 = vshrl.u32 %v2542_v56, 16  ;;  %v1587_v49 = vshll.u32 %v2542_v56, 16  ;;  %v3409_v18 = vld [vmem:[%s2888_s27 + $0x4c] sm:$0x1] }
  0x77   : > { %1700 = vmatmul.bf16.vlgmr.msrb.gmra.mxu3 %v1636_v34  ;;  %v1575_v11 = vrot.slane %v1573_v1, 5  ;;  %v1565_v34 = vshll.u32 %v3376_v32, 16  ;;  %v1598_v0 = vshrl.u32 %v2544_v15, 16  ;;  %v1601_v53 = vshll.u32 %v2544_v15, 16 }
  0x78   : > { %1454 = vmatmul.bf16.vlgmr.msrb.gmra.mxu2 %v2485_v30  ;;  %v1572_v30 = vrot.slane %v1570_v6, 4  ;;  %v1810_v46 = vpack.c.b16 %v1803_v39, %v1802_v38  ;;  %v1217_v7 = vsel %vm2984_vm5, %v2406_v42, %v1216_v58  ;;  %v1221_v35 = vsel %vm2984_vm5, %v2407_v59, %v1220_v61  ;;  %v2400_v39 = vld [vmem:[%s2888_s27 + $0x38] sm:$0xe] }
  0x79   : > { %v1567_v43 = vrot.slane %v1565_v34, 5  ;;  %v1251_v13 = vunpack.c.l.b16 %v1217_v7  ;;  %v1252_v40 = vunpack.c.l.b16 %v1221_v35  ;;  %v1586_v6 = vrot.slane %v1584_v63, 4  ;;  %v2599_v61 = vld [vmem:[%s2888_s27 + $0x38] sm:$0xe]  ;;  %v2601_v63 = vld [vmem:[%s2888_s27 + $0x48] sm:$0xe] }
  0x7a   : > { %v1576_v36 = vor.u32 %v1575_v11, %v1572_v30  ;;  %v1600_v19 = vrot.slane %v1598_v0, 4  ;;  %v1603_v1 = vrot.slane %v1601_v53, 5  ;;  %v2604_v21 = vrot.slane %v2596_v5, 9 }
  0x7b   : > { %v1568_v50 = vsel %vm2960_vm2, %v1563_v41, %v1567_v43  ;;  %v3411_v22 = vpack.c.b16 %v1252_v40, %v1251_v13  ;;  %v1763_v24 = vrot.slane %v3336_v26, 5  ;;  %v2605_v28 = vrot.slane %v2597_v12, 9  ;;  %v2401_v41 = vld [vmem:[%s2888_s27 + $0x40] sm:$0xe] }
  0x7c   : > { %v1577_v29 = vrot.slane %v1576_v36, 4  ;;  %v1632_v2 = vunpack.c.l.b16 %v1568_v50  ;;  %v1767_v25 = vrot.slane %v3339_v27, 5  ;;  %v1593_v11 = vshll.u32 %v3406_v17, 16  ;;  %v2722_v50 = vld [vmem:[%s2888_s27 + $0x44] sm:$0xf0] }
  0x7d   : > { %v1764_v8 = vsel %vm2984_vm5, %v2604_v21, %v1763_v24  ;;  %v2408_v43 = vrot.slane %v2400_v39, 9  ;;  %v1771_v0 = vrot.slane %v3376_v32, 5  ;;  %v2607_v53 = vrot.slane %v2599_v61, 9 }
  0x7e   : > { %v1582_v51 = vsel %vm2960_vm2, %v1577_v29, %v1581_v45  ;;  %v1768_v26 = vsel %vm2984_vm5, %v2605_v28, %v1767_v25  ;;  %v1595_v27 = vrot.slane %v1593_v11, 5  ;;  %v1804_v34 = vunpack.c.l.b16 %v1764_v8 }
  0x7f   : > { %v1633_v4 = vunpack.c.l.b16 %v1582_v51  ;;  %v1805_v36 = vunpack.c.l.b16 %v1768_v26  ;;  %v1224_v29 = vrot.slane %v3306_v44, 5  ;;  %v2409_v45 = vrot.slane %v2401_v41, 9  ;;  %v2598_v44 = vld [vmem:[%s2888_s27 + $0x30] sm:$0xe] }
  0x80   : > { %v1783_v5 = vrot.slane %v3409_v18, 5  ;;  %v2609_v35 = vrot.slane %v2601_v63, 9 }
  0x81   : > { %v1638_v23 = vpack.c.b16 %v1633_v4, %v1632_v2  ;;  %v1811_v51 = vpack.c.b16 %v1805_v36, %v1804_v34  ;;  %v1225_v54 = vsel %vm2984_vm5, %v2408_v43, %v1224_v29  ;;  %v1775_v2 = vrot.slane %v3379_v52, 5 }
  0x82   : > { %v1253_v42 = vunpack.c.l.b16 %v1225_v54  ;;  %v1779_v4 = vrot.slane %v3406_v17, 5  ;;  %v1784_v32 = vsel %vm2984_vm5, %v2609_v35, %v1783_v5 }
  0x85   : > { %610 = vmatmul.bf16.gmra.mxu1 %v2169_v31  ;;  %1160 = vmatmul.bf16.gmra.mxu0 %v1084_v14  ;;  %v1589_v31 = vrot.slane %v1587_v49, 5  ;;  %v2493_v14 = vor.u32 %v2721_v62, %v2492_v48  ;;  %v2496_v48 = vld [vmem:[%s2888_s27 + $0x40] sm:$0xf]  ;;  %v2606_v49 = vrot.slane %v2598_v44, 9 }
  0x86   : > { %v2497_v59 = vor.u32 %v2722_v50, %v2496_v48  ;;  %v2600_v62 = vld [vmem:[%s2888_s27 + $0x40] sm:$0xe] }
  0x87   : > { %1705 = vmatmul.bf16.gmra.mxu3 %v1637_v33  ;;  %v1590_v30 = vor.u32 %v1589_v31, %v1586_v6  ;;  %v1607_v33 = vshll.u32 %v3409_v18, 16  ;;  %v2608_v7 = vrot.slane %v2600_v62, 9  ;;  %v1772_v12 = vsel %vm2984_vm5, %v2606_v49, %v1771_v0 }
  0x88   : > { %1459 = vmatmul.bf16.gmra.mxu2 %v2489_v16  ;;  %v1604_v16 = vor.u32 %v1603_v1, %v1600_v19  ;;  %v1806_v52 = vunpack.c.l.b16 %v1772_v12  ;;  %v1809_v31 = vunpack.c.l.b16 %v1784_v32 }
  0x89   : > { %v1609_v20 = vrot.slane %v1607_v33, 5  ;;  %v1780_v13 = vsel %vm2984_vm5, %v2608_v7, %v1779_v4 }
  0x8a   : > { %v1605_v57 = vrot.slane %v1604_v16, 4  ;;  %v1808_v6 = vunpack.c.l.b16 %v1780_v13 }
  0x8c   : > { %v1610_v38 = vsel %vm2960_vm2, %v1605_v57, %v1609_v20  ;;  %v1813_v19 = vpack.c.b16 %v1809_v31, %v1808_v6 }
  0x8d   : > { %v1635_v56 = vunpack.c.l.b16 %v1610_v38 }
  0x95   : > { %1319 = vmatmul.bf16.vlgmr.msra.gmra.mxu1 %v3330_v9  ;;  %1874 = vmatmul.bf16.vlgmr.msra.gmra.mxu0 %v1810_v46  ;;  %v1591_v9 = vrot.slane %v1590_v30, 4  ;;  %v1228_v46 = vrot.slane %v3319_v60, 5 }
  0x97   : > { %1710 = vmatmul.bf16.gmra.mxu3 %v1638_v23  ;;  %v1596_v37 = vsel %vm2960_vm2, %v1591_v9, %v1595_v27  ;;  %v1229_v47 = vsel %vm2984_vm5, %v2409_v45, %v1228_v46 }
  0x98   : > { %1464 = vmatmul.bf16.gmra.mxu2 %v2493_v14  ;;  %v1634_v55 = vunpack.c.l.b16 %v1596_v37  ;;  %v1254_v58 = vunpack.c.l.b16 %v1229_v47 }
  0x9a   : > { %v1258_v15 = vpack.c.b16 %v1254_v58, %v1253_v42  ;;  %v1639_v60 = vpack.c.b16 %v1635_v56, %v1634_v55 }
  0xa5   : > { %1324 = vmatmul.bf16.gmra.mxu1 %v3370_v10  ;;  %1879 = vmatmul.bf16.gmra.mxu0 %v1811_v51  ;;  %v1776_v10 = vsel %vm2984_vm5, %v2607_v53, %v1775_v2 }
  0xa6   : > { %v1807_v40 = vunpack.c.l.b16 %v1776_v10 }
  0xa7   : > { %1715 = vmatmul.bf16.gmra.mxu3 %v1639_v60 }
  0xa8   : > { %1469 = vmatmul.bf16.gmra.mxu2 %v2497_v59  ;;  %v1812_v14 = vpack.c.b16 %v1807_v40, %v1806_v52 }
  0xb2   : > { %v505_v17 = vpop.f32.mrf.mxu1  ;;  %v495_v18 = vpop.f32.mrf.mxu0 }
  0xb5   : > { %1329 = vmatmul.bf16.gmra.mxu1 %v3411_v22  ;;  %1884 = vmatmul.bf16.gmra.mxu0 %v1812_v14 }
  0xb8   : > { %1889 = vmatmul.bf16.vlgmr.msra.gmra.mxu2 %v1813_v19 }
  0xba   : > { %v507_v21 = vpop.f32.mrf.mxu1  ;;  %v497_v23 = vpop.f32.mrf.mxu0 }
  0xbb   : > { %v765_v1 = vpop.f32.mrf.mxu2  ;;  %v900_v24 = vpop.f32.mrf.mxu3 }
  0xc2   : > { %v510_v25 = vpop.f32.mrf.mxu1  ;;  %v500_v3 = vpop.f32.mrf.mxu0 }
  0xc3   : > { %v767_v28 = vpop.f32.mrf.mxu2  ;;  %v3454_v30 = vpop.f32.mrf.mxu3 }
  0xc5   : > { %1334 = vmatmul.bf16.gmra.mxu1 %v1258_v15 }
  0xca   : > { %v512_v16 = vpop.f32.mrf.mxu1  ;;  %v502_v33 = vpop.f32.mrf.mxu0 }
  0xcb   : > { %v770_v11 = vpop.f32.mrf.mxu2  ;;  %v905_v8 = vpop.f32.mrf.mxu3 }
  0xd2   : > { %v596_v9 = vpop.f32.mrf.mxu1  ;;  %v1146_v27 = vpop.f32.mrf.mxu0 }
  0xd3   : > { %v772_v26 = vpop.f32.mrf.mxu2  ;;  %v597_v22 = vadd.f32 %v596_v9, %v495_v18  ;;  %v3456_v20 = vpop.f32.mrf.mxu3 }
  0xd5   : > { %v785_v57 = vadd.f32 %v765_v1, %v597_v22 }
  0xd7   : > { %v920_v34 = vadd.f32 %v900_v24, %v785_v57 }
  0xd9   : > { %v1166_v36 = vadd.f32 %v1146_v27, %v920_v34 }
  0xda   : > { %v598_v38 = vpop.f32.mrf.mxu1  ;;  %v1148_v39 = vpop.f32.mrf.mxu0 }
  0xdb   : > { %v775_v37 = vpop.f32.mrf.mxu2  ;;  %v599_v41 = vadd.f32 %v598_v38, %v497_v23  ;;  %v910_v29 = vpop.f32.mrf.mxu3 }
  0xdd   : > { %v786_v43 = vadd.f32 %v767_v28, %v599_v41 }
  0xe2   : > { %v601_v46 = vpop.f32.mrf.mxu1  ;;  %v1151_v48 = vpop.f32.mrf.mxu0 }
  0xe3   : > { %v777_v45 = vpop.f32.mrf.mxu2  ;;  %v602_v50 = vadd.f32 %v601_v46, %v500_v3  ;;  %v3458_v56 = vpop.f32.mrf.mxu3  ;;  %v921_v3 = vadd.f32 %v3454_v30, %v786_v43 }
  0xe5   : > { %v787_v51 = vadd.f32 %v770_v11, %v602_v50 }
  0xe7   : > { %v922_v54 = vadd.f32 %v905_v8, %v787_v51 }
  0xe9   : > { %v1168_v47 = vadd.f32 %v1151_v48, %v922_v54 }
  0xea   : > { %v603_v42 = vpop.f32.mrf.mxu1  ;;  %v1153_v58 = vpop.f32.mrf.mxu0 }
  0xeb   : > { %v780_v55 = vpop.f32.mrf.mxu2  ;;  %v604_v59 = vadd.f32 %v603_v42, %v502_v33  ;;  %v3460_v60 = vpop.f32.mrf.mxu3  ;;  %v1167_v33 = vadd.f32 %v1148_v39, %v921_v3 }
  0xed   : > { %v788_v44 = vadd.f32 %v772_v26, %v604_v59 }
  0xef   : > { %v923_v39 = vadd.f32 %v3456_v20, %v788_v44 }
  0xf2   : > { %v606_v15 = vpop.f32.mrf.mxu1  ;;  %v1156_v62 = vpop.f32.mrf.mxu0 }
  0xf3   : > { %v782_v61 = vpop.f32.mrf.mxu2  ;;  %v607_v63 = vadd.f32 %v606_v15, %v505_v17  ;;  %v3468_v12 = vpop.f32.mrf.mxu3 }
  0xf5   : > { %v789_v49 = vadd.f32 %v775_v37, %v607_v63 }
  0xf7   : > { %v924_v0 = vadd.f32 %v910_v29, %v789_v49 }
  0xf9   : > { %v3462_v53 = vadd.f32 %v1156_v62, %v924_v0 }
  0xfa   : > { %v608_v4 = vpop.f32.mrf.mxu1  ;;  %v3464_v5 = vpop.f32.mrf.mxu0 }
  0xfb   : > { %v1455_v2 = vpop.f32.mrf.mxu2  ;;  %v609_v7 = vadd.f32 %v608_v4, %v507_v21  ;;  %v1701_v6 = vpop.f32.mrf.mxu3 }
  0xfd   : > { %v3466_v35 = vadd.f32 %v777_v45, %v609_v7 }
 0x102   : > { %v611_v13 = vpop.f32.mrf.mxu1  ;;  %v3470_v32 = vpop.f32.mrf.mxu0 }
 0x103   : > { %v1457_v10 = vpop.f32.mrf.mxu2  ;;  %v612_v52 = vadd.f32 %v611_v13, %v510_v25  ;;  %v1703_v1 = vpop.f32.mrf.mxu3 }
 0x105   : > { %v3472_v40 = vadd.f32 %v780_v55, %v612_v52  ;;  %v1169_v55 = vadd.f32 %v1153_v58, %v923_v39 }
 0x10a   : > { %v613_v14 = vpop.f32.mrf.mxu1  ;;  %v3474_v17 = vpop.f32.mrf.mxu0 }
 0x10b   : > { %v1460_v31 = vpop.f32.mrf.mxu2  ;;  %v614_v18 = vadd.f32 %v613_v14, %v512_v16  ;;  %v1706_v27 = vpop.f32.mrf.mxu3 }
 0x10d   : > { %v3476_v19 = vadd.f32 %v782_v61, %v614_v18 }
 0x112   : > { %v1320_v21 = vpop.f32.mrf.mxu1  ;;  %v1875_v23 = vpop.f32.mrf.mxu0 }
 0x113   : > { %v1340_v24 = vadd.f32 %v1320_v21, %v1166_v36  ;;  %v1462_v28 = vpop.f32.mrf.mxu2  ;;  %v1708_v50 = vpop.f32.mrf.mxu3 }
 0x115   : > { %v1475_v11 = vadd.f32 %v1455_v2, %v1340_v24 }
 0x117   : > { %v1721_v25 = vadd.f32 %v1701_v6, %v1475_v11  ;;  %v925_v6 = vadd.f32 %v3458_v56, %v3466_v35 }
 0x119   : > { %v1895_v57 = vadd.f32 %v1875_v23, %v1721_v25 }
 0x11a   : > { %v1322_v8 = vpop.f32.mrf.mxu1  ;;  %v1877_v26 = vpop.f32.mrf.mxu0 }
 0x11b   : > { %v1341_v9 = vadd.f32 %v1322_v8, %v1167_v33  ;;  %v1465_v16 = vpop.f32.mrf.mxu2  ;;  %v1936_v38 = vmul.f32 %v1895_v57, %v1895_v57 }
 0x11d   : > { %v1476_v22 = vadd.f32 %v1457_v10, %v1341_v9 }
 0x11f   : > { %v1722_v34 = vadd.f32 %v1703_v1, %v1476_v22  ;;  %v1171_v1 = vadd.f32 %v3464_v5, %v925_v6 }
 0x121   : > { %v1896_v37 = vadd.f32 %v1877_v26, %v1722_v34 }
 0x122   : > { %v1325_v41 = vpop.f32.mrf.mxu1  ;;  %v1880_v29 = vpop.f32.mrf.mxu0 }
 0x123   : > { %v2750_v36 = vpack.c.bf16 %v1896_v37, %v1895_v57  ;;  %v1920_v45 = vadd.f32 %v1896_v37, %v1895_v57  ;;  %v1937_v46 = vmul.f32 %v1896_v37, %v1896_v37  ;;  %v1342_v30 = vadd.f32 %v1325_v41, %v1168_v47  ;;  %v1467_v54 = vpop.f32.mrf.mxu2  ;;  %v1711_v47 = vpop.f32.mrf.mxu3 }
 0x124   : > { %v927_v37 = vadd.f32 %v3468_v12, %v3476_v19 }
 0x125   : > { %2751 = vst [vmem:[%s2883_s24] sm:$0xff] %v2750_v36   ;;  %v1944_v43 = vadd.f32 %v1937_v46, %v1936_v38  ;;  %v1477_v48 = vadd.f32 %v1460_v31, %v1342_v30 }
 0x127   : > { %v1723_v51 = vadd.f32 %v1706_v27, %v1477_v48 }
 0x129   : > { %v1897_v42 = vadd.f32 %v1880_v29, %v1723_v51  ;;  %v1173_v29 = vadd.f32 %v3474_v17, %v927_v37 }
 0x12a   : > { %v1327_v59 = vpop.f32.mrf.mxu1  ;;  %v1882_v61 = vpop.f32.mrf.mxu0 }
 0x12b   : > { %v1921_v15 = vadd.f32 %v1920_v45, %v1897_v42  ;;  %v1938_v62 = vmul.f32 %v1897_v42, %v1897_v42  ;;  %v1343_v63 = vadd.f32 %v1327_v59, %v1169_v55  ;;  %v1470_v20 = vpop.f32.mrf.mxu2  ;;  %v1713_v23 = vpop.f32.mrf.mxu3 }
 0x12d   : > { %v1945_v49 = vadd.f32 %v1944_v43, %v1938_v62  ;;  %v1478_v0 = vadd.f32 %v1462_v28, %v1343_v63 }
 0x12f   : > { %v1724_v2 = vadd.f32 %v1708_v50, %v1478_v0 }
 0x131   : > { %v1898_v4 = vadd.f32 %v1882_v61, %v1724_v2 }
 0x132   : > { %v1330_v44 = vpop.f32.mrf.mxu1  ;;  %v1885_v58 = vpop.f32.mrf.mxu0 }
 0x133   : > { %v2755_v7 = vpack.c.bf16 %v1898_v4, %v1897_v42  ;;  %v1922_v10 = vadd.f32 %v1921_v15, %v1898_v4  ;;  %v1939_v13 = vmul.f32 %v1898_v4, %v1898_v4  ;;  %v1344_v52 = vadd.f32 %v1330_v44, %v3462_v53  ;;  %v1472_v33 = vpop.f32.mrf.mxu2  ;;  %v1716_v34 = vpop.f32.mrf.mxu3  ;;  %v1935_v44 = vld [vmem:[%s3519_s4] sm:$0x1] }
 0x134   : > { %v926_v53 = vadd.f32 %v3460_v60, %v3472_v40 }
 0x135   : > { %2767 = vst [vmem:[%s2883_s24 + $0x8] sm:$0xff] %v2755_v7   ;;  %v1946_v31 = vadd.f32 %v1945_v49, %v1939_v13  ;;  %v1479_v14 = vadd.f32 %v1465_v16, %v1344_v52 }
 0x136   : > { %v1172_v26 = vadd.f32 %v3470_v32, %v926_v53 }
 0x137   : > { %v1725_v18 = vadd.f32 %v1711_v47, %v1479_v14  ;;  %v1919_v47 = vld [vmem:[%s3518_s3] sm:$0x1] }
 0x139   : > { %v1899_v21 = vadd.f32 %v1885_v58, %v1725_v18 }
 0x13a   : > { %v1332_v24 = vpop.f32.mrf.mxu1  ;;  %v1887_v56 = vpop.f32.mrf.mxu0 }
 0x13b   : > { %v1923_v28 = vadd.f32 %v1922_v10, %v1899_v21  ;;  %v1940_v3 = vmul.f32 %v1899_v21, %v1899_v21  ;;  %v1345_v11 = vadd.f32 %v1332_v24, %v1171_v1  ;;  %v1890_v60 = vpop.f32.mrf.mxu2  ;;  %v1718_v48 = vpop.f32.mrf.mxu3 }
 0x13d   : > { %v1947_v25 = vadd.f32 %v1946_v31, %v1940_v3  ;;  %v1480_v8 = vadd.f32 %v1467_v54, %v1345_v11 }
 0x13f   : > { %v1726_v35 = vadd.f32 %v1713_v23, %v1480_v8 }
 0x141   : > { %v1900_v9 = vadd.f32 %v1887_v56, %v1726_v35 }
 0x142   : > { %v1335_v27 = vpop.f32.mrf.mxu1 }
 0x143   : > { %v2760_v5 = vpack.c.bf16 %v1900_v9, %v1899_v21  ;;  %v1924_v22 = vadd.f32 %v1923_v28, %v1900_v9  ;;  %v1941_v57 = vmul.f32 %v1900_v9, %v1900_v9  ;;  %v1346_v16 = vadd.f32 %v1335_v27, %v1172_v26  ;;  %v1892_v51 = vpop.f32.mrf.mxu2 }
 0x145   : > { %2768 = vst [vmem:[%s2883_s24 + $0x10] sm:$0xff] %v2760_v5   ;;  %v1948_v38 = vadd.f32 %v1947_v25, %v1941_v57  ;;  %v1481_v41 = vadd.f32 %v1470_v20, %v1346_v16 }
 0x147   : > { %v1727_v40 = vadd.f32 %v1716_v34, %v1481_v41 }
 0x149   : > { %v1901_v36 = vadd.f32 %v1890_v60, %v1727_v40 }
 0x14a   : > { %v1337_v32 = vpop.f32.mrf.mxu1 }
 0x14b   : > { %v1925_v45 = vadd.f32 %v1924_v22, %v1901_v36  ;;  %v1942_v46 = vmul.f32 %v1901_v36, %v1901_v36  ;;  %v1347_v30 = vadd.f32 %v1337_v32, %v1173_v29 }
 0x14d   : > { %v1949_v39 = vadd.f32 %v1948_v38, %v1942_v46  ;;  %v1482_v43 = vadd.f32 %v1472_v33, %v1347_v30 }
 0x14f   : > { %v1728_v50 = vadd.f32 %v1718_v48, %v1482_v43 }
 0x151   : > { %v1902_v54 = vadd.f32 %v1892_v51, %v1728_v50 }
 0x153   : > { %v2765_v12 = vpack.c.bf16 %v1902_v54, %v1901_v36  ;;  %v1926_v19 = vadd.f32 %v1925_v45, %v1902_v54  ;;  %v1943_v55 = vmul.f32 %v1902_v54, %v1902_v54 }
 0x155   : > { %2769 = vst [vmem:[%s2883_s24 + $0x18] sm:$0xff] %v2765_v12   ;;  %v1927_v42 = vrot.slane %v1926_v19, 4  ;;  %v1950_v59 = vadd.f32 %v1949_v39, %v1943_v55 }
 0x157   : > { %v1928_v61 = vadd.f32 %v1927_v42, %v1926_v19  ;;  %v1951_v15 = vrot.slane %v1950_v59, 4 }
 0x159   : > { %v1929_v17 = vrot.slane %v1928_v61, 2  ;;  %v1952_v62 = vadd.f32 %v1951_v15, %v1950_v59 }
 0x15b   : > { %v1930_v63 = vadd.f32 %v1929_v17, %v1928_v61  ;;  %v1953_v49 = vrot.slane %v1952_v62, 2 }
 0x15d   : > { %v1931_v0 = vrot.slane %v1930_v63, 1  ;;  %v1954_v2 = vadd.f32 %v1953_v49, %v1952_v62 }
 0x15f   : > { %v1932_v4 = vadd.f32 %v1931_v0, %v1930_v63  ;;  %v1955_v20 = vrot.slane %v1954_v2, 1 }
 0x161   : > { %v1933_v7 = vadd.f32 %v1932_v4, %v1919_v47  ;;  %v1956_v10 = vadd.f32 %v1955_v20, %v1954_v2 }
 0x163   : > { %1934 = vst [vmem:[%s3518_s3] sm:$0x1] %v1933_v7  ;;  %v1957_v13 = vadd.f32 %v1956_v10, %v1935_v44 }
 0x165   : > { %1958 = vst [vmem:[%s3519_s4] sm:$0x1] %v1957_v13 }
 0x166 PF: > { %s15_s17 = sadd.s32 1, %s2834_s17   ;;  %s3524_s15 = smov %s2830_s16 }
 0x167   : > { %p12_p6 = scmp.ge.s32.totalorder %s15_s17, 4   ;;  %s3525_s16 = smov %s3527_s18 }
 0x169   :  { %14 = sbr.rel (!%p12_p6) target bundleno = 2 (0x2), region = 99 }

</bundles_post_ra>
